<compile_context>
chip_gen: v5e
topology: v5e:2x2
jax: 0.10.0
libtpu: 0.0.40
codegen_flags: <defaults>
</compile_context>

<pallas_src>
import functools

import jax
import jax.numpy as jnp
from jax import lax
from jax.experimental import pallas as pl
from jax.experimental.pallas import tpu as pltpu

LANE = 128
SUBLANE = 8


def _round_up(n, m):
    return ((n + m - 1) // m) * m


# ------------------------- fused LSTM-stack + FC kernel -------------------------
def _lstm_fc_kernel(x_ref, w_ih_ref, w_hh_ref, b_ref, wfc_ref, bfc_ref, out_ref,
                    seq_scr, xproj_scr):
    """Entire forward pass in one kernel invocation.

    x_ref     : (T*Bp, Fp)      bf16  padded input sequence, time-major, flattened
    w_ih_ref  : (L, Fp, 4*Hp)   bf16  per-layer W_ih^T (gate-slot padded)
    w_hh_ref  : (L, Hp, 4*Hp)   bf16  per-layer W_hh^T (gate-slot padded)
    b_ref     : (L, 1, 4*Hp)    f32   per-layer combined bias (b_ih + b_hh)
    wfc_ref   : (Hp, Op)        bf16  FC weight (transposed)
    bfc_ref   : (1, Op)         f32   FC bias
    out_ref   : (Bp, Op)        f32   fc(hidden[-1])
    seq_scr   : (T*Bp or Bp, Hp)        f32  inter-layer hidden sequence (VMEM resident)
    xproj_scr : (T*Bp, 4*Hp)            f32  hoisted input projection (+bias)
    """
    TB, _ = x_ref.shape
    num_layers, Hp, H4 = w_hh_ref.shape
    Bp = out_ref.shape[0]
    T = TB // Bp
    unroll = min(T, 8)          # bounded unroll: LLO visibility without vreg spills

    h_last = None
    for layer in range(num_layers):             # static; unrolled at trace time
        write_seq = layer < num_layers - 1      # last layer: only final h needed

        # ---- hoisted input projection: one big MXU matmul, M = T*Bp -------------
        if layer == 0:
            lhs = x_ref[...]                               # (T*Bp, Fp) bf16
            w_ih_l = w_ih_ref[layer]                       # (Fp, 4Hp)  bf16
        else:
            lhs = seq_scr[...].astype(jnp.bfloat16)        # (T*Bp, Hp) bf16
            w_ih_l = w_ih_ref[layer, 0:Hp, :]              # (Hp, 4Hp)  bf16
        xproj_scr[...] = (
            jnp.dot(lhs, w_ih_l, preferred_element_type=jnp.float32)
            + b_ref[layer]                                 # bias folded in once
        )

        w_hh_l = w_hh_ref[layer]                           # hoisted (Hp, 4Hp) bf16

        def step(t, carry, w_hh_l=w_hh_l, write_seq=write_seq):
            h, c = carry                                   # (Bp, Hp) f32 vreg carry
            row = pl.multiple_of(t * Bp, Bp)
            gates = xproj_scr[pl.ds(row, Bp), :] + jnp.dot(
                h.astype(jnp.bfloat16), w_hh_l, preferred_element_type=jnp.float32)
            # PyTorch gate order: input, forget, cell(g), output.
            # sigmoid(x) = 0.5*tanh(0.5*x)+0.5  -> 1 EUP push + 2 VPU ops per gate.
            i_g = 0.5 * jnp.tanh(0.5 * gates[:, 0 * Hp:1 * Hp]) + 0.5
            f_g = 0.5 * jnp.tanh(0.5 * gates[:, 1 * Hp:2 * Hp]) + 0.5
            g_g = jnp.tanh(gates[:, 2 * Hp:3 * Hp])
            o_g = 0.5 * jnp.tanh(0.5 * gates[:, 3 * Hp:4 * Hp]) + 0.5
            c_new = f_g * c + i_g * g_g
            h_new = o_g * jnp.tanh(c_new)
            if write_seq:                                  # stays in VMEM
                seq_scr[pl.ds(row, Bp), :] = h_new
            return (h_new, c_new)

        h0 = jnp.zeros((Bp, Hp), jnp.float32)
        c0 = jnp.zeros((Bp, Hp), jnp.float32)
        h_last, _ = lax.fori_loop(0, T, step, (h0, c0), unroll=unroll)

    # Fused final Linear on hidden[-1] (padded lanes of h / rows of wfc are zero).
    out_ref[...] = (
        jnp.dot(h_last.astype(jnp.bfloat16), wfc_ref[...],
                preferred_element_type=jnp.float32)
        + bfc_ref[...]
    )


def _vmem_limit_bytes(T, Bp, Fp, Hp, Op, L, seq_t):
    """Scoped-VMEM limit from the actual footprint (inputs double-buffered by the
    pipeline, scratch single); 2x safety margin, clamped to [32 MiB, 64 MiB]."""
    H4 = 4 * Hp
    inputs = (T * Bp * Fp * 2           # x (bf16)
              + L * Fp * H4 * 2         # w_ih (bf16)
              + L * Hp * H4 * 2         # w_hh (bf16)
              + L * 8 * H4 * 4          # bias (f32, sublane 1 -> 8 pad)
              + Hp * Op * 2             # w_fc (bf16)
              + 8 * Op * 4              # b_fc (f32, sublane pad)
              + Bp * Op * 4)            # out (f32)
    scratch = seq_t * Bp * Hp * 4 + T * Bp * H4 * 4
    needed = 2 * inputs + scratch
    return int(min(64 << 20, max(2 * needed + (4 << 20), 32 << 20)))


def _lstm_fc_forward_padded(xp, w_ih, w_hh, b, w_fc, b_fc):
    TB, Fp = xp.shape
    L, Hp, H4 = w_hh.shape
    Op = w_fc.shape[1]
    Bp = b_fc_rows = None  # (placeholder; Bp passed via closure below)
    return None  # replaced below


def _lstm_fc_forward_padded(xp, w_ih, w_hh, b, w_fc, b_fc, Bp):
    TB, Fp = xp.shape
    L, Hp, H4 = w_hh.shape
    Op = w_fc.shape[1]
    T = TB // Bp
    seq_t = T if L > 1 else 1   # inter-layer scratch unused for a single-layer LSTM

    return pl.pallas_call(
        _lstm_fc_kernel,
        out_shape=jax.ShapeDtypeStruct((Bp, Op), jnp.float32),
        grid_spec=pltpu.PrefetchScalarGridSpec(
            num_scalar_prefetch=0,
            grid=(1,),
            in_specs=[
                pl.BlockSpec((TB, Fp), lambda i: (0, 0)),
                pl.BlockSpec((L, Fp, H4), lambda i: (0, 0, 0)),
                pl.BlockSpec((L, Hp, H4), lambda i: (0, 0, 0)),
                pl.BlockSpec((L, 1, H4), lambda i: (0, 0, 0)),
                pl.BlockSpec((Hp, Op), lambda i: (0, 0)),
                pl.BlockSpec((1, Op), lambda i: (0, 0)),
            ],
            out_specs=pl.BlockSpec((Bp, Op), lambda i: (0, 0)),
            scratch_shapes=[
                pltpu.VMEM((seq_t * Bp, Hp), jnp.float32),   # inter-layer sequence
                pltpu.VMEM((TB, H4), jnp.float32),           # hoisted input projection
            ],
        ),
        compiler_params=pltpu.CompilerParams(
            dimension_semantics=("arbitrary",),   # recurrence: never parallel over time
            vmem_limit_bytes=_vmem_limit_bytes(T, Bp, Fp, Hp, Op, L, seq_t),
        ),
    )(xp, w_ih, w_hh, b, w_fc, b_fc)


# ------------------------------ parameter handling ------------------------------
def init_params(key, input_dim, hidden_dim, num_layers, output_dim):
    """PyTorch-layout params, uniform(-1/sqrt(H), 1/sqrt(H)) like nn.LSTM / nn.Linear."""
    params = {"lstm": [], "fc": None}
    bound = 1.0 / jnp.sqrt(jnp.float32(hidden_dim))
    for layer in range(num_layers):
        d_in = input_dim if layer == 0 else hidden_dim
        key, k1, k2, k3, k4 = jax.random.split(key, 5)
        params["lstm"].append({
            "w_ih": jax.random.uniform(k1, (4 * hidden_dim, d_in), jnp.float32, -bound, bound),
            "w_hh": jax.random.uniform(k2, (4 * hidden_dim, hidden_dim), jnp.float32, -bound, bound),
            "b_ih": jax.random.uniform(k3, (4 * hidden_dim,), jnp.float32, -bound, bound),
            "b_hh": jax.random.uniform(k4, (4 * hidden_dim,), jnp.float32, -bound, bound),
        })
    key, k5, k6 = jax.random.split(key, 3)
    params["fc"] = {
        "w": jax.random.uniform(k5, (output_dim, hidden_dim), jnp.float32, -bound, bound),
        "b": jax.random.uniform(k6, (output_dim,), jnp.float32, -bound, bound),
    }
    return params


def pack_params(params, input_dim, hidden_dim, num_layers, output_dim):
    """Pad + stack weights once: W_ih^T and W_hh^T scattered into lane-aligned gate
    slots (each gate padded H -> Hp). Weights bf16, biases f32."""
    H = hidden_dim
    Hp = _round_up(H, LANE)
    Fp = max(_round_up(input_dim, LANE), Hp)
    Op = _round_up(output_dim, LANE)

    w_ih_stack = jnp.zeros((num_layers, Fp, 4 * Hp), jnp.float32)
    w_hh_stack = jnp.zeros((num_layers, Hp, 4 * Hp), jnp.float32)
    b_stack = jnp.zeros((num_layers, 1, 4 * Hp), jnp.float32)
    for l, lp in enumerate(params["lstm"]):
        w_ih_t = lp["w_ih"].T            # (d_in, 4H)
        w_hh_t = lp["w_hh"].T            # (H, 4H)
        bias = lp["b_ih"] + lp["b_hh"]   # (4H,)
        d_in = w_ih_t.shape[0]
        for g in range(4):               # scatter gate g into its padded Hp slot
            w_ih_stack = w_ih_stack.at[l, 0:d_in, g * Hp:g * Hp + H].set(
                w_ih_t[:, g * H:(g + 1) * H])
            w_hh_stack = w_hh_stack.at[l, 0:H, g * Hp:g * Hp + H].set(
                w_hh_t[:, g * H:(g + 1) * H])
            b_stack = b_stack.at[l, 0, g * Hp:g * Hp + H].set(bias[g * H:(g + 1) * H])

    w_fc_p = jnp.zeros((Hp, Op), jnp.float32).at[0:H, 0:output_dim].set(params["fc"]["w"].T)
    b_fc_p = jnp.zeros((1, Op), jnp.float32).at[0, 0:output_dim].set(params["fc"]["b"])

    return {
        "w_ih": w_ih_stack.astype(jnp.bfloat16),
        "w_hh": w_hh_stack.astype(jnp.bfloat16),
        "b": b_stack,                            # bias kept f32
        "w_fc": w_fc_p.astype(jnp.bfloat16),
        "b_fc": b_fc_p,
    }


# --------------------------------- model wrapper ---------------------------------
@functools.partial(jax.jit, static_argnames=("output_dim",))
def lstm_model_forward(x_btd, packed, *, output_dim):
    """x_btd: (B, T, input_dim), batch_first like the PyTorch module."""
    B, T, D = x_btd.shape
    w_ih = packed["w_ih"]
    L, Fp, H4 = w_ih.shape
    # Per-step f32 state tiles are (8,128)-aligned; 16-row padding only pays off for
    # larger batches (bf16 matmul LHS packing) — keep the minimum for B=2.
    Bp = _round_up(B, SUBLANE)

    # Build the padded input directly in bf16 (no padded f32 intermediate in HBM).
    xt = jnp.transpose(x_btd, (1, 0, 2)).astype(jnp.bfloat16)          # (T, B, D)
    xp = jnp.zeros((T, Bp, Fp), jnp.bfloat16).at[:, :B, :D].set(xt)
    xp = xp.reshape(T * Bp, Fp)                                        # flat, time-major

    out_p = _lstm_fc_forward_padded(
        xp, w_ih, packed["w_hh"], packed["b"], packed["w_fc"], packed["b_fc"], Bp)
    return out_p[:B, :output_dim]


# ------------------------------- pure-JAX reference -------------------------------
def _reference_forward(x_btd, params):
    """Same math with bf16 weight/operand rounding emulated, f32 state/accumulation."""
    def as_bf16(v):
        return v.astype(jnp.bfloat16).astype(jnp.float32)

    seq = as_bf16(jnp.transpose(x_btd, (1, 0, 2)).astype(jnp.float32))  # (T, B, D)
    h_last = None
    for lp in params["lstm"]:
        w_ih_t = as_bf16(lp["w_ih"].T)
        w_hh_t = as_bf16(lp["w_hh"].T)
        bias = (lp["b_ih"] + lp["b_hh"])[None, :]
        H = lp["w_hh"].shape[1]
        B = seq.shape[1]
        h0 = jnp.zeros((B, H), jnp.float32)
        c0 = jnp.zeros((B, H), jnp.float32)

        def step(carry, x_t, w_ih_t=w_ih_t, w_hh_t=w_hh_t, bias=bias, H=H):
            h, c = carry
            gates = x_t @ w_ih_t + as_bf16(h) @ w_hh_t + bias
            i = jax.nn.sigmoid(gates[:, 0 * H:1 * H])
            f = jax.nn.sigmoid(gates[:, 1 * H:2 * H])
            g = jnp.tanh(gates[:, 2 * H:3 * H])
            o = jax.nn.sigmoid(gates[:, 3 * H:4 * H])
            c_new = f * c + i * g
            h_new = o * jnp.tanh(c_new)
            return (h_new, c_new), as_bf16(h_new)

        (h_last, _), seq = jax.lax.scan(step, (h0, c0), seq)

    return as_bf16(h_last) @ as_bf16(params["fc"]["w"].T) + params["fc"]["b"][None, :]


if __name__ == "__main__":
    batch, seq_len = 2, 8
    input_dim, hidden_dim, num_layers, output_dim = 16, 32, 2, 4

    key = jax.random.PRNGKey(0)
    key, kx = jax.random.split(key)
    x = jax.random.normal(kx, (batch, seq_len, input_dim), jnp.float32)

    params = init_params(key, input_dim, hidden_dim, num_layers, output_dim)
    packed = pack_params(params, input_dim, hidden_dim, num_layers, output_dim)

    out = lstm_model_forward(x, packed, output_dim=output_dim)
    out = jax.block_until_ready(out)

    ref = _reference_forward(x, params)
    assert out.shape == (batch, output_dim)
    assert jnp.allclose(out, ref, atol=1e-2, rtol=1e-2), \
        f"max abs err = {float(jnp.max(jnp.abs(out - ref)))}"

    print("KERNEL_OK")
</pallas_src>

<mosaic_0001>
module attributes {stable_mosaic.version = 11 : i64} {
  func.func @_lstm_fc_kernel(%arg0: i32, %arg1: memref<64x128xbf16, #tpu.memory_space<vmem>>, %arg2: memref<2x128x512xbf16, #tpu.memory_space<vmem>>, %arg3: memref<2x128x512xbf16, #tpu.memory_space<vmem>>, %arg4: memref<2x1x512xf32, #tpu.memory_space<vmem>>, %arg5: memref<128x128xbf16, #tpu.memory_space<vmem>>, %arg6: memref<1x128xf32, #tpu.memory_space<vmem>>, %arg7: memref<8x128xf32, #tpu.memory_space<vmem>>, %arg8: memref<64x128xf32, #tpu.memory_space<vmem>>, %arg9: memref<64x512xf32, #tpu.memory_space<vmem>>) attributes {dimension_semantics = [#tpu.dimension_semantics<arbitrary>], iteration_bounds = array<i64: 1>, scalar_prefetch = 0 : i64, scratch_operands = 2 : i64, tpu.core_type = #tpu.core_type<tc>, window_params = [{pipeline_mode = #tpu.pipeline_mode<synchronous>, transform_indices = @transform_0, window_bounds = array<i64: 64, 128>}, {pipeline_mode = #tpu.pipeline_mode<synchronous>, transform_indices = @transform_1, window_bounds = array<i64: 2, 128, 512>}, {pipeline_mode = #tpu.pipeline_mode<synchronous>, transform_indices = @transform_2, window_bounds = array<i64: 2, 128, 512>}, {pipeline_mode = #tpu.pipeline_mode<synchronous>, transform_indices = @transform_3, window_bounds = array<i64: 2, 1, 512>}, {pipeline_mode = #tpu.pipeline_mode<synchronous>, transform_indices = @transform_4, window_bounds = array<i64: 128, 128>}, {pipeline_mode = #tpu.pipeline_mode<synchronous>, transform_indices = @transform_5, window_bounds = array<i64: 1, 128>}, {pipeline_mode = #tpu.pipeline_mode<synchronous>, transform_indices = @transform_6, window_bounds = array<i64: 8, 128>}]} {
    %c0 = arith.constant 0 : index
    %c0_0 = arith.constant 0 : index
    %0 = vector.load %arg1[%c0, %c0_0] : memref<64x128xbf16, #tpu.memory_space<vmem>>, vector<64x128xbf16>
    %c0_1 = arith.constant 0 : index
    %c0_2 = arith.constant 0 : index
    %c0_3 = arith.constant 0 : index
    %1 = vector.load %arg2[%c0_1, %c0_2, %c0_3] : memref<2x128x512xbf16, #tpu.memory_space<vmem>>, vector<1x128x512xbf16>
    %2 = vector.shape_cast %1 : vector<1x128x512xbf16> to vector<128x512xbf16>
    %cst = arith.constant dense<0.000000e+00> : vector<64x512xf32>
    %3 = tpu.matmul %0, %2, %cst {dimension_numbers = #tpu.dot_dimension_numbers<[1], [0], [0], [1], [0, 0, 1, 1], [], []>} : vector<64x128xbf16>, vector<128x512xbf16>, vector<64x512xf32> -> vector<64x512xf32>
    %c0_4 = arith.constant 0 : index
    %c0_5 = arith.constant 0 : index
    %c0_6 = arith.constant 0 : index
    %4 = vector.load %arg4[%c0_4, %c0_5, %c0_6] : memref<2x1x512xf32, #tpu.memory_space<vmem>>, vector<1x1x512xf32>
    %5 = vector.shape_cast %4 : vector<1x1x512xf32> to vector<1x512xf32>
    %6 = vector.broadcast %5 : vector<1x512xf32> to vector<64x512xf32>
    %7 = arith.addf %3, %6 : vector<64x512xf32>
    %c0_7 = arith.constant 0 : index
    %c0_8 = arith.constant 0 : index
    %8 = vector.load %arg9[%c0_7, %c0_8] : memref<64x512xf32, #tpu.memory_space<vmem>>, vector<64x512xf32>
    tpu.vector_store %arg9[%c0_7, %c0_8], %7 {strides = array<i32>} : memref<64x512xf32, #tpu.memory_space<vmem>>, vector<64x512xf32>,
    %c0_9 = arith.constant 0 : index
    %c0_10 = arith.constant 0 : index
    %c0_11 = arith.constant 0 : index
    %9 = vector.load %arg3[%c0_9, %c0_10, %c0_11] : memref<2x128x512xbf16, #tpu.memory_space<vmem>>, vector<1x128x512xbf16>
    %10 = vector.shape_cast %9 : vector<1x128x512xbf16> to vector<128x512xbf16>
    %cst_12 = arith.constant 0.000000e+00 : f32
    %11 = vector.broadcast %cst_12 : f32 to vector<8x128xf32>
    %cst_13 = arith.constant 0.000000e+00 : f32
    %12 = vector.broadcast %cst_13 : f32 to vector<8x128xf32>
    %c0_i32 = arith.constant 0 : i32
    %c8_i32 = arith.constant 8 : i32
    %13 = arith.muli %c0_i32, %c8_i32 : i32
    %14 = tpu.assume_multiple %13, 8 : i32
    %15 = arith.index_cast %14 : i32 to index
    %c0_14 = arith.constant 0 : index
    %16 = vector.load %arg9[%15, %c0_14] : memref<64x512xf32, #tpu.memory_space<vmem>>, vector<8x512xf32>
    %17 = arith.truncf %11 : vector<8x128xf32> to vector<8x128xbf16>
    %cst_15 = arith.constant dense<0.000000e+00> : vector<8x512xf32>
    %18 = tpu.matmul %17, %10, %cst_15 {dimension_numbers = #tpu.dot_dimension_numbers<[1], [0], [0], [1], [0, 0, 1, 1], [], []>} : vector<8x128xbf16>, vector<128x512xbf16>, vector<8x512xf32> -> vector<8x512xf32>
    %19 = arith.addf %16, %18 : vector<8x512xf32>
    %20 = vector.extract_strided_slice %19 {offsets = [0, 0], sizes = [8, 128], strides = [1, 1]} : vector<8x512xf32> to vector<8x128xf32>
    %cst_16 = arith.constant 5.000000e-01 : f32
    %21 = vector.broadcast %cst_16 : f32 to vector<8x128xf32>
    %22 = arith.mulf %21, %20 : vector<8x128xf32>
    %23 = math.tanh %22 : vector<8x128xf32>
    %cst_17 = arith.constant 5.000000e-01 : f32
    %24 = vector.broadcast %cst_17 : f32 to vector<8x128xf32>
    %25 = arith.mulf %24, %23 : vector<8x128xf32>
    %cst_18 = arith.constant 5.000000e-01 : f32
    %26 = vector.broadcast %cst_18 : f32 to vector<8x128xf32>
    %27 = arith.addf %25, %26 : vector<8x128xf32>
    %28 = vector.extract_strided_slice %19 {offsets = [0, 128], sizes = [8, 128], strides = [1, 1]} : vector<8x512xf32> to vector<8x128xf32>
    %cst_19 = arith.constant 5.000000e-01 : f32
    %29 = vector.broadcast %cst_19 : f32 to vector<8x128xf32>
    %30 = arith.mulf %29, %28 : vector<8x128xf32>
    %31 = math.tanh %30 : vector<8x128xf32>
    %cst_20 = arith.constant 5.000000e-01 : f32
    %32 = vector.broadcast %cst_20 : f32 to vector<8x128xf32>
    %33 = arith.mulf %32, %31 : vector<8x128xf32>
    %cst_21 = arith.constant 5.000000e-01 : f32
    %34 = vector.broadcast %cst_21 : f32 to vector<8x128xf32>
    %35 = arith.addf %33, %34 : vector<8x128xf32>
    %36 = vector.extract_strided_slice %19 {offsets = [0, 256], sizes = [8, 128], strides = [1, 1]} : vector<8x512xf32> to vector<8x128xf32>
    %37 = math.tanh %36 : vector<8x128xf32>
    %38 = vector.extract_strided_slice %19 {offsets = [0, 384], sizes = [8, 128], strides = [1, 1]} : vector<8x512xf32> to vector<8x128xf32>
    %cst_22 = arith.constant 5.000000e-01 : f32
    %39 = vector.broadcast %cst_22 : f32 to vector<8x128xf32>
    %40 = arith.mulf %39, %38 : vector<8x128xf32>
    %41 = math.tanh %40 : vector<8x128xf32>
    %cst_23 = arith.constant 5.000000e-01 : f32
    %42 = vector.broadcast %cst_23 : f32 to vector<8x128xf32>
    %43 = arith.mulf %42, %41 : vector<8x128xf32>
    %cst_24 = arith.constant 5.000000e-01 : f32
    %44 = vector.broadcast %cst_24 : f32 to vector<8x128xf32>
    %45 = arith.addf %43, %44 : vector<8x128xf32>
    %46 = arith.mulf %35, %12 : vector<8x128xf32>
    %47 = arith.mulf %27, %37 : vector<8x128xf32>
    %48 = arith.addf %46, %47 : vector<8x128xf32>
    %49 = math.tanh %48 : vector<8x128xf32>
    %50 = arith.mulf %45, %49 : vector<8x128xf32>
    %51 = arith.index_cast %14 : i32 to index
    %c0_25 = arith.constant 0 : index
    %52 = vector.load %arg8[%51, %c0_25] : memref<64x128xf32, #tpu.memory_space<vmem>>, vector<8x128xf32>
    tpu.vector_store %arg8[%51, %c0_25], %50 {strides = array<i32>} : memref<64x128xf32, #tpu.memory_space<vmem>>, vector<8x128xf32>,
    %c1_i32 = arith.constant 1 : i32
    %c8_i32_26 = arith.constant 8 : i32
    %53 = arith.muli %c1_i32, %c8_i32_26 : i32
    %54 = tpu.assume_multiple %53, 8 : i32
    %55 = arith.index_cast %54 : i32 to index
    %c0_27 = arith.constant 0 : index
    %56 = vector.load %arg9[%55, %c0_27] : memref<64x512xf32, #tpu.memory_space<vmem>>, vector<8x512xf32>
    %57 = arith.truncf %50 : vector<8x128xf32> to vector<8x128xbf16>
    %cst_28 = arith.constant dense<0.000000e+00> : vector<8x512xf32>
    %58 = tpu.matmul %57, %10, %cst_28 {dimension_numbers = #tpu.dot_dimension_numbers<[1], [0], [0], [1], [0, 0, 1, 1], [], []>} : vector<8x128xbf16>, vector<128x512xbf16>, vector<8x512xf32> -> vector<8x512xf32>
    %59 = arith.addf %56, %58 : vector<8x512xf32>
    %60 = vector.extract_strided_slice %59 {offsets = [0, 0], sizes = [8, 128], strides = [1, 1]} : vector<8x512xf32> to vector<8x128xf32>
    %cst_29 = arith.constant 5.000000e-01 : f32
    %61 = vector.broadcast %cst_29 : f32 to vector<8x128xf32>
    %62 = arith.mulf %61, %60 : vector<8x128xf32>
    %63 = math.tanh %62 : vector<8x128xf32>
    %cst_30 = arith.constant 5.000000e-01 : f32
    %64 = vector.broadcast %cst_30 : f32 to vector<8x128xf32>
    %65 = arith.mulf %64, %63 : vector<8x128xf32>
    %cst_31 = arith.constant 5.000000e-01 : f32
    %66 = vector.broadcast %cst_31 : f32 to vector<8x128xf32>
    %67 = arith.addf %65, %66 : vector<8x128xf32>
    %68 = vector.extract_strided_slice %59 {offsets = [0, 128], sizes = [8, 128], strides = [1, 1]} : vector<8x512xf32> to vector<8x128xf32>
    %cst_32 = arith.constant 5.000000e-01 : f32
    %69 = vector.broadcast %cst_32 : f32 to vector<8x128xf32>
    %70 = arith.mulf %69, %68 : vector<8x128xf32>
    %71 = math.tanh %70 : vector<8x128xf32>
    %cst_33 = arith.constant 5.000000e-01 : f32
    %72 = vector.broadcast %cst_33 : f32 to vector<8x128xf32>
    %73 = arith.mulf %72, %71 : vector<8x128xf32>
    %cst_34 = arith.constant 5.000000e-01 : f32
    %74 = vector.broadcast %cst_34 : f32 to vector<8x128xf32>
    %75 = arith.addf %73, %74 : vector<8x128xf32>
    %76 = vector.extract_strided_slice %59 {offsets = [0, 256], sizes = [8, 128], strides = [1, 1]} : vector<8x512xf32> to vector<8x128xf32>
    %77 = math.tanh %76 : vector<8x128xf32>
    %78 = vector.extract_strided_slice %59 {offsets = [0, 384], sizes = [8, 128], strides = [1, 1]} : vector<8x512xf32> to vector<8x128xf32>
    %cst_35 = arith.constant 5.000000e-01 : f32
    %79 = vector.broadcast %cst_35 : f32 to vector<8x128xf32>
    %80 = arith.mulf %79, %78 : vector<8x128xf32>
    %81 = math.tanh %80 : vector<8x128xf32>
    %cst_36 = arith.constant 5.000000e-01 : f32
    %82 = vector.broadcast %cst_36 : f32 to vector<8x128xf32>
    %83 = arith.mulf %82, %81 : vector<8x128xf32>
    %cst_37 = arith.constant 5.000000e-01 : f32
    %84 = vector.broadcast %cst_37 : f32 to vector<8x128xf32>
    %85 = arith.addf %83, %84 : vector<8x128xf32>
    %86 = arith.mulf %75, %48 : vector<8x128xf32>
    %87 = arith.mulf %67, %77 : vector<8x128xf32>
    %88 = arith.addf %86, %87 : vector<8x128xf32>
    %89 = math.tanh %88 : vector<8x128xf32>
    %90 = arith.mulf %85, %89 : vector<8x128xf32>
    %91 = arith.index_cast %54 : i32 to index
    %c0_38 = arith.constant 0 : index
    %92 = vector.load %arg8[%91, %c0_38] : memref<64x128xf32, #tpu.memory_space<vmem>>, vector<8x128xf32>
    tpu.vector_store %arg8[%91, %c0_38], %90 {strides = array<i32>} : memref<64x128xf32, #tpu.memory_space<vmem>>, vector<8x128xf32>,
    %c2_i32 = arith.constant 2 : i32
    %c8_i32_39 = arith.constant 8 : i32
    %93 = arith.muli %c2_i32, %c8_i32_39 : i32
    %94 = tpu.assume_multiple %93, 8 : i32
    %95 = arith.index_cast %94 : i32 to index
    %c0_40 = arith.constant 0 : index
    %96 = vector.load %arg9[%95, %c0_40] : memref<64x512xf32, #tpu.memory_space<vmem>>, vector<8x512xf32>
    %97 = arith.truncf %90 : vector<8x128xf32> to vector<8x128xbf16>
    %cst_41 = arith.constant dense<0.000000e+00> : vector<8x512xf32>
    %98 = tpu.matmul %97, %10, %cst_41 {dimension_numbers = #tpu.dot_dimension_numbers<[1], [0], [0], [1], [0, 0, 1, 1], [], []>} : vector<8x128xbf16>, vector<128x512xbf16>, vector<8x512xf32> -> vector<8x512xf32>
    %99 = arith.addf %96, %98 : vector<8x512xf32>
    %100 = vector.extract_strided_slice %99 {offsets = [0, 0], sizes = [8, 128], strides = [1, 1]} : vector<8x512xf32> to vector<8x128xf32>
    %cst_42 = arith.constant 5.000000e-01 : f32
    %101 = vector.broadcast %cst_42 : f32 to vector<8x128xf32>
    %102 = arith.mulf %101, %100 : vector<8x128xf32>
    %103 = math.tanh %102 : vector<8x128xf32>
    %cst_43 = arith.constant 5.000000e-01 : f32
    %104 = vector.broadcast %cst_43 : f32 to vector<8x128xf32>
    %105 = arith.mulf %104, %103 : vector<8x128xf32>
    %cst_44 = arith.constant 5.000000e-01 : f32
    %106 = vector.broadcast %cst_44 : f32 to vector<8x128xf32>
    %107 = arith.addf %105, %106 : vector<8x128xf32>
    %108 = vector.extract_strided_slice %99 {offsets = [0, 128], sizes = [8, 128], strides = [1, 1]} : vector<8x512xf32> to vector<8x128xf32>
    %cst_45 = arith.constant 5.000000e-01 : f32
    %109 = vector.broadcast %cst_45 : f32 to vector<8x128xf32>
    %110 = arith.mulf %109, %108 : vector<8x128xf32>
    %111 = math.tanh %110 : vector<8x128xf32>
    %cst_46 = arith.constant 5.000000e-01 : f32
    %112 = vector.broadcast %cst_46 : f32 to vector<8x128xf32>
    %113 = arith.mulf %112, %111 : vector<8x128xf32>
    %cst_47 = arith.constant 5.000000e-01 : f32
    %114 = vector.broadcast %cst_47 : f32 to vector<8x128xf32>
    %115 = arith.addf %113, %114 : vector<8x128xf32>
    %116 = vector.extract_strided_slice %99 {offsets = [0, 256], sizes = [8, 128], strides = [1, 1]} : vector<8x512xf32> to vector<8x128xf32>
    %117 = math.tanh %116 : vector<8x128xf32>
    %118 = vector.extract_strided_slice %99 {offsets = [0, 384], sizes = [8, 128], strides = [1, 1]} : vector<8x512xf32> to vector<8x128xf32>
    %cst_48 = arith.constant 5.000000e-01 : f32
    %119 = vector.broadcast %cst_48 : f32 to vector<8x128xf32>
    %120 = arith.mulf %119, %118 : vector<8x128xf32>
    %121 = math.tanh %120 : vector<8x128xf32>
    %cst_49 = arith.constant 5.000000e-01 : f32
    %122 = vector.broadcast %cst_49 : f32 to vector<8x128xf32>
    %123 = arith.mulf %122, %121 : vector<8x128xf32>
    %cst_50 = arith.constant 5.000000e-01 : f32
    %124 = vector.broadcast %cst_50 : f32 to vector<8x128xf32>
    %125 = arith.addf %123, %124 : vector<8x128xf32>
    %126 = arith.mulf %115, %88 : vector<8x128xf32>
    %127 = arith.mulf %107, %117 : vector<8x128xf32>
    %128 = arith.addf %126, %127 : vector<8x128xf32>
    %129 = math.tanh %128 : vector<8x128xf32>
    %130 = arith.mulf %125, %129 : vector<8x128xf32>
    %131 = arith.index_cast %94 : i32 to index
    %c0_51 = arith.constant 0 : index
    %132 = vector.load %arg8[%131, %c0_51] : memref<64x128xf32, #tpu.memory_space<vmem>>, vector<8x128xf32>
    tpu.vector_store %arg8[%131, %c0_51], %130 {strides = array<i32>} : memref<64x128xf32, #tpu.memory_space<vmem>>, vector<8x128xf32>,
    %c3_i32 = arith.constant 3 : i32
    %c8_i32_52 = arith.constant 8 : i32
    %133 = arith.muli %c3_i32, %c8_i32_52 : i32
    %134 = tpu.assume_multiple %133, 8 : i32
    %135 = arith.index_cast %134 : i32 to index
    %c0_53 = arith.constant 0 : index
    %136 = vector.load %arg9[%135, %c0_53] : memref<64x512xf32, #tpu.memory_space<vmem>>, vector<8x512xf32>
    %137 = arith.truncf %130 : vector<8x128xf32> to vector<8x128xbf16>
    %cst_54 = arith.constant dense<0.000000e+00> : vector<8x512xf32>
    %138 = tpu.matmul %137, %10, %cst_54 {dimension_numbers = #tpu.dot_dimension_numbers<[1], [0], [0], [1], [0, 0, 1, 1], [], []>} : vector<8x128xbf16>, vector<128x512xbf16>, vector<8x512xf32> -> vector<8x512xf32>
    %139 = arith.addf %136, %138 : vector<8x512xf32>
    %140 = vector.extract_strided_slice %139 {offsets = [0, 0], sizes = [8, 128], strides = [1, 1]} : vector<8x512xf32> to vector<8x128xf32>
    %cst_55 = arith.constant 5.000000e-01 : f32
    %141 = vector.broadcast %cst_55 : f32 to vector<8x128xf32>
    %142 = arith.mulf %141, %140 : vector<8x128xf32>
    %143 = math.tanh %142 : vector<8x128xf32>
    %cst_56 = arith.constant 5.000000e-01 : f32
    %144 = vector.broadcast %cst_56 : f32 to vector<8x128xf32>
    %145 = arith.mulf %144, %143 : vector<8x128xf32>
    %cst_57 = arith.constant 5.000000e-01 : f32
    %146 = vector.broadcast %cst_57 : f32 to vector<8x128xf32>
    %147 = arith.addf %145, %146 : vector<8x128xf32>
    %148 = vector.extract_strided_slice %139 {offsets = [0, 128], sizes = [8, 128], strides = [1, 1]} : vector<8x512xf32> to vector<8x128xf32>
    %cst_58 = arith.constant 5.000000e-01 : f32
    %149 = vector.broadcast %cst_58 : f32 to vector<8x128xf32>
    %150 = arith.mulf %149, %148 : vector<8x128xf32>
    %151 = math.tanh %150 : vector<8x128xf32>
    %cst_59 = arith.constant 5.000000e-01 : f32
    %152 = vector.broadcast %cst_59 : f32 to vector<8x128xf32>
    %153 = arith.mulf %152, %151 : vector<8x128xf32>
    %cst_60 = arith.constant 5.000000e-01 : f32
    %154 = vector.broadcast %cst_60 : f32 to vector<8x128xf32>
    %155 = arith.addf %153, %154 : vector<8x128xf32>
    %156 = vector.extract_strided_slice %139 {offsets = [0, 256], sizes = [8, 128], strides = [1, 1]} : vector<8x512xf32> to vector<8x128xf32>
    %157 = math.tanh %156 : vector<8x128xf32>
    %158 = vector.extract_strided_slice %139 {offsets = [0, 384], sizes = [8, 128], strides = [1, 1]} : vector<8x512xf32> to vector<8x128xf32>
    %cst_61 = arith.constant 5.000000e-01 : f32
    %159 = vector.broadcast %cst_61 : f32 to vector<8x128xf32>
    %160 = arith.mulf %159, %158 : vector<8x128xf32>
    %161 = math.tanh %160 : vector<8x128xf32>
    %cst_62 = arith.constant 5.000000e-01 : f32
    %162 = vector.broadcast %cst_62 : f32 to vector<8x128xf32>
    %163 = arith.mulf %162, %161 : vector<8x128xf32>
    %cst_63 = arith.constant 5.000000e-01 : f32
    %164 = vector.broadcast %cst_63 : f32 to vector<8x128xf32>
    %165 = arith.addf %163, %164 : vector<8x128xf32>
    %166 = arith.mulf %155, %128 : vector<8x128xf32>
    %167 = arith.mulf %147, %157 : vector<8x128xf32>
    %168 = arith.addf %166, %167 : vector<8x128xf32>
    %169 = math.tanh %168 : vector<8x128xf32>
    %170 = arith.mulf %165, %169 : vector<8x128xf32>
    %171 = arith.index_cast %134 : i32 to index
    %c0_64 = arith.constant 0 : index
    %172 = vector.load %arg8[%171, %c0_64] : memref<64x128xf32, #tpu.memory_space<vmem>>, vector<8x128xf32>
    tpu.vector_store %arg8[%171, %c0_64], %170 {strides = array<i32>} : memref<64x128xf32, #tpu.memory_space<vmem>>, vector<8x128xf32>,
    %c4_i32 = arith.constant 4 : i32
    %c8_i32_65 = arith.constant 8 : i32
    %173 = arith.muli %c4_i32, %c8_i32_65 : i32
    %174 = tpu.assume_multiple %173, 8 : i32
    %175 = arith.index_cast %174 : i32 to index
    %c0_66 = arith.constant 0 : index
    %176 = vector.load %arg9[%175, %c0_66] : memref<64x512xf32, #tpu.memory_space<vmem>>, vector<8x512xf32>
    %177 = arith.truncf %170 : vector<8x128xf32> to vector<8x128xbf16>
    %cst_67 = arith.constant dense<0.000000e+00> : vector<8x512xf32>
    %178 = tpu.matmul %177, %10, %cst_67 {dimension_numbers = #tpu.dot_dimension_numbers<[1], [0], [0], [1], [0, 0, 1, 1], [], []>} : vector<8x128xbf16>, vector<128x512xbf16>, vector<8x512xf32> -> vector<8x512xf32>
    %179 = arith.addf %176, %178 : vector<8x512xf32>
    %180 = vector.extract_strided_slice %179 {offsets = [0, 0], sizes = [8, 128], strides = [1, 1]} : vector<8x512xf32> to vector<8x128xf32>
    %cst_68 = arith.constant 5.000000e-01 : f32
    %181 = vector.broadcast %cst_68 : f32 to vector<8x128xf32>
    %182 = arith.mulf %181, %180 : vector<8x128xf32>
    %183 = math.tanh %182 : vector<8x128xf32>
    %cst_69 = arith.constant 5.000000e-01 : f32
    %184 = vector.broadcast %cst_69 : f32 to vector<8x128xf32>
    %185 = arith.mulf %184, %183 : vector<8x128xf32>
    %cst_70 = arith.constant 5.000000e-01 : f32
    %186 = vector.broadcast %cst_70 : f32 to vector<8x128xf32>
    %187 = arith.addf %185, %186 : vector<8x128xf32>
    %188 = vector.extract_strided_slice %179 {offsets = [0, 128], sizes = [8, 128], strides = [1, 1]} : vector<8x512xf32> to vector<8x128xf32>
    %cst_71 = arith.constant 5.000000e-01 : f32
    %189 = vector.broadcast %cst_71 : f32 to vector<8x128xf32>
    %190 = arith.mulf %189, %188 : vector<8x128xf32>
    %191 = math.tanh %190 : vector<8x128xf32>
    %cst_72 = arith.constant 5.000000e-01 : f32
    %192 = vector.broadcast %cst_72 : f32 to vector<8x128xf32>
    %193 = arith.mulf %192, %191 : vector<8x128xf32>
    %cst_73 = arith.constant 5.000000e-01 : f32
    %194 = vector.broadcast %cst_73 : f32 to vector<8x128xf32>
    %195 = arith.addf %193, %194 : vector<8x128xf32>
    %196 = vector.extract_strided_slice %179 {offsets = [0, 256], sizes = [8, 128], strides = [1, 1]} : vector<8x512xf32> to vector<8x128xf32>
    %197 = math.tanh %196 : vector<8x128xf32>
    %198 = vector.extract_strided_slice %179 {offsets = [0, 384], sizes = [8, 128], strides = [1, 1]} : vector<8x512xf32> to vector<8x128xf32>
    %cst_74 = arith.constant 5.000000e-01 : f32
    %199 = vector.broadcast %cst_74 : f32 to vector<8x128xf32>
    %200 = arith.mulf %199, %198 : vector<8x128xf32>
    %201 = math.tanh %200 : vector<8x128xf32>
    %cst_75 = arith.constant 5.000000e-01 : f32
    %202 = vector.broadcast %cst_75 : f32 to vector<8x128xf32>
    %203 = arith.mulf %202, %201 : vector<8x128xf32>
    %cst_76 = arith.constant 5.000000e-01 : f32
    %204 = vector.broadcast %cst_76 : f32 to vector<8x128xf32>
    %205 = arith.addf %203, %204 : vector<8x128xf32>
    %206 = arith.mulf %195, %168 : vector<8x128xf32>
    %207 = arith.mulf %187, %197 : vector<8x128xf32>
    %208 = arith.addf %206, %207 : vector<8x128xf32>
    %209 = math.tanh %208 : vector<8x128xf32>
    %210 = arith.mulf %205, %209 : vector<8x128xf32>
    %211 = arith.index_cast %174 : i32 to index
    %c0_77 = arith.constant 0 : index
    %212 = vector.load %arg8[%211, %c0_77] : memref<64x128xf32, #tpu.memory_space<vmem>>, vector<8x128xf32>
    tpu.vector_store %arg8[%211, %c0_77], %210 {strides = array<i32>} : memref<64x128xf32, #tpu.memory_space<vmem>>, vector<8x128xf32>,
    %c5_i32 = arith.constant 5 : i32
    %c8_i32_78 = arith.constant 8 : i32
    %213 = arith.muli %c5_i32, %c8_i32_78 : i32
    %214 = tpu.assume_multiple %213, 8 : i32
    %215 = arith.index_cast %214 : i32 to index
    %c0_79 = arith.constant 0 : index
    %216 = vector.load %arg9[%215, %c0_79] : memref<64x512xf32, #tpu.memory_space<vmem>>, vector<8x512xf32>
    %217 = arith.truncf %210 : vector<8x128xf32> to vector<8x128xbf16>
    %cst_80 = arith.constant dense<0.000000e+00> : vector<8x512xf32>
    %218 = tpu.matmul %217, %10, %cst_80 {dimension_numbers = #tpu.dot_dimension_numbers<[1], [0], [0], [1], [0, 0, 1, 1], [], []>} : vector<8x128xbf16>, vector<128x512xbf16>, vector<8x512xf32> -> vector<8x512xf32>
    %219 = arith.addf %216, %218 : vector<8x512xf32>
    %220 = vector.extract_strided_slice %219 {offsets = [0, 0], sizes = [8, 128], strides = [1, 1]} : vector<8x512xf32> to vector<8x128xf32>
    %cst_81 = arith.constant 5.000000e-01 : f32
    %221 = vector.broadcast %cst_81 : f32 to vector<8x128xf32>
    %222 = arith.mulf %221, %220 : vector<8x128xf32>
    %223 = math.tanh %222 : vector<8x128xf32>
    %cst_82 = arith.constant 5.000000e-01 : f32
    %224 = vector.broadcast %cst_82 : f32 to vector<8x128xf32>
    %225 = arith.mulf %224, %223 : vector<8x128xf32>
    %cst_83 = arith.constant 5.000000e-01 : f32
    %226 = vector.broadcast %cst_83 : f32 to vector<8x128xf32>
    %227 = arith.addf %225, %226 : vector<8x128xf32>
    %228 = vector.extract_strided_slice %219 {offsets = [0, 128], sizes = [8, 128], strides = [1, 1]} : vector<8x512xf32> to vector<8x128xf32>
    %cst_84 = arith.constant 5.000000e-01 : f32
    %229 = vector.broadcast %cst_84 : f32 to vector<8x128xf32>
    %230 = arith.mulf %229, %228 : vector<8x128xf32>
    %231 = math.tanh %230 : vector<8x128xf32>
    %cst_85 = arith.constant 5.000000e-01 : f32
    %232 = vector.broadcast %cst_85 : f32 to vector<8x128xf32>
    %233 = arith.mulf %232, %231 : vector<8x128xf32>
    %cst_86 = arith.constant 5.000000e-01 : f32
    %234 = vector.broadcast %cst_86 : f32 to vector<8x128xf32>
    %235 = arith.addf %233, %234 : vector<8x128xf32>
    %236 = vector.extract_strided_slice %219 {offsets = [0, 256], sizes = [8, 128], strides = [1, 1]} : vector<8x512xf32> to vector<8x128xf32>
    %237 = math.tanh %236 : vector<8x128xf32>
    %238 = vector.extract_strided_slice %219 {offsets = [0, 384], sizes = [8, 128], strides = [1, 1]} : vector<8x512xf32> to vector<8x128xf32>
    %cst_87 = arith.constant 5.000000e-01 : f32
    %239 = vector.broadcast %cst_87 : f32 to vector<8x128xf32>
    %240 = arith.mulf %239, %238 : vector<8x128xf32>
    %241 = math.tanh %240 : vector<8x128xf32>
    %cst_88 = arith.constant 5.000000e-01 : f32
    %242 = vector.broadcast %cst_88 : f32 to vector<8x128xf32>
    %243 = arith.mulf %242, %241 : vector<8x128xf32>
    %cst_89 = arith.constant 5.000000e-01 : f32
    %244 = vector.broadcast %cst_89 : f32 to vector<8x128xf32>
    %245 = arith.addf %243, %244 : vector<8x128xf32>
    %246 = arith.mulf %235, %208 : vector<8x128xf32>
    %247 = arith.mulf %227, %237 : vector<8x128xf32>
    %248 = arith.addf %246, %247 : vector<8x128xf32>
    %249 = math.tanh %248 : vector<8x128xf32>
    %250 = arith.mulf %245, %249 : vector<8x128xf32>
    %251 = arith.index_cast %214 : i32 to index
    %c0_90 = arith.constant 0 : index
    %252 = vector.load %arg8[%251, %c0_90] : memref<64x128xf32, #tpu.memory_space<vmem>>, vector<8x128xf32>
    tpu.vector_store %arg8[%251, %c0_90], %250 {strides = array<i32>} : memref<64x128xf32, #tpu.memory_space<vmem>>, vector<8x128xf32>,
    %c6_i32 = arith.constant 6 : i32
    %c8_i32_91 = arith.constant 8 : i32
    %253 = arith.muli %c6_i32, %c8_i32_91 : i32
    %254 = tpu.assume_multiple %253, 8 : i32
    %255 = arith.index_cast %254 : i32 to index
    %c0_92 = arith.constant 0 : index
    %256 = vector.load %arg9[%255, %c0_92] : memref<64x512xf32, #tpu.memory_space<vmem>>, vector<8x512xf32>
    %257 = arith.truncf %250 : vector<8x128xf32> to vector<8x128xbf16>
    %cst_93 = arith.constant dense<0.000000e+00> : vector<8x512xf32>
    %258 = tpu.matmul %257, %10, %cst_93 {dimension_numbers = #tpu.dot_dimension_numbers<[1], [0], [0], [1], [0, 0, 1, 1], [], []>} : vector<8x128xbf16>, vector<128x512xbf16>, vector<8x512xf32> -> vector<8x512xf32>
    %259 = arith.addf %256, %258 : vector<8x512xf32>
    %260 = vector.extract_strided_slice %259 {offsets = [0, 0], sizes = [8, 128], strides = [1, 1]} : vector<8x512xf32> to vector<8x128xf32>
    %cst_94 = arith.constant 5.000000e-01 : f32
    %261 = vector.broadcast %cst_94 : f32 to vector<8x128xf32>
    %262 = arith.mulf %261, %260 : vector<8x128xf32>
    %263 = math.tanh %262 : vector<8x128xf32>
    %cst_95 = arith.constant 5.000000e-01 : f32
    %264 = vector.broadcast %cst_95 : f32 to vector<8x128xf32>
    %265 = arith.mulf %264, %263 : vector<8x128xf32>
    %cst_96 = arith.constant 5.000000e-01 : f32
    %266 = vector.broadcast %cst_96 : f32 to vector<8x128xf32>
    %267 = arith.addf %265, %266 : vector<8x128xf32>
    %268 = vector.extract_strided_slice %259 {offsets = [0, 128], sizes = [8, 128], strides = [1, 1]} : vector<8x512xf32> to vector<8x128xf32>
    %cst_97 = arith.constant 5.000000e-01 : f32
    %269 = vector.broadcast %cst_97 : f32 to vector<8x128xf32>
    %270 = arith.mulf %269, %268 : vector<8x128xf32>
    %271 = math.tanh %270 : vector<8x128xf32>
    %cst_98 = arith.constant 5.000000e-01 : f32
    %272 = vector.broadcast %cst_98 : f32 to vector<8x128xf32>
    %273 = arith.mulf %272, %271 : vector<8x128xf32>
    %cst_99 = arith.constant 5.000000e-01 : f32
    %274 = vector.broadcast %cst_99 : f32 to vector<8x128xf32>
    %275 = arith.addf %273, %274 : vector<8x128xf32>
    %276 = vector.extract_strided_slice %259 {offsets = [0, 256], sizes = [8, 128], strides = [1, 1]} : vector<8x512xf32> to vector<8x128xf32>
    %277 = math.tanh %276 : vector<8x128xf32>
    %278 = vector.extract_strided_slice %259 {offsets = [0, 384], sizes = [8, 128], strides = [1, 1]} : vector<8x512xf32> to vector<8x128xf32>
    %cst_100 = arith.constant 5.000000e-01 : f32
    %279 = vector.broadcast %cst_100 : f32 to vector<8x128xf32>
    %280 = arith.mulf %279, %278 : vector<8x128xf32>
    %281 = math.tanh %280 : vector<8x128xf32>
    %cst_101 = arith.constant 5.000000e-01 : f32
    %282 = vector.broadcast %cst_101 : f32 to vector<8x128xf32>
    %283 = arith.mulf %282, %281 : vector<8x128xf32>
    %cst_102 = arith.constant 5.000000e-01 : f32
    %284 = vector.broadcast %cst_102 : f32 to vector<8x128xf32>
    %285 = arith.addf %283, %284 : vector<8x128xf32>
    %286 = arith.mulf %275, %248 : vector<8x128xf32>
    %287 = arith.mulf %267, %277 : vector<8x128xf32>
    %288 = arith.addf %286, %287 : vector<8x128xf32>
    %289 = math.tanh %288 : vector<8x128xf32>
    %290 = arith.mulf %285, %289 : vector<8x128xf32>
    %291 = arith.index_cast %254 : i32 to index
    %c0_103 = arith.constant 0 : index
    %292 = vector.load %arg8[%291, %c0_103] : memref<64x128xf32, #tpu.memory_space<vmem>>, vector<8x128xf32>
    tpu.vector_store %arg8[%291, %c0_103], %290 {strides = array<i32>} : memref<64x128xf32, #tpu.memory_space<vmem>>, vector<8x128xf32>,
    %c7_i32 = arith.constant 7 : i32
    %c8_i32_104 = arith.constant 8 : i32
    %293 = arith.muli %c7_i32, %c8_i32_104 : i32
    %294 = tpu.assume_multiple %293, 8 : i32
    %295 = arith.index_cast %294 : i32 to index
    %c0_105 = arith.constant 0 : index
    %296 = vector.load %arg9[%295, %c0_105] : memref<64x512xf32, #tpu.memory_space<vmem>>, vector<8x512xf32>
    %297 = arith.truncf %290 : vector<8x128xf32> to vector<8x128xbf16>
    %cst_106 = arith.constant dense<0.000000e+00> : vector<8x512xf32>
    %298 = tpu.matmul %297, %10, %cst_106 {dimension_numbers = #tpu.dot_dimension_numbers<[1], [0], [0], [1], [0, 0, 1, 1], [], []>} : vector<8x128xbf16>, vector<128x512xbf16>, vector<8x512xf32> -> vector<8x512xf32>
    %299 = arith.addf %296, %298 : vector<8x512xf32>
    %300 = vector.extract_strided_slice %299 {offsets = [0, 0], sizes = [8, 128], strides = [1, 1]} : vector<8x512xf32> to vector<8x128xf32>
    %cst_107 = arith.constant 5.000000e-01 : f32
    %301 = vector.broadcast %cst_107 : f32 to vector<8x128xf32>
    %302 = arith.mulf %301, %300 : vector<8x128xf32>
    %303 = math.tanh %302 : vector<8x128xf32>
    %cst_108 = arith.constant 5.000000e-01 : f32
    %304 = vector.broadcast %cst_108 : f32 to vector<8x128xf32>
    %305 = arith.mulf %304, %303 : vector<8x128xf32>
    %cst_109 = arith.constant 5.000000e-01 : f32
    %306 = vector.broadcast %cst_109 : f32 to vector<8x128xf32>
    %307 = arith.addf %305, %306 : vector<8x128xf32>
    %308 = vector.extract_strided_slice %299 {offsets = [0, 128], sizes = [8, 128], strides = [1, 1]} : vector<8x512xf32> to vector<8x128xf32>
    %cst_110 = arith.constant 5.000000e-01 : f32
    %309 = vector.broadcast %cst_110 : f32 to vector<8x128xf32>
    %310 = arith.mulf %309, %308 : vector<8x128xf32>
    %311 = math.tanh %310 : vector<8x128xf32>
    %cst_111 = arith.constant 5.000000e-01 : f32
    %312 = vector.broadcast %cst_111 : f32 to vector<8x128xf32>
    %313 = arith.mulf %312, %311 : vector<8x128xf32>
    %cst_112 = arith.constant 5.000000e-01 : f32
    %314 = vector.broadcast %cst_112 : f32 to vector<8x128xf32>
    %315 = arith.addf %313, %314 : vector<8x128xf32>
    %316 = vector.extract_strided_slice %299 {offsets = [0, 256], sizes = [8, 128], strides = [1, 1]} : vector<8x512xf32> to vector<8x128xf32>
    %317 = math.tanh %316 : vector<8x128xf32>
    %318 = vector.extract_strided_slice %299 {offsets = [0, 384], sizes = [8, 128], strides = [1, 1]} : vector<8x512xf32> to vector<8x128xf32>
    %cst_113 = arith.constant 5.000000e-01 : f32
    %319 = vector.broadcast %cst_113 : f32 to vector<8x128xf32>
    %320 = arith.mulf %319, %318 : vector<8x128xf32>
    %321 = math.tanh %320 : vector<8x128xf32>
    %cst_114 = arith.constant 5.000000e-01 : f32
    %322 = vector.broadcast %cst_114 : f32 to vector<8x128xf32>
    %323 = arith.mulf %322, %321 : vector<8x128xf32>
    %cst_115 = arith.constant 5.000000e-01 : f32
    %324 = vector.broadcast %cst_115 : f32 to vector<8x128xf32>
    %325 = arith.addf %323, %324 : vector<8x128xf32>
    %326 = arith.mulf %315, %288 : vector<8x128xf32>
    %327 = arith.mulf %307, %317 : vector<8x128xf32>
    %328 = arith.addf %326, %327 : vector<8x128xf32>
    %329 = math.tanh %328 : vector<8x128xf32>
    %330 = arith.mulf %325, %329 : vector<8x128xf32>
    %331 = arith.index_cast %294 : i32 to index
    %c0_116 = arith.constant 0 : index
    %332 = vector.load %arg8[%331, %c0_116] : memref<64x128xf32, #tpu.memory_space<vmem>>, vector<8x128xf32>
    tpu.vector_store %arg8[%331, %c0_116], %330 {strides = array<i32>} : memref<64x128xf32, #tpu.memory_space<vmem>>, vector<8x128xf32>,
    %c8_i32_117 = arith.constant 8 : i32
    %c0_118 = arith.constant 0 : index
    %c0_119 = arith.constant 0 : index
    %333 = vector.load %arg8[%c0_118, %c0_119] : memref<64x128xf32, #tpu.memory_space<vmem>>, vector<64x128xf32>
    %334 = arith.truncf %333 : vector<64x128xf32> to vector<64x128xbf16>
    %c1 = arith.constant 1 : index
    %c0_120 = arith.constant 0 : index
    %c0_121 = arith.constant 0 : index
    %335 = vector.load %arg2[%c1, %c0_120, %c0_121] : memref<2x128x512xbf16, #tpu.memory_space<vmem>>, vector<1x128x512xbf16>
    %336 = vector.shape_cast %335 : vector<1x128x512xbf16> to vector<128x512xbf16>
    %cst_122 = arith.constant dense<0.000000e+00> : vector<64x512xf32>
    %337 = tpu.matmul %334, %336, %cst_122 {dimension_numbers = #tpu.dot_dimension_numbers<[1], [0], [0], [1], [0, 0, 1, 1], [], []>} : vector<64x128xbf16>, vector<128x512xbf16>, vector<64x512xf32> -> vector<64x512xf32>
    %c1_123 = arith.constant 1 : index
    %c0_124 = arith.constant 0 : index
    %c0_125 = arith.constant 0 : index
    %338 = vector.load %arg4[%c1_123, %c0_124, %c0_125] : memref<2x1x512xf32, #tpu.memory_space<vmem>>, vector<1x1x512xf32>
    %339 = vector.shape_cast %338 : vector<1x1x512xf32> to vector<1x512xf32>
    %340 = vector.broadcast %339 : vector<1x512xf32> to vector<64x512xf32>
    %341 = arith.addf %337, %340 : vector<64x512xf32>
    %c0_126 = arith.constant 0 : index
    %c0_127 = arith.constant 0 : index
    %342 = vector.load %arg9[%c0_126, %c0_127] : memref<64x512xf32, #tpu.memory_space<vmem>>, vector<64x512xf32>
    tpu.vector_store %arg9[%c0_126, %c0_127], %341 {strides = array<i32>} : memref<64x512xf32, #tpu.memory_space<vmem>>, vector<64x512xf32>,
    %c1_128 = arith.constant 1 : index
    %c0_129 = arith.constant 0 : index
    %c0_130 = arith.constant 0 : index
    %343 = vector.load %arg3[%c1_128, %c0_129, %c0_130] : memref<2x128x512xbf16, #tpu.memory_space<vmem>>, vector<1x128x512xbf16>
    %344 = vector.shape_cast %343 : vector<1x128x512xbf16> to vector<128x512xbf16>
    %cst_131 = arith.constant 0.000000e+00 : f32
    %345 = vector.broadcast %cst_131 : f32 to vector<8x128xf32>
    %cst_132 = arith.constant 0.000000e+00 : f32
    %346 = vector.broadcast %cst_132 : f32 to vector<8x128xf32>
    %c0_i32_133 = arith.constant 0 : i32
    %c8_i32_134 = arith.constant 8 : i32
    %347 = arith.muli %c0_i32_133, %c8_i32_134 : i32
    %348 = tpu.assume_multiple %347, 8 : i32
    %349 = arith.index_cast %348 : i32 to index
    %c0_135 = arith.constant 0 : index
    %350 = vector.load %arg9[%349, %c0_135] : memref<64x512xf32, #tpu.memory_space<vmem>>, vector<8x512xf32>
    %351 = arith.truncf %345 : vector<8x128xf32> to vector<8x128xbf16>
    %cst_136 = arith.constant dense<0.000000e+00> : vector<8x512xf32>
    %352 = tpu.matmul %351, %344, %cst_136 {dimension_numbers = #tpu.dot_dimension_numbers<[1], [0], [0], [1], [0, 0, 1, 1], [], []>} : vector<8x128xbf16>, vector<128x512xbf16>, vector<8x512xf32> -> vector<8x512xf32>
    %353 = arith.addf %350, %352 : vector<8x512xf32>
    %354 = vector.extract_strided_slice %353 {offsets = [0, 0], sizes = [8, 128], strides = [1, 1]} : vector<8x512xf32> to vector<8x128xf32>
    %cst_137 = arith.constant 5.000000e-01 : f32
    %355 = vector.broadcast %cst_137 : f32 to vector<8x128xf32>
    %356 = arith.mulf %355, %354 : vector<8x128xf32>
    %357 = math.tanh %356 : vector<8x128xf32>
    %cst_138 = arith.constant 5.000000e-01 : f32
    %358 = vector.broadcast %cst_138 : f32 to vector<8x128xf32>
    %359 = arith.mulf %358, %357 : vector<8x128xf32>
    %cst_139 = arith.constant 5.000000e-01 : f32
    %360 = vector.broadcast %cst_139 : f32 to vector<8x128xf32>
    %361 = arith.addf %359, %360 : vector<8x128xf32>
    %362 = vector.extract_strided_slice %353 {offsets = [0, 128], sizes = [8, 128], strides = [1, 1]} : vector<8x512xf32> to vector<8x128xf32>
    %cst_140 = arith.constant 5.000000e-01 : f32
    %363 = vector.broadcast %cst_140 : f32 to vector<8x128xf32>
    %364 = arith.mulf %363, %362 : vector<8x128xf32>
    %365 = math.tanh %364 : vector<8x128xf32>
    %cst_141 = arith.constant 5.000000e-01 : f32
    %366 = vector.broadcast %cst_141 : f32 to vector<8x128xf32>
    %367 = arith.mulf %366, %365 : vector<8x128xf32>
    %cst_142 = arith.constant 5.000000e-01 : f32
    %368 = vector.broadcast %cst_142 : f32 to vector<8x128xf32>
    %369 = arith.addf %367, %368 : vector<8x128xf32>
    %370 = vector.extract_strided_slice %353 {offsets = [0, 256], sizes = [8, 128], strides = [1, 1]} : vector<8x512xf32> to vector<8x128xf32>
    %371 = math.tanh %370 : vector<8x128xf32>
    %372 = vector.extract_strided_slice %353 {offsets = [0, 384], sizes = [8, 128], strides = [1, 1]} : vector<8x512xf32> to vector<8x128xf32>
    %cst_143 = arith.constant 5.000000e-01 : f32
    %373 = vector.broadcast %cst_143 : f32 to vector<8x128xf32>
    %374 = arith.mulf %373, %372 : vector<8x128xf32>
    %375 = math.tanh %374 : vector<8x128xf32>
    %cst_144 = arith.constant 5.000000e-01 : f32
    %376 = vector.broadcast %cst_144 : f32 to vector<8x128xf32>
    %377 = arith.mulf %376, %375 : vector<8x128xf32>
    %cst_145 = arith.constant 5.000000e-01 : f32
    %378 = vector.broadcast %cst_145 : f32 to vector<8x128xf32>
    %379 = arith.addf %377, %378 : vector<8x128xf32>
    %380 = arith.mulf %369, %346 : vector<8x128xf32>
    %381 = arith.mulf %361, %371 : vector<8x128xf32>
    %382 = arith.addf %380, %381 : vector<8x128xf32>
    %383 = math.tanh %382 : vector<8x128xf32>
    %384 = arith.mulf %379, %383 : vector<8x128xf32>
    %c1_i32_146 = arith.constant 1 : i32
    %c8_i32_147 = arith.constant 8 : i32
    %385 = arith.muli %c1_i32_146, %c8_i32_147 : i32
    %386 = tpu.assume_multiple %385, 8 : i32
    %387 = arith.index_cast %386 : i32 to index
    %c0_148 = arith.constant 0 : index
    %388 = vector.load %arg9[%387, %c0_148] : memref<64x512xf32, #tpu.memory_space<vmem>>, vector<8x512xf32>
    %389 = arith.truncf %384 : vector<8x128xf32> to vector<8x128xbf16>
    %cst_149 = arith.constant dense<0.000000e+00> : vector<8x512xf32>
    %390 = tpu.matmul %389, %344, %cst_149 {dimension_numbers = #tpu.dot_dimension_numbers<[1], [0], [0], [1], [0, 0, 1, 1], [], []>} : vector<8x128xbf16>, vector<128x512xbf16>, vector<8x512xf32> -> vector<8x512xf32>
    %391 = arith.addf %388, %390 : vector<8x512xf32>
    %392 = vector.extract_strided_slice %391 {offsets = [0, 0], sizes = [8, 128], strides = [1, 1]} : vector<8x512xf32> to vector<8x128xf32>
    %cst_150 = arith.constant 5.000000e-01 : f32
    %393 = vector.broadcast %cst_150 : f32 to vector<8x128xf32>
    %394 = arith.mulf %393, %392 : vector<8x128xf32>
    %395 = math.tanh %394 : vector<8x128xf32>
    %cst_151 = arith.constant 5.000000e-01 : f32
    %396 = vector.broadcast %cst_151 : f32 to vector<8x128xf32>
    %397 = arith.mulf %396, %395 : vector<8x128xf32>
    %cst_152 = arith.constant 5.000000e-01 : f32
    %398 = vector.broadcast %cst_152 : f32 to vector<8x128xf32>
    %399 = arith.addf %397, %398 : vector<8x128xf32>
    %400 = vector.extract_strided_slice %391 {offsets = [0, 128], sizes = [8, 128], strides = [1, 1]} : vector<8x512xf32> to vector<8x128xf32>
    %cst_153 = arith.constant 5.000000e-01 : f32
    %401 = vector.broadcast %cst_153 : f32 to vector<8x128xf32>
    %402 = arith.mulf %401, %400 : vector<8x128xf32>
    %403 = math.tanh %402 : vector<8x128xf32>
    %cst_154 = arith.constant 5.000000e-01 : f32
    %404 = vector.broadcast %cst_154 : f32 to vector<8x128xf32>
    %405 = arith.mulf %404, %403 : vector<8x128xf32>
    %cst_155 = arith.constant 5.000000e-01 : f32
    %406 = vector.broadcast %cst_155 : f32 to vector<8x128xf32>
    %407 = arith.addf %405, %406 : vector<8x128xf32>
    %408 = vector.extract_strided_slice %391 {offsets = [0, 256], sizes = [8, 128], strides = [1, 1]} : vector<8x512xf32> to vector<8x128xf32>
    %409 = math.tanh %408 : vector<8x128xf32>
    %410 = vector.extract_strided_slice %391 {offsets = [0, 384], sizes = [8, 128], strides = [1, 1]} : vector<8x512xf32> to vector<8x128xf32>
    %cst_156 = arith.constant 5.000000e-01 : f32
    %411 = vector.broadcast %cst_156 : f32 to vector<8x128xf32>
    %412 = arith.mulf %411, %410 : vector<8x128xf32>
    %413 = math.tanh %412 : vector<8x128xf32>
    %cst_157 = arith.constant 5.000000e-01 : f32
    %414 = vector.broadcast %cst_157 : f32 to vector<8x128xf32>
    %415 = arith.mulf %414, %413 : vector<8x128xf32>
    %cst_158 = arith.constant 5.000000e-01 : f32
    %416 = vector.broadcast %cst_158 : f32 to vector<8x128xf32>
    %417 = arith.addf %415, %416 : vector<8x128xf32>
    %418 = arith.mulf %407, %382 : vector<8x128xf32>
    %419 = arith.mulf %399, %409 : vector<8x128xf32>
    %420 = arith.addf %418, %419 : vector<8x128xf32>
    %421 = math.tanh %420 : vector<8x128xf32>
    %422 = arith.mulf %417, %421 : vector<8x128xf32>
    %c2_i32_159 = arith.constant 2 : i32
    %c8_i32_160 = arith.constant 8 : i32
    %423 = arith.muli %c2_i32_159, %c8_i32_160 : i32
    %424 = tpu.assume_multiple %423, 8 : i32
    %425 = arith.index_cast %424 : i32 to index
    %c0_161 = arith.constant 0 : index
    %426 = vector.load %arg9[%425, %c0_161] : memref<64x512xf32, #tpu.memory_space<vmem>>, vector<8x512xf32>
    %427 = arith.truncf %422 : vector<8x128xf32> to vector<8x128xbf16>
    %cst_162 = arith.constant dense<0.000000e+00> : vector<8x512xf32>
    %428 = tpu.matmul %427, %344, %cst_162 {dimension_numbers = #tpu.dot_dimension_numbers<[1], [0], [0], [1], [0, 0, 1, 1], [], []>} : vector<8x128xbf16>, vector<128x512xbf16>, vector<8x512xf32> -> vector<8x512xf32>
    %429 = arith.addf %426, %428 : vector<8x512xf32>
    %430 = vector.extract_strided_slice %429 {offsets = [0, 0], sizes = [8, 128], strides = [1, 1]} : vector<8x512xf32> to vector<8x128xf32>
    %cst_163 = arith.constant 5.000000e-01 : f32
    %431 = vector.broadcast %cst_163 : f32 to vector<8x128xf32>
    %432 = arith.mulf %431, %430 : vector<8x128xf32>
    %433 = math.tanh %432 : vector<8x128xf32>
    %cst_164 = arith.constant 5.000000e-01 : f32
    %434 = vector.broadcast %cst_164 : f32 to vector<8x128xf32>
    %435 = arith.mulf %434, %433 : vector<8x128xf32>
    %cst_165 = arith.constant 5.000000e-01 : f32
    %436 = vector.broadcast %cst_165 : f32 to vector<8x128xf32>
    %437 = arith.addf %435, %436 : vector<8x128xf32>
    %438 = vector.extract_strided_slice %429 {offsets = [0, 128], sizes = [8, 128], strides = [1, 1]} : vector<8x512xf32> to vector<8x128xf32>
    %cst_166 = arith.constant 5.000000e-01 : f32
    %439 = vector.broadcast %cst_166 : f32 to vector<8x128xf32>
    %440 = arith.mulf %439, %438 : vector<8x128xf32>
    %441 = math.tanh %440 : vector<8x128xf32>
    %cst_167 = arith.constant 5.000000e-01 : f32
    %442 = vector.broadcast %cst_167 : f32 to vector<8x128xf32>
    %443 = arith.mulf %442, %441 : vector<8x128xf32>
    %cst_168 = arith.constant 5.000000e-01 : f32
    %444 = vector.broadcast %cst_168 : f32 to vector<8x128xf32>
    %445 = arith.addf %443, %444 : vector<8x128xf32>
    %446 = vector.extract_strided_slice %429 {offsets = [0, 256], sizes = [8, 128], strides = [1, 1]} : vector<8x512xf32> to vector<8x128xf32>
    %447 = math.tanh %446 : vector<8x128xf32>
    %448 = vector.extract_strided_slice %429 {offsets = [0, 384], sizes = [8, 128], strides = [1, 1]} : vector<8x512xf32> to vector<8x128xf32>
    %cst_169 = arith.constant 5.000000e-01 : f32
    %449 = vector.broadcast %cst_169 : f32 to vector<8x128xf32>
    %450 = arith.mulf %449, %448 : vector<8x128xf32>
    %451 = math.tanh %450 : vector<8x128xf32>
    %cst_170 = arith.constant 5.000000e-01 : f32
    %452 = vector.broadcast %cst_170 : f32 to vector<8x128xf32>
    %453 = arith.mulf %452, %451 : vector<8x128xf32>
    %cst_171 = arith.constant 5.000000e-01 : f32
    %454 = vector.broadcast %cst_171 : f32 to vector<8x128xf32>
    %455 = arith.addf %453, %454 : vector<8x128xf32>
    %456 = arith.mulf %445, %420 : vector<8x128xf32>
    %457 = arith.mulf %437, %447 : vector<8x128xf32>
    %458 = arith.addf %456, %457 : vector<8x128xf32>
    %459 = math.tanh %458 : vector<8x128xf32>
    %460 = arith.mulf %455, %459 : vector<8x128xf32>
    %c3_i32_172 = arith.constant 3 : i32
    %c8_i32_173 = arith.constant 8 : i32
    %461 = arith.muli %c3_i32_172, %c8_i32_173 : i32
    %462 = tpu.assume_multiple %461, 8 : i32
    %463 = arith.index_cast %462 : i32 to index
    %c0_174 = arith.constant 0 : index
    %464 = vector.load %arg9[%463, %c0_174] : memref<64x512xf32, #tpu.memory_space<vmem>>, vector<8x512xf32>
    %465 = arith.truncf %460 : vector<8x128xf32> to vector<8x128xbf16>
    %cst_175 = arith.constant dense<0.000000e+00> : vector<8x512xf32>
    %466 = tpu.matmul %465, %344, %cst_175 {dimension_numbers = #tpu.dot_dimension_numbers<[1], [0], [0], [1], [0, 0, 1, 1], [], []>} : vector<8x128xbf16>, vector<128x512xbf16>, vector<8x512xf32> -> vector<8x512xf32>
    %467 = arith.addf %464, %466 : vector<8x512xf32>
    %468 = vector.extract_strided_slice %467 {offsets = [0, 0], sizes = [8, 128], strides = [1, 1]} : vector<8x512xf32> to vector<8x128xf32>
    %cst_176 = arith.constant 5.000000e-01 : f32
    %469 = vector.broadcast %cst_176 : f32 to vector<8x128xf32>
    %470 = arith.mulf %469, %468 : vector<8x128xf32>
    %471 = math.tanh %470 : vector<8x128xf32>
    %cst_177 = arith.constant 5.000000e-01 : f32
    %472 = vector.broadcast %cst_177 : f32 to vector<8x128xf32>
    %473 = arith.mulf %472, %471 : vector<8x128xf32>
    %cst_178 = arith.constant 5.000000e-01 : f32
    %474 = vector.broadcast %cst_178 : f32 to vector<8x128xf32>
    %475 = arith.addf %473, %474 : vector<8x128xf32>
    %476 = vector.extract_strided_slice %467 {offsets = [0, 128], sizes = [8, 128], strides = [1, 1]} : vector<8x512xf32> to vector<8x128xf32>
    %cst_179 = arith.constant 5.000000e-01 : f32
    %477 = vector.broadcast %cst_179 : f32 to vector<8x128xf32>
    %478 = arith.mulf %477, %476 : vector<8x128xf32>
    %479 = math.tanh %478 : vector<8x128xf32>
    %cst_180 = arith.constant 5.000000e-01 : f32
    %480 = vector.broadcast %cst_180 : f32 to vector<8x128xf32>
    %481 = arith.mulf %480, %479 : vector<8x128xf32>
    %cst_181 = arith.constant 5.000000e-01 : f32
    %482 = vector.broadcast %cst_181 : f32 to vector<8x128xf32>
    %483 = arith.addf %481, %482 : vector<8x128xf32>
    %484 = vector.extract_strided_slice %467 {offsets = [0, 256], sizes = [8, 128], strides = [1, 1]} : vector<8x512xf32> to vector<8x128xf32>
    %485 = math.tanh %484 : vector<8x128xf32>
    %486 = vector.extract_strided_slice %467 {offsets = [0, 384], sizes = [8, 128], strides = [1, 1]} : vector<8x512xf32> to vector<8x128xf32>
    %cst_182 = arith.constant 5.000000e-01 : f32
    %487 = vector.broadcast %cst_182 : f32 to vector<8x128xf32>
    %488 = arith.mulf %487, %486 : vector<8x128xf32>
    %489 = math.tanh %488 : vector<8x128xf32>
    %cst_183 = arith.constant 5.000000e-01 : f32
    %490 = vector.broadcast %cst_183 : f32 to vector<8x128xf32>
    %491 = arith.mulf %490, %489 : vector<8x128xf32>
    %cst_184 = arith.constant 5.000000e-01 : f32
    %492 = vector.broadcast %cst_184 : f32 to vector<8x128xf32>
    %493 = arith.addf %491, %492 : vector<8x128xf32>
    %494 = arith.mulf %483, %458 : vector<8x128xf32>
    %495 = arith.mulf %475, %485 : vector<8x128xf32>
    %496 = arith.addf %494, %495 : vector<8x128xf32>
    %497 = math.tanh %496 : vector<8x128xf32>
    %498 = arith.mulf %493, %497 : vector<8x128xf32>
    %c4_i32_185 = arith.constant 4 : i32
    %c8_i32_186 = arith.constant 8 : i32
    %499 = arith.muli %c4_i32_185, %c8_i32_186 : i32
    %500 = tpu.assume_multiple %499, 8 : i32
    %501 = arith.index_cast %500 : i32 to index
    %c0_187 = arith.constant 0 : index
    %502 = vector.load %arg9[%501, %c0_187] : memref<64x512xf32, #tpu.memory_space<vmem>>, vector<8x512xf32>
    %503 = arith.truncf %498 : vector<8x128xf32> to vector<8x128xbf16>
    %cst_188 = arith.constant dense<0.000000e+00> : vector<8x512xf32>
    %504 = tpu.matmul %503, %344, %cst_188 {dimension_numbers = #tpu.dot_dimension_numbers<[1], [0], [0], [1], [0, 0, 1, 1], [], []>} : vector<8x128xbf16>, vector<128x512xbf16>, vector<8x512xf32> -> vector<8x512xf32>
    %505 = arith.addf %502, %504 : vector<8x512xf32>
    %506 = vector.extract_strided_slice %505 {offsets = [0, 0], sizes = [8, 128], strides = [1, 1]} : vector<8x512xf32> to vector<8x128xf32>
    %cst_189 = arith.constant 5.000000e-01 : f32
    %507 = vector.broadcast %cst_189 : f32 to vector<8x128xf32>
    %508 = arith.mulf %507, %506 : vector<8x128xf32>
    %509 = math.tanh %508 : vector<8x128xf32>
    %cst_190 = arith.constant 5.000000e-01 : f32
    %510 = vector.broadcast %cst_190 : f32 to vector<8x128xf32>
    %511 = arith.mulf %510, %509 : vector<8x128xf32>
    %cst_191 = arith.constant 5.000000e-01 : f32
    %512 = vector.broadcast %cst_191 : f32 to vector<8x128xf32>
    %513 = arith.addf %511, %512 : vector<8x128xf32>
    %514 = vector.extract_strided_slice %505 {offsets = [0, 128], sizes = [8, 128], strides = [1, 1]} : vector<8x512xf32> to vector<8x128xf32>
    %cst_192 = arith.constant 5.000000e-01 : f32
    %515 = vector.broadcast %cst_192 : f32 to vector<8x128xf32>
    %516 = arith.mulf %515, %514 : vector<8x128xf32>
    %517 = math.tanh %516 : vector<8x128xf32>
    %cst_193 = arith.constant 5.000000e-01 : f32
    %518 = vector.broadcast %cst_193 : f32 to vector<8x128xf32>
    %519 = arith.mulf %518, %517 : vector<8x128xf32>
    %cst_194 = arith.constant 5.000000e-01 : f32
    %520 = vector.broadcast %cst_194 : f32 to vector<8x128xf32>
    %521 = arith.addf %519, %520 : vector<8x128xf32>
    %522 = vector.extract_strided_slice %505 {offsets = [0, 256], sizes = [8, 128], strides = [1, 1]} : vector<8x512xf32> to vector<8x128xf32>
    %523 = math.tanh %522 : vector<8x128xf32>
    %524 = vector.extract_strided_slice %505 {offsets = [0, 384], sizes = [8, 128], strides = [1, 1]} : vector<8x512xf32> to vector<8x128xf32>
    %cst_195 = arith.constant 5.000000e-01 : f32
    %525 = vector.broadcast %cst_195 : f32 to vector<8x128xf32>
    %526 = arith.mulf %525, %524 : vector<8x128xf32>
    %527 = math.tanh %526 : vector<8x128xf32>
    %cst_196 = arith.constant 5.000000e-01 : f32
    %528 = vector.broadcast %cst_196 : f32 to vector<8x128xf32>
    %529 = arith.mulf %528, %527 : vector<8x128xf32>
    %cst_197 = arith.constant 5.000000e-01 : f32
    %530 = vector.broadcast %cst_197 : f32 to vector<8x128xf32>
    %531 = arith.addf %529, %530 : vector<8x128xf32>
    %532 = arith.mulf %521, %496 : vector<8x128xf32>
    %533 = arith.mulf %513, %523 : vector<8x128xf32>
    %534 = arith.addf %532, %533 : vector<8x128xf32>
    %535 = math.tanh %534 : vector<8x128xf32>
    %536 = arith.mulf %531, %535 : vector<8x128xf32>
    %c5_i32_198 = arith.constant 5 : i32
    %c8_i32_199 = arith.constant 8 : i32
    %537 = arith.muli %c5_i32_198, %c8_i32_199 : i32
    %538 = tpu.assume_multiple %537, 8 : i32
    %539 = arith.index_cast %538 : i32 to index
    %c0_200 = arith.constant 0 : index
    %540 = vector.load %arg9[%539, %c0_200] : memref<64x512xf32, #tpu.memory_space<vmem>>, vector<8x512xf32>
    %541 = arith.truncf %536 : vector<8x128xf32> to vector<8x128xbf16>
    %cst_201 = arith.constant dense<0.000000e+00> : vector<8x512xf32>
    %542 = tpu.matmul %541, %344, %cst_201 {dimension_numbers = #tpu.dot_dimension_numbers<[1], [0], [0], [1], [0, 0, 1, 1], [], []>} : vector<8x128xbf16>, vector<128x512xbf16>, vector<8x512xf32> -> vector<8x512xf32>
    %543 = arith.addf %540, %542 : vector<8x512xf32>
    %544 = vector.extract_strided_slice %543 {offsets = [0, 0], sizes = [8, 128], strides = [1, 1]} : vector<8x512xf32> to vector<8x128xf32>
    %cst_202 = arith.constant 5.000000e-01 : f32
    %545 = vector.broadcast %cst_202 : f32 to vector<8x128xf32>
    %546 = arith.mulf %545, %544 : vector<8x128xf32>
    %547 = math.tanh %546 : vector<8x128xf32>
    %cst_203 = arith.constant 5.000000e-01 : f32
    %548 = vector.broadcast %cst_203 : f32 to vector<8x128xf32>
    %549 = arith.mulf %548, %547 : vector<8x128xf32>
    %cst_204 = arith.constant 5.000000e-01 : f32
    %550 = vector.broadcast %cst_204 : f32 to vector<8x128xf32>
    %551 = arith.addf %549, %550 : vector<8x128xf32>
    %552 = vector.extract_strided_slice %543 {offsets = [0, 128], sizes = [8, 128], strides = [1, 1]} : vector<8x512xf32> to vector<8x128xf32>
    %cst_205 = arith.constant 5.000000e-01 : f32
    %553 = vector.broadcast %cst_205 : f32 to vector<8x128xf32>
    %554 = arith.mulf %553, %552 : vector<8x128xf32>
    %555 = math.tanh %554 : vector<8x128xf32>
    %cst_206 = arith.constant 5.000000e-01 : f32
    %556 = vector.broadcast %cst_206 : f32 to vector<8x128xf32>
    %557 = arith.mulf %556, %555 : vector<8x128xf32>
    %cst_207 = arith.constant 5.000000e-01 : f32
    %558 = vector.broadcast %cst_207 : f32 to vector<8x128xf32>
    %559 = arith.addf %557, %558 : vector<8x128xf32>
    %560 = vector.extract_strided_slice %543 {offsets = [0, 256], sizes = [8, 128], strides = [1, 1]} : vector<8x512xf32> to vector<8x128xf32>
    %561 = math.tanh %560 : vector<8x128xf32>
    %562 = vector.extract_strided_slice %543 {offsets = [0, 384], sizes = [8, 128], strides = [1, 1]} : vector<8x512xf32> to vector<8x128xf32>
    %cst_208 = arith.constant 5.000000e-01 : f32
    %563 = vector.broadcast %cst_208 : f32 to vector<8x128xf32>
    %564 = arith.mulf %563, %562 : vector<8x128xf32>
    %565 = math.tanh %564 : vector<8x128xf32>
    %cst_209 = arith.constant 5.000000e-01 : f32
    %566 = vector.broadcast %cst_209 : f32 to vector<8x128xf32>
    %567 = arith.mulf %566, %565 : vector<8x128xf32>
    %cst_210 = arith.constant 5.000000e-01 : f32
    %568 = vector.broadcast %cst_210 : f32 to vector<8x128xf32>
    %569 = arith.addf %567, %568 : vector<8x128xf32>
    %570 = arith.mulf %559, %534 : vector<8x128xf32>
    %571 = arith.mulf %551, %561 : vector<8x128xf32>
    %572 = arith.addf %570, %571 : vector<8x128xf32>
    %573 = math.tanh %572 : vector<8x128xf32>
    %574 = arith.mulf %569, %573 : vector<8x128xf32>
    %c6_i32_211 = arith.constant 6 : i32
    %c8_i32_212 = arith.constant 8 : i32
    %575 = arith.muli %c6_i32_211, %c8_i32_212 : i32
    %576 = tpu.assume_multiple %575, 8 : i32
    %577 = arith.index_cast %576 : i32 to index
    %c0_213 = arith.constant 0 : index
    %578 = vector.load %arg9[%577, %c0_213] : memref<64x512xf32, #tpu.memory_space<vmem>>, vector<8x512xf32>
    %579 = arith.truncf %574 : vector<8x128xf32> to vector<8x128xbf16>
    %cst_214 = arith.constant dense<0.000000e+00> : vector<8x512xf32>
    %580 = tpu.matmul %579, %344, %cst_214 {dimension_numbers = #tpu.dot_dimension_numbers<[1], [0], [0], [1], [0, 0, 1, 1], [], []>} : vector<8x128xbf16>, vector<128x512xbf16>, vector<8x512xf32> -> vector<8x512xf32>
    %581 = arith.addf %578, %580 : vector<8x512xf32>
    %582 = vector.extract_strided_slice %581 {offsets = [0, 0], sizes = [8, 128], strides = [1, 1]} : vector<8x512xf32> to vector<8x128xf32>
    %cst_215 = arith.constant 5.000000e-01 : f32
    %583 = vector.broadcast %cst_215 : f32 to vector<8x128xf32>
    %584 = arith.mulf %583, %582 : vector<8x128xf32>
    %585 = math.tanh %584 : vector<8x128xf32>
    %cst_216 = arith.constant 5.000000e-01 : f32
    %586 = vector.broadcast %cst_216 : f32 to vector<8x128xf32>
    %587 = arith.mulf %586, %585 : vector<8x128xf32>
    %cst_217 = arith.constant 5.000000e-01 : f32
    %588 = vector.broadcast %cst_217 : f32 to vector<8x128xf32>
    %589 = arith.addf %587, %588 : vector<8x128xf32>
    %590 = vector.extract_strided_slice %581 {offsets = [0, 128], sizes = [8, 128], strides = [1, 1]} : vector<8x512xf32> to vector<8x128xf32>
    %cst_218 = arith.constant 5.000000e-01 : f32
    %591 = vector.broadcast %cst_218 : f32 to vector<8x128xf32>
    %592 = arith.mulf %591, %590 : vector<8x128xf32>
    %593 = math.tanh %592 : vector<8x128xf32>
    %cst_219 = arith.constant 5.000000e-01 : f32
    %594 = vector.broadcast %cst_219 : f32 to vector<8x128xf32>
    %595 = arith.mulf %594, %593 : vector<8x128xf32>
    %cst_220 = arith.constant 5.000000e-01 : f32
    %596 = vector.broadcast %cst_220 : f32 to vector<8x128xf32>
    %597 = arith.addf %595, %596 : vector<8x128xf32>
    %598 = vector.extract_strided_slice %581 {offsets = [0, 256], sizes = [8, 128], strides = [1, 1]} : vector<8x512xf32> to vector<8x128xf32>
    %599 = math.tanh %598 : vector<8x128xf32>
    %600 = vector.extract_strided_slice %581 {offsets = [0, 384], sizes = [8, 128], strides = [1, 1]} : vector<8x512xf32> to vector<8x128xf32>
    %cst_221 = arith.constant 5.000000e-01 : f32
    %601 = vector.broadcast %cst_221 : f32 to vector<8x128xf32>
    %602 = arith.mulf %601, %600 : vector<8x128xf32>
    %603 = math.tanh %602 : vector<8x128xf32>
    %cst_222 = arith.constant 5.000000e-01 : f32
    %604 = vector.broadcast %cst_222 : f32 to vector<8x128xf32>
    %605 = arith.mulf %604, %603 : vector<8x128xf32>
    %cst_223 = arith.constant 5.000000e-01 : f32
    %606 = vector.broadcast %cst_223 : f32 to vector<8x128xf32>
    %607 = arith.addf %605, %606 : vector<8x128xf32>
    %608 = arith.mulf %597, %572 : vector<8x128xf32>
    %609 = arith.mulf %589, %599 : vector<8x128xf32>
    %610 = arith.addf %608, %609 : vector<8x128xf32>
    %611 = math.tanh %610 : vector<8x128xf32>
    %612 = arith.mulf %607, %611 : vector<8x128xf32>
    %c7_i32_224 = arith.constant 7 : i32
    %c8_i32_225 = arith.constant 8 : i32
    %613 = arith.muli %c7_i32_224, %c8_i32_225 : i32
    %614 = tpu.assume_multiple %613, 8 : i32
    %615 = arith.index_cast %614 : i32 to index
    %c0_226 = arith.constant 0 : index
    %616 = vector.load %arg9[%615, %c0_226] : memref<64x512xf32, #tpu.memory_space<vmem>>, vector<8x512xf32>
    %617 = arith.truncf %612 : vector<8x128xf32> to vector<8x128xbf16>
    %cst_227 = arith.constant dense<0.000000e+00> : vector<8x512xf32>
    %618 = tpu.matmul %617, %344, %cst_227 {dimension_numbers = #tpu.dot_dimension_numbers<[1], [0], [0], [1], [0, 0, 1, 1], [], []>} : vector<8x128xbf16>, vector<128x512xbf16>, vector<8x512xf32> -> vector<8x512xf32>
    %619 = arith.addf %616, %618 : vector<8x512xf32>
    %620 = vector.extract_strided_slice %619 {offsets = [0, 0], sizes = [8, 128], strides = [1, 1]} : vector<8x512xf32> to vector<8x128xf32>
    %cst_228 = arith.constant 5.000000e-01 : f32
    %621 = vector.broadcast %cst_228 : f32 to vector<8x128xf32>
    %622 = arith.mulf %621, %620 : vector<8x128xf32>
    %623 = math.tanh %622 : vector<8x128xf32>
    %cst_229 = arith.constant 5.000000e-01 : f32
    %624 = vector.broadcast %cst_229 : f32 to vector<8x128xf32>
    %625 = arith.mulf %624, %623 : vector<8x128xf32>
    %cst_230 = arith.constant 5.000000e-01 : f32
    %626 = vector.broadcast %cst_230 : f32 to vector<8x128xf32>
    %627 = arith.addf %625, %626 : vector<8x128xf32>
    %628 = vector.extract_strided_slice %619 {offsets = [0, 128], sizes = [8, 128], strides = [1, 1]} : vector<8x512xf32> to vector<8x128xf32>
    %cst_231 = arith.constant 5.000000e-01 : f32
    %629 = vector.broadcast %cst_231 : f32 to vector<8x128xf32>
    %630 = arith.mulf %629, %628 : vector<8x128xf32>
    %631 = math.tanh %630 : vector<8x128xf32>
    %cst_232 = arith.constant 5.000000e-01 : f32
    %632 = vector.broadcast %cst_232 : f32 to vector<8x128xf32>
    %633 = arith.mulf %632, %631 : vector<8x128xf32>
    %cst_233 = arith.constant 5.000000e-01 : f32
    %634 = vector.broadcast %cst_233 : f32 to vector<8x128xf32>
    %635 = arith.addf %633, %634 : vector<8x128xf32>
    %636 = vector.extract_strided_slice %619 {offsets = [0, 256], sizes = [8, 128], strides = [1, 1]} : vector<8x512xf32> to vector<8x128xf32>
    %637 = math.tanh %636 : vector<8x128xf32>
    %638 = vector.extract_strided_slice %619 {offsets = [0, 384], sizes = [8, 128], strides = [1, 1]} : vector<8x512xf32> to vector<8x128xf32>
    %cst_234 = arith.constant 5.000000e-01 : f32
    %639 = vector.broadcast %cst_234 : f32 to vector<8x128xf32>
    %640 = arith.mulf %639, %638 : vector<8x128xf32>
    %641 = math.tanh %640 : vector<8x128xf32>
    %cst_235 = arith.constant 5.000000e-01 : f32
    %642 = vector.broadcast %cst_235 : f32 to vector<8x128xf32>
    %643 = arith.mulf %642, %641 : vector<8x128xf32>
    %cst_236 = arith.constant 5.000000e-01 : f32
    %644 = vector.broadcast %cst_236 : f32 to vector<8x128xf32>
    %645 = arith.addf %643, %644 : vector<8x128xf32>
    %646 = arith.mulf %635, %610 : vector<8x128xf32>
    %647 = arith.mulf %627, %637 : vector<8x128xf32>
    %648 = arith.addf %646, %647 : vector<8x128xf32>
    %649 = math.tanh %648 : vector<8x128xf32>
    %650 = arith.mulf %645, %649 : vector<8x128xf32>
    %c8_i32_237 = arith.constant 8 : i32
    %651 = arith.truncf %650 : vector<8x128xf32> to vector<8x128xbf16>
    %c0_238 = arith.constant 0 : index
    %c0_239 = arith.constant 0 : index
    %652 = vector.load %arg5[%c0_238, %c0_239] : memref<128x128xbf16, #tpu.memory_space<vmem>>, vector<128x128xbf16>
    %cst_240 = arith.constant dense<0.000000e+00> : vector<8x128xf32>
    %653 = tpu.matmul %651, %652, %cst_240 {dimension_numbers = #tpu.dot_dimension_numbers<[1], [0], [0], [1], [0, 0, 1, 1], [], []>} : vector<8x128xbf16>, vector<128x128xbf16>, vector<8x128xf32> -> vector<8x128xf32>
    %c0_241 = arith.constant 0 : index
    %c0_242 = arith.constant 0 : index
    %654 = vector.load %arg6[%c0_241, %c0_242] : memref<1x128xf32, #tpu.memory_space<vmem>>, vector<1x128xf32>
    %655 = vector.broadcast %654 : vector<1x128xf32> to vector<8x128xf32>
    %656 = arith.addf %653, %655 : vector<8x128xf32>
    %c0_243 = arith.constant 0 : index
    %c0_244 = arith.constant 0 : index
    %657 = vector.load %arg7[%c0_243, %c0_244] : memref<8x128xf32, #tpu.memory_space<vmem>>, vector<8x128xf32>
    tpu.vector_store %arg7[%c0_243, %c0_244], %656 {strides = array<i32>} : memref<8x128xf32, #tpu.memory_space<vmem>>, vector<8x128xf32>,
    return
  }
  func.func @transform_0(%arg0: i32) -> (i32, i32) {
    %c0_i32 = arith.constant 0 : i32
    %c0_i32_0 = arith.constant 0 : i32
    %c0_i32_1 = arith.constant 0 : i32
    return %c0_i32, %c0_i32_0 : i32, i32
  }
  func.func @transform_1(%arg0: i32) -> (i32, i32, i32) {
    %c0_i32 = arith.constant 0 : i32
    %c0_i32_0 = arith.constant 0 : i32
    %c0_i32_1 = arith.constant 0 : i32
    %c0_i32_2 = arith.constant 0 : i32
    return %c0_i32, %c0_i32_0, %c0_i32_1 : i32, i32, i32
  }
  func.func @transform_2(%arg0: i32) -> (i32, i32, i32) {
    %c0_i32 = arith.constant 0 : i32
    %c0_i32_0 = arith.constant 0 : i32
    %c0_i32_1 = arith.constant 0 : i32
    %c0_i32_2 = arith.constant 0 : i32
    return %c0_i32, %c0_i32_0, %c0_i32_1 : i32, i32, i32
  }
  func.func @transform_3(%arg0: i32) -> (i32, i32, i32) {
    %c0_i32 = arith.constant 0 : i32
    %c0_i32_0 = arith.constant 0 : i32
    %c0_i32_1 = arith.constant 0 : i32
    %c0_i32_2 = arith.constant 0 : i32
    return %c0_i32, %c0_i32_0, %c0_i32_1 : i32, i32, i32
  }
  func.func @transform_4(%arg0: i32) -> (i32, i32) {
    %c0_i32 = arith.constant 0 : i32
    %c0_i32_0 = arith.constant 0 : i32
    %c0_i32_1 = arith.constant 0 : i32
    return %c0_i32, %c0_i32_0 : i32, i32
  }
  func.func @transform_5(%arg0: i32) -> (i32, i32) {
    %c0_i32 = arith.constant 0 : i32
    %c0_i32_0 = arith.constant 0 : i32
    %c0_i32_1 = arith.constant 0 : i32
    return %c0_i32, %c0_i32_0 : i32, i32
  }
  func.func @transform_6(%arg0: i32) -> (i32, i32) {
    %c0_i32 = arith.constant 0 : i32
    %c0_i32_0 = arith.constant 0 : i32
    %c0_i32_1 = arith.constant 0 : i32
    return %c0_i32, %c0_i32_0 : i32, i32
  }
}

</mosaic_0001>

<bundles_post_ra>
// kernel: lstm_model_forward.1
= control target key start
LH: loop header
LB: loop body
LE: loop exit
PB: predicated region body
PF: predicated region fallthrough
CT: control target
= control target key end

     0   :  { %11 = vsyncpa [#allocation5], 0  ;;  %s4576_s0 = inlined_call_operand.vmem [shape: bf16[64,128], index: 0, kind: input, shape index: {}]   ;;  %s4577_s1 = inlined_call_operand.hbm [shape: bf16[2,128,512], index: 1, kind: input, shape index: {}]   ;;  %s4578_s2 = inlined_call_operand.hbm [shape: bf16[2,128,512], index: 2, kind: input, shape index: {}]   ;;  %s4579_s3 = inlined_call_operand.vmem [shape: f32[2,1,512], index: 3, kind: input, shape index: {}]   ;;  %s4580_s4 = inlined_call_operand.vmem [shape: bf16[128,128], index: 4, kind: input, shape index: {}]   ;;  %s4581_s5 = inlined_call_operand.vmem [shape: f32[1,128], index: 5, kind: input, shape index: {}]   ;;  %s4582_s6 = inlined_call_operand.vmem [shape: f32[8,128], index: 6, kind: output, shape index: {}]  }
   0x1   :  { %s19_s23 = sshll.u32 %s4577_s1, 4  ;;  %s20_s23 = int_to_ptr.hbm [resolvable:$true] %s19_s23 }
   0x2   :  { %12 = vsyncpa [#allocation7], 0  ;;  %s3503_s24 = smov [#allocation4]   ;;  %s32_s28 = sshll.u32 %s4578_s2, 4  ;;  %s33_s28 = int_to_ptr.hbm [resolvable:$true] %s32_s28 }
   0x3   :  { %s21_s25 = sshll.u32 %s3503_s24, 4  ;;  %s3504_s29 = smov 256   ;;  %s22_s25 = int_to_ptr.vmem [resolvable:$true] %s21_s25 }
   0x4   :  { %s3505_s30 = smov 16   ;;  %s3506_s7 = smov [#allocation6]  }
   0x5   :  { %27 = dma.hbm_to_vmem [thread:$0]  %s20_s23, 8192, %s22_s25, [#allocation5], %s3504_s29, %s3504_s29, %s3505_s30  }
   0x6   :  { %s34_s8 = sshll.u32 %s3506_s7, 4  ;;  %s35_s8 = int_to_ptr.vmem [resolvable:$true] %s34_s8 }
   0x7   :  { %40 = dma.hbm_to_vmem [thread:$0]  %s33_s28, 8192, %s35_s8, [#allocation7], %s3504_s29, %s3504_s29, %s3505_s30  }
   0x8   :  { %3499 = dma.done.wait [#allocation5], 8192  }
   0x9   :  { %3500 = vsyncadd [#allocation5], 4294959104 }
   0xa   :  { %3501 = dma.done.wait [#allocation7], 8192  }
   0xb   :  { %3502 = vsyncadd [#allocation7], 4294959104  ;;  %v2714_v0 = vld [vmem:[#allocation4 + $0xe0] sm:$0xf]  ;;  %v3179_v1 = vld [vmem:[#allocation4 + $0xec] sm:$0xf0] }
   0xc   :  { %v3177_v2 = vld [vmem:[#allocation4 + $0xe4] sm:$0xf]  ;;  %v2715_v3 = vor.u32 %v3179_v1, %v2714_v0  ;;  %v2716_v4 = vld [vmem:[#allocation4 + $0xf0] sm:$0xf0]  ;;  %v2722_v5 = vld [vmem:[#allocation4 + $0xe8] sm:$0xf] }
   0xd   :  { %v3180_v6 = vld [vmem:[#allocation4 + $0xf4] sm:$0xf0]  ;;  %v2719_v7 = vor.u32 %v3177_v2, %v2716_v4  ;;  %v3178_v9 = vld [vmem:[#allocation4 + $0xec] sm:$0xf]  ;;  %v2724_v10 = vld [vmem:[#allocation4 + $0xf8] sm:$0xf0] }
   0xe   :  { %v2723_v8 = vor.u32 %v3180_v6, %v2722_v5  ;;  %v2698_v11 = vld [vmem:[#allocation4 + $0xc0] sm:$0xf]  ;;  %290 = vmatpush.bf16.msra.mxu0 %v2715_v3  ;;  %v2727_v12 = vor.u32 %v3178_v9, %v2724_v10  ;;  %v3175_v13 = vld [vmem:[#allocation4 + $0xcc] sm:$0xf0]  ;;  %v3173_v14 = vld [vmem:[#allocation4 + $0xc4] sm:$0xf] }
   0xf   :  { %v2700_v15 = vld [vmem:[#allocation4 + $0xd0] sm:$0xf0]  ;;  %319 = vmatpush.bf16.msra.mxu1 %v2719_v7  ;;  %v2699_v16 = vor.u32 %v3175_v13, %v2698_v11  ;;  %v2706_v18 = vld [vmem:[#allocation4 + $0xc8] sm:$0xf]  ;;  %v3176_v19 = vld [vmem:[#allocation4 + $0xd4] sm:$0xf0] }
  0x10   :  { %348 = vmatpush.bf16.msra.mxu2 %v2723_v8  ;;  %v2703_v17 = vor.u32 %v3173_v14, %v2700_v15  ;;  %v3174_v20 = vld [vmem:[#allocation4 + $0xcc] sm:$0xf]  ;;  %377 = vmatpush.bf16.msra.mxu3 %v2727_v12  ;;  %v2707_v21 = vor.u32 %v3176_v19, %v2706_v18  ;;  %v2708_v22 = vld [vmem:[#allocation4 + $0xd8] sm:$0xf0]  ;;  %v2682_v23 = vld [vmem:[#allocation4 + $0xa0] sm:$0xf] }
  0x11   :  { %v3171_v24 = vld [vmem:[#allocation4 + $0xac] sm:$0xf0]  ;;  %v2711_v25 = vor.u32 %v3174_v20, %v2708_v22  ;;  %v3169_v26 = vld [vmem:[#allocation4 + $0xa4] sm:$0xf]  ;;  %v2684_v27 = vld [vmem:[#allocation4 + $0xb0] sm:$0xf0] }
  0x12   :  { %v2690_v28 = vld [vmem:[#allocation4 + $0xa8] sm:$0xf]  ;;  %291 = vmatpush.bf16.msra.mxu0 %v2699_v16  ;;  %v2683_v29 = vor.u32 %v3171_v24, %v2682_v23  ;;  %v3172_v30 = vld [vmem:[#allocation4 + $0xb4] sm:$0xf0]  ;;  %v3170_v31 = vld [vmem:[#allocation4 + $0xac] sm:$0xf]  ;;  %v2687_v33 = vor.u32 %v3169_v26, %v2684_v27 }
  0x13   :  { %v2692_v32 = vld [vmem:[#allocation4 + $0xb8] sm:$0xf0]  ;;  %320 = vmatpush.bf16.msra.mxu1 %v2703_v17  ;;  %v2691_v34 = vor.u32 %v3172_v30, %v2690_v28  ;;  %v2666_v35 = vld [vmem:[#allocation4 + $0x80] sm:$0xf]  ;;  %v3167_v36 = vld [vmem:[#allocation4 + $0x8c] sm:$0xf0] }
  0x14   :  { %349 = vmatpush.bf16.msra.mxu2 %v2707_v21  ;;  %v3165_v37 = vld [vmem:[#allocation4 + $0x84] sm:$0xf]  ;;  %378 = vmatpush.bf16.msra.mxu3 %v2711_v25  ;;  %v2695_v38 = vor.u32 %v3170_v31, %v2692_v32  ;;  %v2668_v39 = vld [vmem:[#allocation4 + $0x90] sm:$0xf0]  ;;  %v2674_v40 = vld [vmem:[#allocation4 + $0x88] sm:$0xf]  ;;  %v2667_v44 = vor.u32 %v3167_v36, %v2666_v35 }
  0x15   :  { %v3168_v41 = vld [vmem:[#allocation4 + $0x94] sm:$0xf0]  ;;  %v3166_v42 = vld [vmem:[#allocation4 + $0x8c] sm:$0xf]  ;;  %v2676_v43 = vld [vmem:[#allocation4 + $0x98] sm:$0xf0]  ;;  %v2671_v45 = vor.u32 %v3165_v37, %v2668_v39 }
  0x16   :  { %292 = vmatpush.bf16.msra.mxu0 %v2683_v29  ;;  %v2675_v46 = vor.u32 %v3168_v41, %v2674_v40  ;;  %v2650_v47 = vld [vmem:[#allocation4 + $0x60] sm:$0xf]  ;;  %v3163_v48 = vld [vmem:[#allocation4 + $0x6c] sm:$0xf0]  ;;  %v3161_v49 = vld [vmem:[#allocation4 + $0x64] sm:$0xf]  ;;  %v2679_v50 = vor.u32 %v3166_v42, %v2676_v43 }
  0x17   :  { %321 = vmatpush.bf16.msra.mxu1 %v2687_v33  ;;  %v2652_v51 = vld [vmem:[#allocation4 + $0x70] sm:$0xf0]  ;;  %v2658_v52 = vld [vmem:[#allocation4 + $0x68] sm:$0xf]  ;;  %v3164_v53 = vld [vmem:[#allocation4 + $0x74] sm:$0xf0]  ;;  %v2651_v56 = vor.u32 %v3163_v48, %v2650_v47 }
  0x18   :  { %350 = vmatpush.bf16.msra.mxu2 %v2691_v34  ;;  %379 = vmatpush.bf16.msra.mxu3 %v2695_v38  ;;  %v3162_v54 = vld [vmem:[#allocation4 + $0x6c] sm:$0xf]  ;;  %v2660_v55 = vld [vmem:[#allocation4 + $0x78] sm:$0xf0]  ;;  %v2655_v57 = vor.u32 %v3161_v49, %v2652_v51  ;;  %v2659_v58 = vor.u32 %v3164_v53, %v2658_v52  ;;  %v2634_v59 = vld [vmem:[#allocation4 + $0x40] sm:$0xf] }
  0x19   :  { %v3159_v60 = vld [vmem:[#allocation4 + $0x4c] sm:$0xf0]  ;;  %v3157_v61 = vld [vmem:[#allocation4 + $0x44] sm:$0xf]  ;;  %v2663_v62 = vor.u32 %v3162_v54, %v2660_v55  ;;  %v2636_v63 = vld [vmem:[#allocation4 + $0x50] sm:$0xf0] }
  0x1a   :  { %293 = vmatpush.bf16.msra.mxu0 %v2667_v44  ;;  %v2642_v0 = vld [vmem:[#allocation4 + $0x48] sm:$0xf]  ;;  %v3160_v1 = vld [vmem:[#allocation4 + $0x54] sm:$0xf0]  ;;  %v3158_v2 = vld [vmem:[#allocation4 + $0x4c] sm:$0xf]  ;;  %v2635_v4 = vor.u32 %v3159_v60, %v2634_v59  ;;  %v2639_v5 = vor.u32 %v3157_v61, %v2636_v63 }
  0x1b   :  { %322 = vmatpush.bf16.msra.mxu1 %v2671_v45  ;;  %v2644_v3 = vld [vmem:[#allocation4 + $0x58] sm:$0xf0]  ;;  %v2643_v6 = vor.u32 %v3160_v1, %v2642_v0  ;;  %v2618_v7 = vld [vmem:[#allocation4 + $0x20] sm:$0xf]  ;;  %v3155_v8 = vld [vmem:[#allocation4 + $0x2c] sm:$0xf0] }
  0x1c   :  { %351 = vmatpush.bf16.msra.mxu2 %v2675_v46  ;;  %380 = vmatpush.bf16.msra.mxu3 %v2679_v50  ;;  %v3153_v9 = vld [vmem:[#allocation4 + $0x24] sm:$0xf]  ;;  %v2647_v10 = vor.u32 %v3158_v2, %v2644_v3  ;;  %v2620_v11 = vld [vmem:[#allocation4 + $0x30] sm:$0xf0]  ;;  %v2626_v12 = vld [vmem:[#allocation4 + $0x28] sm:$0xf]  ;;  %v2619_v16 = vor.u32 %v3155_v8, %v2618_v7 }
  0x1d   :  { %v3156_v13 = vld [vmem:[#allocation4 + $0x34] sm:$0xf0]  ;;  %v3154_v14 = vld [vmem:[#allocation4 + $0x2c] sm:$0xf]  ;;  %v2628_v15 = vld [vmem:[#allocation4 + $0x38] sm:$0xf0]  ;;  %v2623_v18 = vor.u32 %v3153_v9, %v2620_v11 }
  0x1e   :  { %294 = vmatpush.bf16.msra.mxu0 %v2651_v56  ;;  %v2602_v17 = vld [vmem:[#allocation4] sm:$0xf]  ;;  %v2627_v19 = vor.u32 %v3156_v13, %v2626_v12  ;;  %v3151_v20 = vld [vmem:[#allocation4 + $0xc] sm:$0xf0]  ;;  %v3149_v21 = vld [vmem:[#allocation4 + $0x4] sm:$0xf]  ;;  %v2631_v23 = vor.u32 %v3154_v14, %v2628_v15 }
  0x1f   :  { %323 = vmatpush.bf16.msra.mxu1 %v2655_v57  ;;  %v2604_v22 = vld [vmem:[#allocation4 + $0x10] sm:$0xf0]  ;;  %v2610_v24 = vld [vmem:[#allocation4 + $0x8] sm:$0xf]  ;;  %v3152_v25 = vld [vmem:[#allocation4 + $0x14] sm:$0xf0]  ;;  %v2603_v30 = vor.u32 %v3151_v20, %v2602_v17 }
  0x20   :  { %352 = vmatpush.bf16.msra.mxu2 %v2659_v58  ;;  %381 = vmatpush.bf16.msra.mxu3 %v2663_v62  ;;  %v3150_v26 = vld [vmem:[#allocation4 + $0xc] sm:$0xf]  ;;  %v2612_v27 = vld [vmem:[#allocation4 + $0x18] sm:$0xf0]  ;;  %v2842_v28 = vld [vmem:[#allocation6 + $0xe0] sm:$0xf]  ;;  %v2607_v33 = vor.u32 %v3149_v21, %v2604_v22  ;;  %v2611_v34 = vor.u32 %v3152_v25, %v2610_v24 }
  0x21   :  { %v3211_v29 = vld [vmem:[#allocation6 + $0xec] sm:$0xf0]  ;;  %v3209_v31 = vld [vmem:[#allocation6 + $0xe4] sm:$0xf]  ;;  %v2844_v32 = vld [vmem:[#allocation6 + $0xf0] sm:$0xf0]  ;;  %v2615_v36 = vor.u32 %v3150_v26, %v2612_v27 }
  0x22   :  { %295 = vmatpush.bf16.msra.mxu0 %v2635_v4  ;;  %v3145_v35 = vld [vmem:[%s4576_s0] sm:$0xff]  ;;  %v3552_v37 = vor.u32 %v3211_v29, %v2842_v28  ;;  %v2850_v38 = vld [vmem:[#allocation6 + $0xe8] sm:$0xf]  ;;  %v3212_v39 = vld [vmem:[#allocation6 + $0xf4] sm:$0xf0]  ;;  %v3554_v41 = vor.u32 %v3209_v31, %v2844_v32 }
  0x23   :  { %324 = vmatpush.bf16.msra.mxu1 %v2639_v5  ;;  %v3210_v40 = vld [vmem:[#allocation6 + $0xec] sm:$0xf]  ;;  %v2852_v42 = vld [vmem:[#allocation6 + $0xf8] sm:$0xf0]  ;;  %v2826_v43 = vld [vmem:[#allocation6 + $0xc0] sm:$0xf]  ;;  %v3556_v47 = vor.u32 %v3212_v39, %v2850_v38 }
  0x24   :  { %353 = vmatpush.bf16.msra.mxu2 %v2643_v6  ;;  %382 = vmatpush.bf16.msra.mxu3 %v2647_v10  ;;  %v3207_v44 = vld [vmem:[#allocation6 + $0xcc] sm:$0xf0]  ;;  %v3205_v45 = vld [vmem:[#allocation6 + $0xc4] sm:$0xf]  ;;  %v2828_v46 = vld [vmem:[#allocation6 + $0xd0] sm:$0xf0]  ;;  %v3559_v49 = vor.u32 %v3210_v40, %v2852_v42 }
  0x25   :  { %v2834_v48 = vld [vmem:[#allocation6 + $0xc8] sm:$0xf]  ;;  %v3561_v50 = vor.u32 %v3207_v44, %v2826_v43  ;;  %v3208_v51 = vld [vmem:[#allocation6 + $0xd4] sm:$0xf0]  ;;  %v3206_v52 = vld [vmem:[#allocation6 + $0xcc] sm:$0xf]  ;;  %v3564_v53 = vor.u32 %v3205_v45, %v2828_v46 }
  0x26   :  { %296 = vmatpush.bf16.msra.mxu0 %v2619_v16  ;;  %v2836_v54 = vld [vmem:[#allocation6 + $0xd8] sm:$0xf0]  ;;  %v2810_v55 = vld [vmem:[#allocation6 + $0xa0] sm:$0xf]  ;;  %v3203_v56 = vld [vmem:[#allocation6 + $0xac] sm:$0xf0]  ;;  %v3567_v59 = vor.u32 %v3208_v51, %v2834_v48 }
  0x27   :  { %325 = vmatpush.bf16.msra.mxu1 %v2623_v18  ;;  %v3201_v57 = vld [vmem:[#allocation6 + $0xa4] sm:$0xf]  ;;  %v2812_v58 = vld [vmem:[#allocation6 + $0xb0] sm:$0xf0]  ;;  %v3571_v60 = vor.u32 %v3206_v52, %v2836_v54  ;;  %v3573_v61 = vor.u32 %v3203_v56, %v2810_v55  ;;  %v2818_v62 = vld [vmem:[#allocation6 + $0xa8] sm:$0xf] }
  0x28   :  { %354 = vmatpush.bf16.msra.mxu2 %v2627_v19  ;;  %383 = vmatpush.bf16.msra.mxu3 %v2631_v23  ;;  %v3204_v63 = vld [vmem:[#allocation6 + $0xb4] sm:$0xf0]  ;;  %v3202_v0 = vld [vmem:[#allocation6 + $0xac] sm:$0xf]  ;;  %v3576_v1 = vor.u32 %v3201_v57, %v2812_v58  ;;  %v2820_v2 = vld [vmem:[#allocation6 + $0xb8] sm:$0xf0] }
  0x29   :  { %v2794_v3 = vld [vmem:[#allocation6 + $0x80] sm:$0xf]  ;;  %v3199_v4 = vld [vmem:[#allocation6 + $0x8c] sm:$0xf0]  ;;  %v3197_v5 = vld [vmem:[#allocation6 + $0x84] sm:$0xf]  ;;  %v3579_v7 = vor.u32 %v3204_v63, %v2818_v62  ;;  %v3583_v8 = vor.u32 %v3202_v0, %v2820_v2 }
  0x2a   :  { %297 = vmatpush.bf16.msra.mxu0 %v2603_v30  ;;  %v2796_v6 = vld [vmem:[#allocation6 + $0x90] sm:$0xf0]  ;;  %v3585_v9 = vor.u32 %v3199_v4, %v2794_v3  ;;  %v2802_v10 = vld [vmem:[#allocation6 + $0x88] sm:$0xf]  ;;  %v3200_v11 = vld [vmem:[#allocation6 + $0x94] sm:$0xf0] }
  0x2b   :  { %326 = vmatpush.bf16.msra.mxu1 %v2607_v33  ;;  %v3198_v12 = vld [vmem:[#allocation6 + $0x8c] sm:$0xf]  ;;  %v3588_v13 = vor.u32 %v3197_v5, %v2796_v6  ;;  %v2804_v14 = vld [vmem:[#allocation6 + $0x98] sm:$0xf0]  ;;  %v2778_v15 = vld [vmem:[#allocation6 + $0x60] sm:$0xf]  ;;  %v3594_v20 = vor.u32 %v3200_v11, %v2802_v10 }
  0x2c   :  { %355 = vmatpush.bf16.msra.mxu2 %v2611_v34  ;;  %384 = vmatpush.bf16.msra.mxu3 %v2615_v36  ;;  %v3195_v16 = vld [vmem:[#allocation6 + $0x6c] sm:$0xf0]  ;;  %v3193_v17 = vld [vmem:[#allocation6 + $0x64] sm:$0xf]  ;;  %v2780_v18 = vld [vmem:[#allocation6 + $0x70] sm:$0xf0]  ;;  %v3598_v21 = vor.u32 %v3198_v12, %v2804_v14 }
  0x2d   :  { %298 = vmatmul.bf16.vlgmr.msra.gmra.mxu0 %v3145_v35  ;;  %v3146_v19 = vld [vmem:[%s4576_s0 + $0x8] sm:$0xff]  ;;  %v3600_v22 = vor.u32 %v3195_v16, %v2778_v15  ;;  %v3196_v24 = vld [vmem:[#allocation6 + $0x74] sm:$0xf0]  ;;  %v3603_v26 = vor.u32 %v3193_v17, %v2780_v18  ;;  %v2788_v27 = vld [vmem:[#allocation6 + $0x78] sm:$0xf0]  ;;  %v4583_v18 = vmov 0  }
  0x2e   :  { %637 = vmatpush.bf16.msrb.mxu0 %v3552_v37  ;;  %327 = vmatmul.bf16.vlgmr.msra.gmra.mxu1 %v3145_v35  ;;  %v2786_v23 = vld [vmem:[#allocation6 + $0x68] sm:$0xf]  ;;  %v3194_v25 = vld [vmem:[#allocation6 + $0x6c] sm:$0xf]  ;;  %v2762_v28 = vld [vmem:[#allocation6 + $0x40] sm:$0xf] }
  0x2f   :  { %650 = vmatpush.bf16.msrb.mxu1 %v3554_v41  ;;  %356 = vmatmul.bf16.vlgmr.msra.gmra.mxu2 %v3145_v35  ;;  %v3191_v29 = vld [vmem:[#allocation6 + $0x4c] sm:$0xf0]  ;;  %v3189_v30 = vld [vmem:[#allocation6 + $0x44] sm:$0xf]  ;;  %v2764_v31 = vld [vmem:[#allocation6 + $0x50] sm:$0xf0]  ;;  %v3606_v32 = vor.u32 %v3196_v24, %v2786_v23  ;;  %v3610_v33 = vor.u32 %v3194_v25, %v2788_v27 }
  0x30   :  { %385 = vmatmul.bf16.vlgmr.msra.gmra.mxu3 %v3145_v35  ;;  %663 = vmatpush.bf16.msrb.mxu2 %v3556_v47  ;;  %v3612_v34 = vor.u32 %v3191_v29, %v2762_v28  ;;  %v2770_v35 = vld [vmem:[#allocation6 + $0x48] sm:$0xf]  ;;  %v3192_v36 = vld [vmem:[#allocation6 + $0x54] sm:$0xf0]  ;;  %v3615_v38 = vor.u32 %v3189_v30, %v2764_v31  ;;  %v3190_v39 = vld [vmem:[#allocation6 + $0x4c] sm:$0xf] }
  0x31   :  { %676 = vmatpush.bf16.msrb.mxu3 %v3559_v49  ;;  %v2772_v40 = vld [vmem:[#allocation6 + $0x58] sm:$0xf0]  ;;  %v3618_v42 = vor.u32 %v3192_v36, %v2770_v35  ;;  %v2746_v43 = vld [vmem:[#allocation6 + $0x20] sm:$0xf]  ;;  %v3187_v44 = vld [vmem:[#allocation6 + $0x2c] sm:$0xf0] }
  0x32   :  { %638 = vmatpush.bf16.msrb.mxu0 %v3561_v50  ;;  %v3185_v45 = vld [vmem:[#allocation6 + $0x24] sm:$0xf]  ;;  %v3622_v46 = vor.u32 %v3190_v39, %v2772_v40  ;;  %v3624_v48 = vor.u32 %v3187_v44, %v2746_v43  ;;  %v2748_v51 = vld [vmem:[#allocation6 + $0x30] sm:$0xf0]  ;;  %v2754_v52 = vld [vmem:[#allocation6 + $0x28] sm:$0xf] }
  0x33   :  { %651 = vmatpush.bf16.msrb.mxu1 %v3564_v53  ;;  %v3188_v54 = vld [vmem:[#allocation6 + $0x34] sm:$0xf0]  ;;  %v3627_v55 = vor.u32 %v3185_v45, %v2748_v51  ;;  %v3186_v56 = vld [vmem:[#allocation6 + $0x2c] sm:$0xf]  ;;  %v2756_v57 = vld [vmem:[#allocation6 + $0x38] sm:$0xf0] }
  0x34   :  { %664 = vmatpush.bf16.msrb.mxu2 %v3567_v59  ;;  %v2730_v58 = vld [vmem:[#allocation6] sm:$0xf]  ;;  %v3183_v62 = vld [vmem:[#allocation6 + $0xc] sm:$0xf0]  ;;  %v3181_v63 = vld [vmem:[#allocation6 + $0x4] sm:$0xf]  ;;  %v3630_v2 = vor.u32 %v3188_v54, %v2754_v52  ;;  %v3634_v3 = vor.u32 %v3186_v56, %v2756_v57 }
  0x35   :  { %677 = vmatpush.bf16.msrb.mxu3 %v3571_v60  ;;  %v2732_v0 = vld [vmem:[#allocation6 + $0x10] sm:$0xf0]  ;;  %v3636_v4 = vor.u32 %v3183_v62, %v2730_v58  ;;  %v2738_v5 = vld [vmem:[#allocation6 + $0x8] sm:$0xf]  ;;  %v3184_v6 = vld [vmem:[#allocation6 + $0x14] sm:$0xf0] }
  0x36   :  { %639 = vmatpush.bf16.msrb.mxu0 %v3573_v61  ;;  %v3639_v10 = vor.u32 %v3181_v63, %v2732_v0  ;;  %v3182_v11 = vld [vmem:[#allocation6 + $0xc] sm:$0xf]  ;;  %v2740_v12 = vld [vmem:[#allocation6 + $0x18] sm:$0xf0]  ;;  %v3642_v14 = vor.u32 %v3184_v6, %v2738_v5  ;;  %v3147_v16 = vld [vmem:[%s4576_s0 + $0x10] sm:$0xff] }
  0x37   :  { %652 = vmatpush.bf16.msrb.mxu1 %v3576_v1  ;;  %v3646_v15 = vor.u32 %v3182_v11, %v2740_v12  ;;  %v3148_v17 = vld [vmem:[%s4576_s0 + $0x18] sm:$0xff]  ;;  %v96_v29 = vld [vmem:[%s4579_s3] sm:$0xf] }
  0x38   :  { %665 = vmatpush.bf16.msrb.mxu2 %v3579_v7  ;;  %v3732_v30 = vperm.slane %v96_v29, 0  ;;  %v3736_v35 = vperm.slane %v96_v29, 1  ;;  %v3746_v45 = vperm.slane %v96_v29, 2  ;;  %v3748_v51 = vperm.slane %v96_v29, 3 }
  0x39   :  { %678 = vmatpush.bf16.msrb.mxu3 %v3583_v8 }
  0x3a   :  { %640 = vmatpush.bf16.msrb.mxu0 %v3585_v9 }
  0x3b   :  { %653 = vmatpush.bf16.msrb.mxu1 %v3588_v13 }
  0x3c   :  { %666 = vmatpush.bf16.msrb.mxu2 %v3594_v20 }
  0x3d   :  { %679 = vmatpush.bf16.msrb.mxu3 %v3598_v21  ;;  %303 = vmatmul.bf16.gmra.mxu0 %v3146_v19 }
  0x3e   :  { %641 = vmatpush.bf16.msrb.mxu0 %v3600_v22  ;;  %332 = vmatmul.bf16.gmra.mxu1 %v3146_v19 }
  0x3f   :  { %654 = vmatpush.bf16.msrb.mxu1 %v3603_v26  ;;  %361 = vmatmul.bf16.gmra.mxu2 %v3146_v19 }
  0x40   :  { %390 = vmatmul.bf16.gmra.mxu3 %v3146_v19  ;;  %667 = vmatpush.bf16.msrb.mxu2 %v3606_v32 }
  0x41   :  { %680 = vmatpush.bf16.msrb.mxu3 %v3610_v33 }
  0x42   :  { %642 = vmatpush.bf16.msrb.mxu0 %v3612_v34 }
  0x43   :  { %655 = vmatpush.bf16.msrb.mxu1 %v3615_v38 }
  0x44   :  { %668 = vmatpush.bf16.msrb.mxu2 %v3618_v42 }
  0x45   :  { %681 = vmatpush.bf16.msrb.mxu3 %v3622_v46 }
  0x46   :  { %643 = vmatpush.bf16.msrb.mxu0 %v3624_v48 }
  0x47   :  { %656 = vmatpush.bf16.msrb.mxu1 %v3627_v55 }
  0x48   :  { %669 = vmatpush.bf16.msrb.mxu2 %v3630_v2 }
  0x49   :  { %682 = vmatpush.bf16.msrb.mxu3 %v3634_v3 }
  0x4a   :  { %644 = vmatpush.bf16.msrb.mxu0 %v3636_v4 }
  0x4b   :  { %657 = vmatpush.bf16.msrb.mxu1 %v3639_v10 }
  0x4c   :  { %670 = vmatpush.bf16.msrb.mxu2 %v3642_v14 }
  0x4d   :  { %683 = vmatpush.bf16.msrb.mxu3 %v3646_v15  ;;  %308 = vmatmul.bf16.gmra.mxu0 %v3147_v16 }
  0x4e   :  { %720 = vmatpush.bf16.msra.mxu0 %v3552_v37  ;;  %337 = vmatmul.bf16.gmra.mxu1 %v3147_v16 }
  0x4f   :  { %733 = vmatpush.bf16.msra.mxu1 %v3554_v41  ;;  %366 = vmatmul.bf16.gmra.mxu2 %v3147_v16 }
  0x50   :  { %746 = vmatpush.bf16.msra.mxu2 %v3556_v47  ;;  %395 = vmatmul.bf16.gmra.mxu3 %v3147_v16 }
  0x51   :  { %759 = vmatpush.bf16.msra.mxu3 %v3559_v49 }
  0x52   :  { %721 = vmatpush.bf16.msra.mxu0 %v3561_v50 }
  0x53   :  { %734 = vmatpush.bf16.msra.mxu1 %v3564_v53 }
  0x54   :  { %747 = vmatpush.bf16.msra.mxu2 %v3567_v59 }
  0x55   :  { %760 = vmatpush.bf16.msra.mxu3 %v3571_v60 }
  0x56   :  { %722 = vmatpush.bf16.msra.mxu0 %v3573_v61 }
  0x57   :  { %735 = vmatpush.bf16.msra.mxu1 %v3576_v1 }
  0x58   :  { %748 = vmatpush.bf16.msra.mxu2 %v3579_v7 }
  0x59   :  { %761 = vmatpush.bf16.msra.mxu3 %v3583_v8 }
  0x5a   :  { %723 = vmatpush.bf16.msra.mxu0 %v3585_v9 }
  0x5b   :  { %736 = vmatpush.bf16.msra.mxu1 %v3588_v13 }
  0x5c   :  { %749 = vmatpush.bf16.msra.mxu2 %v3594_v20 }
  0x5d   :  { %762 = vmatpush.bf16.msra.mxu3 %v3598_v21  ;;  %313 = vmatmul.bf16.gmra.mxu0 %v3148_v17 }
  0x5e   :  { %724 = vmatpush.bf16.msra.mxu0 %v3600_v22  ;;  %342 = vmatmul.bf16.gmra.mxu1 %v3148_v17 }
  0x5f   :  { %737 = vmatpush.bf16.msra.mxu1 %v3603_v26  ;;  %371 = vmatmul.bf16.gmra.mxu2 %v3148_v17 }
  0x60   :  { %750 = vmatpush.bf16.msra.mxu2 %v3606_v32  ;;  %400 = vmatmul.bf16.gmra.mxu3 %v3148_v17 }
  0x61   :  { %763 = vmatpush.bf16.msra.mxu3 %v3610_v33 }
  0x62   :  { %725 = vmatpush.bf16.msra.mxu0 %v3612_v34 }
  0x63   :  { %738 = vmatpush.bf16.msra.mxu1 %v3615_v38 }
  0x64   :  { %751 = vmatpush.bf16.msra.mxu2 %v3618_v42 }
  0x65   :  { %764 = vmatpush.bf16.msra.mxu3 %v3622_v46 }
  0x66   :  { %726 = vmatpush.bf16.msra.mxu0 %v3624_v48 }
  0x67   :  { %739 = vmatpush.bf16.msra.mxu1 %v3627_v55 }
  0x68   :  { %752 = vmatpush.bf16.msra.mxu2 %v3630_v2 }
  0x69   :  { %765 = vmatpush.bf16.msra.mxu3 %v3634_v3 }
  0x6a   :  { %727 = vmatpush.bf16.msra.mxu0 %v3636_v4 }
  0x6b   :  { %740 = vmatpush.bf16.msra.mxu1 %v3639_v10 }
  0x6c   :  { %753 = vmatpush.bf16.msra.mxu2 %v3642_v14 }
  0x6d   :  { %766 = vmatpush.bf16.msra.mxu3 %v3646_v15  ;;  %645 = vmatmul.bf16.vlgmr.msrb.gmra.mxu0 %v4583_v18 }
  0x6e   :  { %658 = vmatmul.bf16.vlgmr.msrb.gmra.mxu1 %v4583_v18  ;;  %804 = vmatpush.bf16.msrb.mxu0 %v3552_v37 }
  0x6f   :  { %671 = vmatmul.bf16.vlgmr.msrb.gmra.mxu2 %v4583_v18  ;;  %817 = vmatpush.bf16.msrb.mxu1 %v3554_v41 }
  0x70   :  { %684 = vmatmul.bf16.vlgmr.msrb.gmra.mxu3 %v4583_v18  ;;  %830 = vmatpush.bf16.msrb.mxu2 %v3556_v47 }
  0x71   :  { %843 = vmatpush.bf16.msrb.mxu3 %v3559_v49 }
  0x72   :  { %805 = vmatpush.bf16.msrb.mxu0 %v3561_v50 }
  0x73   :  { %818 = vmatpush.bf16.msrb.mxu1 %v3564_v53 }
  0x74   :  { %831 = vmatpush.bf16.msrb.mxu2 %v3567_v59 }
  0x75   :  { %844 = vmatpush.bf16.msrb.mxu3 %v3571_v60 }
  0x76   :  { %806 = vmatpush.bf16.msrb.mxu0 %v3573_v61 }
  0x77   :  { %819 = vmatpush.bf16.msrb.mxu1 %v3576_v1 }
  0x78   :  { %832 = vmatpush.bf16.msrb.mxu2 %v3579_v7 }
  0x79   :  { %845 = vmatpush.bf16.msrb.mxu3 %v3583_v8 }
  0x7a   :  { %807 = vmatpush.bf16.msrb.mxu0 %v3585_v9 }
  0x7b   :  { %820 = vmatpush.bf16.msrb.mxu1 %v3588_v13 }
  0x7c   :  { %833 = vmatpush.bf16.msrb.mxu2 %v3594_v20 }
  0x7d   :  { %846 = vmatpush.bf16.msrb.mxu3 %v3598_v21 }
  0x7e   :  { %808 = vmatpush.bf16.msrb.mxu0 %v3600_v22 }
  0x7f   :  { %821 = vmatpush.bf16.msrb.mxu1 %v3603_v26 }
  0x80   :  { %834 = vmatpush.bf16.msrb.mxu2 %v3606_v32 }
  0x81   :  { %847 = vmatpush.bf16.msrb.mxu3 %v3610_v33 }
  0x82   :  { %809 = vmatpush.bf16.msrb.mxu0 %v3612_v34 }
  0x83   :  { %822 = vmatpush.bf16.msrb.mxu1 %v3615_v38 }
  0x84   :  { %835 = vmatpush.bf16.msrb.mxu2 %v3618_v42 }
  0x85   :  { %848 = vmatpush.bf16.msrb.mxu3 %v3622_v46 }
  0x86   :  { %810 = vmatpush.bf16.msrb.mxu0 %v3624_v48 }
  0x87   :  { %823 = vmatpush.bf16.msrb.mxu1 %v3627_v55 }
  0x88   :  { %836 = vmatpush.bf16.msrb.mxu2 %v3630_v2 }
  0x89   :  { %849 = vmatpush.bf16.msrb.mxu3 %v3634_v3 }
  0x8a   :  { %811 = vmatpush.bf16.msrb.mxu0 %v3636_v4 }
  0x8b   :  { %824 = vmatpush.bf16.msrb.mxu1 %v3639_v10 }
  0x8c   :  { %837 = vmatpush.bf16.msrb.mxu2 %v3642_v14 }
  0x8d   :  { %850 = vmatpush.bf16.msrb.mxu3 %v3646_v15 }
  0xaa   :  { %v299_v19 = vpop.f32.mrf.mxu0 }
  0xab   :  { %v328_v23 = vpop.f32.mrf.mxu1 }
  0xb2   :  { %v357_v24 = vpop.f32.mrf.mxu2  ;;  %v3725_v27 = vpop.f32.mrf.mxu0 }
  0xb3   :  { %v386_v25 = vpop.f32.mrf.mxu3  ;;  %v3727_v28 = vpop.f32.mrf.mxu1 }
  0xba   :  { %v3734_v31 = vpop.f32.mrf.mxu2  ;;  %v304_v39 = vpop.f32.mrf.mxu0 }
  0xbb   :  { %v3738_v36 = vpop.f32.mrf.mxu3  ;;  %v3741_v40 = vadd.f32 %v304_v39, %v3732_v30  ;;  %v333_v43 = vpop.f32.mrf.mxu1 }
  0xbc   :  { %v3744_v44 = vadd.f32 %v333_v43, %v3736_v35 }
  0xc2   :  { %v362_v52 = vpop.f32.mrf.mxu2  ;;  %v3753_v57 = vpop.f32.mrf.mxu0 }
  0xc3   :  { %v3751_v54 = vadd.f32 %v362_v52, %v3746_v45  ;;  %v391_v56 = vpop.f32.mrf.mxu3  ;;  %4585 = vst [vmem:[#allocation10_spill] sm:$0xff] %v3753_v57  ;;  %v3758_v62 = vpop.f32.mrf.mxu1 }
  0xc4   :  { %v3756_v58 = vadd.f32 %v391_v56, %v3748_v51  ;;  %4587 = vst [vmem:[#allocation12_spill] sm:$0xff] %v3758_v62 }
  0xc6   :  { %4586 = vst [vmem:[#allocation11_spill] sm:$0xff] %v3756_v58 }
  0xca   :  { %v3760_v63 = vpop.f32.mrf.mxu2  ;;  %v309_v5 = vpop.f32.mrf.mxu0 }
  0xcb   :  { %4588 = vst [vmem:[#allocation13_spill] sm:$0xff] %v3760_v63  ;;  %v3762_v0 = vpop.f32.mrf.mxu3  ;;  %v3765_v6 = vadd.f32 %v309_v5, %v3732_v30  ;;  %v338_v11 = vpop.f32.mrf.mxu1 }
  0xcc   :  { %4589 = vst [vmem:[#allocation14_spill] sm:$0xff] %v3762_v0  ;;  %v3768_v12 = vadd.f32 %v338_v11, %v3736_v35 }
  0xcd   :  { %4590 = vst [vmem:[#allocation15_spill] sm:$0xff] %v3765_v6 }
  0xce   :  { %4591 = vst [vmem:[#allocation16_spill] sm:$0xff] %v3768_v12 }
  0xd2   :  { %v367_v16 = vpop.f32.mrf.mxu2  ;;  %v3773_v39 = vpop.f32.mrf.mxu0 }
  0xd3   :  { %v3771_v17 = vadd.f32 %v367_v16, %v3746_v45  ;;  %v396_v29 = vpop.f32.mrf.mxu3  ;;  %4593 = vst [vmem:[#allocation18_spill] sm:$0xff] %v3773_v39  ;;  %v3778_v52 = vpop.f32.mrf.mxu1 }
  0xd4   :  { %v3776_v43 = vadd.f32 %v396_v29, %v3748_v51  ;;  %4595 = vst [vmem:[#allocation20_spill] sm:$0xff] %v3778_v52 }
  0xd5   :  { %4592 = vst [vmem:[#allocation17_spill] sm:$0xff] %v3771_v17 }
  0xd6   :  { %4594 = vst [vmem:[#allocation19_spill] sm:$0xff] %v3776_v43 }
  0xda   :  { %v3780_v56 = vpop.f32.mrf.mxu2  ;;  %v314_v18 = vpop.f32.mrf.mxu0 }
  0xdb   :  { %4596 = vst [vmem:[#allocation21_spill] sm:$0xff] %v3780_v56  ;;  %v3782_v5 = vpop.f32.mrf.mxu3  ;;  %v3785_v11 = vadd.f32 %v314_v18, %v3732_v30  ;;  %v343_v12 = vpop.f32.mrf.mxu1 }
  0xdc   :  { %4597 = vst [vmem:[#allocation22_spill] sm:$0xff] %v3782_v5  ;;  %v3788_v16 = vadd.f32 %v343_v12, %v3736_v35  ;;  %v300_v5 = vadd.f32 %v299_v19, %v3732_v30 }
  0xdd   :  { %4598 = vst [vmem:[#allocation23_spill] sm:$0xff] %v3785_v11  ;;  %v329_v11 = vadd.f32 %v328_v23, %v3736_v35 }
  0xde   :  { %4599 = vst [vmem:[#allocation24_spill] sm:$0xff] %v3788_v16 }
  0xe2   :  { %v372_v17 = vpop.f32.mrf.mxu2  ;;  %v3793_v43 = vpop.f32.mrf.mxu0 }
  0xe3   :  { %v3791_v39 = vadd.f32 %v372_v17, %v3746_v45  ;;  %v401_v29 = vpop.f32.mrf.mxu3  ;;  %4601 = vst [vmem:[#allocation26_spill] sm:$0xff] %v3793_v43  ;;  %v3798_v56 = vpop.f32.mrf.mxu1 }
  0xe4   :  { %v3796_v52 = vadd.f32 %v401_v29, %v3748_v51  ;;  %4603 = vst [vmem:[#allocation28_spill] sm:$0xff] %v3798_v56  ;;  %v358_v29 = vadd.f32 %v357_v24, %v3746_v45  ;;  %v387_v56 = vadd.f32 %v386_v25, %v3748_v51 }
  0xe5   :  { %4600 = vst [vmem:[#allocation25_spill] sm:$0xff] %v3791_v39 }
  0xe6   :  { %4602 = vst [vmem:[#allocation27_spill] sm:$0xff] %v3796_v52 }
  0xea   :  { %v3801_v18 = vpop.f32.mrf.mxu2  ;;  %v646_v16 = vpop.f32.mrf.mxu0 }
  0xeb   :  { %4604 = vst [vmem:[#allocation29_spill] sm:$0xff] %v3801_v18  ;;  %v3804_v12 = vpop.f32.mrf.mxu3  ;;  %v689_v6 = vadd.f32 %v646_v16, %v300_v5  ;;  %v659_v17 = vpop.f32.mrf.mxu1 }
  0xec   :  { %4605 = vst [vmem:[#allocation30_spill] sm:$0xff] %v3804_v12  ;;  %v690_v39 = vadd.f32 %v659_v17, %v329_v11 }
  0xed   :  { %v693_v0 = vmul.f32 0.5, %v689_v6 }
  0xee   :  { %v697_v63 = vmul.f32 0.5, %v690_v39 }
  0xef   :  { %3291 = vtanh.f32 %v693_v0 }
  0xf0   :  { %3293 = vtanh.f32 %v697_v63 }
  0xf2   :  { %v672_v43 = vpop.f32.mrf.mxu2  ;;  %v648_v18 = vpop.f32.mrf.mxu0 }
  0xf3   :  { %v691_v19 = vadd.f32 %v672_v43, %v358_v29  ;;  %v685_v52 = vpop.f32.mrf.mxu3  ;;  %v661_v23 = vpop.f32.mrf.mxu1 }
  0xf4   :  { %v692_v62 = vadd.f32 %v685_v52, %v387_v56 }
  0xf5   :  { %3295 = vtanh.f32 %v691_v19  ;;  %v3292_v12 = vpop.eup %3291 }
  0xf6   :  { %v702_v57 = vmul.f32 0.5, %v692_v62  ;;  %v3294_v5 = vpop.eup %3293  ;;  %v695_v16 = vmul.f32 0.5, %v3292_v12  ;;  %v331_v12 = vadd.f32 %v3727_v28, %v3736_v35 }
  0xf7   :  { %v699_v11 = vmul.f32 0.5, %v3294_v5 }
  0xf8   :  { %3297 = vtanh.f32 %v702_v57  ;;  %v696_v6 = vadd.f32 0.5, %v695_v16 }
  0xf9   :  { %v700_v0 = vadd.f32 0.5, %v699_v11 }
  0xfa   :  { %v674_v39 = vpop.f32.mrf.mxu2 }
  0xfb   :  { %v3296_v24 = vpop.eup %3295  ;;  %v687_v63 = vpop.f32.mrf.mxu3  ;;  %v706_v17 = vmul.f32 0.0, %v700_v0  ;;  %v389_v0 = vadd.f32 %v3738_v36, %v3748_v51 }
  0xfc   :  { %v707_v25 = vmul.f32 %v3296_v24, %v696_v6  ;;  %v360_v6 = vadd.f32 %v3734_v31, %v3746_v45 }
  0xfe   :  { %v3298_v58 = vpop.eup %3297  ;;  %v3808_v43 = vadd.f32 %v707_v25, %v706_v17 }
  0xff   :  { %v704_v52 = vmul.f32 0.5, %v3298_v58  ;;  %v302_v58 = vadd.f32 %v3725_v27, %v3732_v30 }
 0x100   :  { %3299 = vtanh.f32 %v3808_v43 }
 0x101   :  { %v705_v56 = vadd.f32 0.5, %v704_v52 }
 0x106   :  { %v3300_v18 = vpop.eup %3299 }
 0x107   :  { %v3811_v62 = vmul.f32 %v3300_v18, %v705_v56 }
 0x109   :  { %v719_v57 = vpack.c.bf16 %v3811_v62, %v3811_v62 }
 0x10b   :  { %728 = vmatmul.bf16.vlgmr.msra.gmra.mxu0 %v719_v57  ;;  %741 = vmatmul.bf16.vlgmr.msra.gmra.mxu1 %v719_v57 }
 0x10c   :  { %754 = vmatmul.bf16.vlgmr.msra.gmra.mxu2 %v719_v57  ;;  %767 = vmatmul.bf16.vlgmr.msra.gmra.mxu3 %v719_v57 }
 0x10d   :  { %888 = vmatpush.bf16.msra.mxu0 %v3552_v37  ;;  %901 = vmatpush.bf16.msra.mxu1 %v3554_v41 }
 0x10e   :  { %914 = vmatpush.bf16.msra.mxu2 %v3556_v47  ;;  %927 = vmatpush.bf16.msra.mxu3 %v3559_v49 }
 0x111   :  { %889 = vmatpush.bf16.msra.mxu0 %v3561_v50  ;;  %902 = vmatpush.bf16.msra.mxu1 %v3564_v53 }
 0x112   :  { %915 = vmatpush.bf16.msra.mxu2 %v3567_v59  ;;  %928 = vmatpush.bf16.msra.mxu3 %v3571_v60 }
 0x115   :  { %890 = vmatpush.bf16.msra.mxu0 %v3573_v61  ;;  %903 = vmatpush.bf16.msra.mxu1 %v3576_v1 }
 0x116   :  { %916 = vmatpush.bf16.msra.mxu2 %v3579_v7  ;;  %929 = vmatpush.bf16.msra.mxu3 %v3583_v8 }
 0x119   :  { %891 = vmatpush.bf16.msra.mxu0 %v3585_v9  ;;  %904 = vmatpush.bf16.msra.mxu1 %v3588_v13 }
 0x11a   :  { %917 = vmatpush.bf16.msra.mxu2 %v3594_v20  ;;  %930 = vmatpush.bf16.msra.mxu3 %v3598_v21 }
 0x11d   :  { %892 = vmatpush.bf16.msra.mxu0 %v3600_v22  ;;  %905 = vmatpush.bf16.msra.mxu1 %v3603_v26 }
 0x11e   :  { %918 = vmatpush.bf16.msra.mxu2 %v3606_v32  ;;  %931 = vmatpush.bf16.msra.mxu3 %v3610_v33 }
 0x121   :  { %893 = vmatpush.bf16.msra.mxu0 %v3612_v34  ;;  %906 = vmatpush.bf16.msra.mxu1 %v3615_v38 }
 0x122   :  { %919 = vmatpush.bf16.msra.mxu2 %v3618_v42  ;;  %932 = vmatpush.bf16.msra.mxu3 %v3622_v46 }
 0x125   :  { %894 = vmatpush.bf16.msra.mxu0 %v3624_v48  ;;  %907 = vmatpush.bf16.msra.mxu1 %v3627_v55 }
 0x126   :  { %920 = vmatpush.bf16.msra.mxu2 %v3630_v2  ;;  %933 = vmatpush.bf16.msra.mxu3 %v3634_v3 }
 0x129   :  { %895 = vmatpush.bf16.msra.mxu0 %v3636_v4  ;;  %908 = vmatpush.bf16.msra.mxu1 %v3639_v10 }
 0x12a   :  { %921 = vmatpush.bf16.msra.mxu2 %v3642_v14  ;;  %934 = vmatpush.bf16.msra.mxu3 %v3646_v15 }
 0x188   :  { %v729_v29 = vpop.f32.mrf.mxu0  ;;  %v742_v19 = vpop.f32.mrf.mxu1 }
 0x189   :  { %v772_v23 = vadd.f32 %v729_v29, %v302_v58  ;;  %v773_v5 = vadd.f32 %v742_v19, %v331_v12 }
 0x18b   :  { %v776_v16 = vmul.f32 0.5, %v772_v23  ;;  %v780_v11 = vmul.f32 0.5, %v773_v5 }
 0x18d   :  { %3301 = vtanh.f32 %v776_v16 }
 0x18e   :  { %3303 = vtanh.f32 %v780_v11 }
 0x18f   :  { %v755_v39 = vpop.f32.mrf.mxu2  ;;  %v768_v24 = vpop.f32.mrf.mxu3 }
 0x190   :  { %v774_v27 = vadd.f32 %v755_v39, %v360_v6  ;;  %v775_v63 = vadd.f32 %v768_v24, %v389_v0  ;;  %v731_v17 = vpop.f32.mrf.mxu0  ;;  %v744_v28 = vpop.f32.mrf.mxu1 }
 0x192   :  { %3305 = vtanh.f32 %v774_v27  ;;  %v785_v25 = vmul.f32 0.5, %v775_v63 }
 0x193   :  { %v3302_v52 = vpop.eup %3301 }
 0x194   :  { %v3304_v56 = vpop.eup %3303  ;;  %v778_v18 = vmul.f32 0.5, %v3302_v52  ;;  %3307 = vtanh.f32 %v785_v25 }
 0x195   :  { %v782_v57 = vmul.f32 0.5, %v3304_v56 }
 0x196   :  { %v779_v58 = vadd.f32 0.5, %v778_v18 }
 0x197   :  { %v783_v12 = vadd.f32 0.5, %v782_v57  ;;  %v757_v31 = vpop.f32.mrf.mxu2  ;;  %v770_v29 = vpop.f32.mrf.mxu3  ;;  %v4606_v57 = vld [vmem:[#allocation11_spill] sm:$0xff] }
 0x198   :  { %v3306_v19 = vpop.eup %3305 }
 0x199   :  { %v789_v36 = vmul.f32 %v783_v12, %v3808_v43  ;;  %v790_v23 = vmul.f32 %v3306_v19, %v779_v58 }
 0x19a   :  { %v3308_v5 = vpop.eup %3307 }
 0x19b   :  { %v3856_v16 = vadd.f32 %v790_v23, %v789_v36  ;;  %v787_v11 = vmul.f32 0.5, %v3308_v5 }
 0x19d   :  { %3309 = vtanh.f32 %v3856_v16  ;;  %v788_v6 = vadd.f32 0.5, %v787_v11 }
 0x1a3   :  { %v3310_v0 = vpop.eup %3309 }
 0x1a4   :  { %v3859_v39 = vmul.f32 %v3310_v0, %v788_v6 }
 0x1a6   :  { %v803_v24 = vpack.c.bf16 %v3859_v39, %v3859_v39 }
 0x1a8   :  { %812 = vmatmul.bf16.vlgmr.msrb.gmra.mxu0 %v803_v24  ;;  %825 = vmatmul.bf16.vlgmr.msrb.gmra.mxu1 %v803_v24 }
 0x1a9   :  { %838 = vmatmul.bf16.vlgmr.msrb.gmra.mxu2 %v803_v24  ;;  %851 = vmatmul.bf16.vlgmr.msrb.gmra.mxu3 %v803_v24 }
 0x1aa   :  { %972 = vmatpush.bf16.msrb.mxu0 %v3552_v37  ;;  %985 = vmatpush.bf16.msrb.mxu1 %v3554_v41 }
 0x1ab   :  { %998 = vmatpush.bf16.msrb.mxu2 %v3556_v47  ;;  %1011 = vmatpush.bf16.msrb.mxu3 %v3559_v49 }
 0x1ae   :  { %973 = vmatpush.bf16.msrb.mxu0 %v3561_v50  ;;  %986 = vmatpush.bf16.msrb.mxu1 %v3564_v53 }
 0x1af   :  { %999 = vmatpush.bf16.msrb.mxu2 %v3567_v59  ;;  %1012 = vmatpush.bf16.msrb.mxu3 %v3571_v60 }
 0x1b2   :  { %974 = vmatpush.bf16.msrb.mxu0 %v3573_v61  ;;  %987 = vmatpush.bf16.msrb.mxu1 %v3576_v1 }
 0x1b3   :  { %1000 = vmatpush.bf16.msrb.mxu2 %v3579_v7  ;;  %1013 = vmatpush.bf16.msrb.mxu3 %v3583_v8 }
 0x1b6   :  { %975 = vmatpush.bf16.msrb.mxu0 %v3585_v9  ;;  %988 = vmatpush.bf16.msrb.mxu1 %v3588_v13 }
 0x1b7   :  { %1001 = vmatpush.bf16.msrb.mxu2 %v3594_v20  ;;  %1014 = vmatpush.bf16.msrb.mxu3 %v3598_v21 }
 0x1ba   :  { %976 = vmatpush.bf16.msrb.mxu0 %v3600_v22  ;;  %989 = vmatpush.bf16.msrb.mxu1 %v3603_v26 }
 0x1bb   :  { %1002 = vmatpush.bf16.msrb.mxu2 %v3606_v32  ;;  %1015 = vmatpush.bf16.msrb.mxu3 %v3610_v33 }
 0x1be   :  { %977 = vmatpush.bf16.msrb.mxu0 %v3612_v34  ;;  %990 = vmatpush.bf16.msrb.mxu1 %v3615_v38 }
 0x1bf   :  { %1003 = vmatpush.bf16.msrb.mxu2 %v3618_v42  ;;  %1016 = vmatpush.bf16.msrb.mxu3 %v3622_v46 }
 0x1c2   :  { %978 = vmatpush.bf16.msrb.mxu0 %v3624_v48  ;;  %991 = vmatpush.bf16.msrb.mxu1 %v3627_v55 }
 0x1c3   :  { %1004 = vmatpush.bf16.msrb.mxu2 %v3630_v2  ;;  %1017 = vmatpush.bf16.msrb.mxu3 %v3634_v3 }
 0x1c6   :  { %979 = vmatpush.bf16.msrb.mxu0 %v3636_v4  ;;  %992 = vmatpush.bf16.msrb.mxu1 %v3639_v10 }
 0x1c7   :  { %1005 = vmatpush.bf16.msrb.mxu2 %v3642_v14  ;;  %1018 = vmatpush.bf16.msrb.mxu3 %v3646_v15 }
 0x225   :  { %v813_v43 = vpop.f32.mrf.mxu0  ;;  %v826_v27 = vpop.f32.mrf.mxu1 }
 0x226   :  { %v856_v63 = vadd.f32 %v813_v43, %v3741_v40  ;;  %v857_v17 = vadd.f32 %v826_v27, %v3744_v44 }
 0x228   :  { %v860_v28 = vmul.f32 0.5, %v856_v63  ;;  %v864_v25 = vmul.f32 0.5, %v857_v17 }
 0x22a   :  { %3311 = vtanh.f32 %v860_v28 }
 0x22b   :  { %3313 = vtanh.f32 %v864_v25 }
 0x22c   :  { %v839_v52 = vpop.f32.mrf.mxu2  ;;  %v852_v56 = vpop.f32.mrf.mxu3 }
 0x22d   :  { %v858_v18 = vadd.f32 %v839_v52, %v3751_v54  ;;  %v859_v58 = vadd.f32 %v852_v56, %v4606_v57  ;;  %v815_v12 = vpop.f32.mrf.mxu0  ;;  %v828_v31 = vpop.f32.mrf.mxu1 }
 0x22f   :  { %3315 = vtanh.f32 %v858_v18  ;;  %v869_v29 = vmul.f32 0.5, %v859_v58  ;;  %v4608_v18 = vld [vmem:[#allocation12_spill] sm:$0xff] }
 0x230   :  { %v3312_v19 = vpop.eup %3311  ;;  %v336_v57 = vadd.f32 %v4608_v18, %v3736_v35 }
 0x231   :  { %v3314_v36 = vpop.eup %3313  ;;  %v862_v23 = vmul.f32 0.5, %v3312_v19  ;;  %3317 = vtanh.f32 %v869_v29 }
 0x232   :  { %v866_v40 = vmul.f32 0.5, %v3314_v36 }
 0x233   :  { %v863_v44 = vadd.f32 0.5, %v862_v23  ;;  %v4609_v23 = vld [vmem:[#allocation13_spill] sm:$0xff] }
 0x234   :  { %v867_v5 = vadd.f32 0.5, %v866_v40  ;;  %v841_v11 = vpop.f32.mrf.mxu2  ;;  %v854_v6 = vpop.f32.mrf.mxu3  ;;  %v365_v40 = vadd.f32 %v4609_v23, %v3746_v45 }
 0x235   :  { %v3316_v0 = vpop.eup %3315 }
 0x236   :  { %v873_v24 = vmul.f32 %v867_v5, %v3856_v16  ;;  %v874_v43 = vmul.f32 %v3316_v0, %v863_v44  ;;  %v4607_v16 = vld [vmem:[#allocation10_spill] sm:$0xff] }
 0x237   :  { %v3318_v54 = vpop.eup %3317  ;;  %v307_v56 = vadd.f32 %v4607_v16, %v3732_v30  ;;  %v4610_v44 = vld [vmem:[#allocation14_spill] sm:$0xff] }
 0x238   :  { %v3900_v27 = vadd.f32 %v874_v43, %v873_v24  ;;  %v871_v63 = vmul.f32 0.5, %v3318_v54  ;;  %v394_v5 = vadd.f32 %v4610_v44, %v3748_v51 }
 0x23a   :  { %3319 = vtanh.f32 %v3900_v27  ;;  %v872_v17 = vadd.f32 0.5, %v871_v63 }
 0x240   :  { %v3320_v28 = vpop.eup %3319 }
 0x241   :  { %v3903_v25 = vmul.f32 %v3320_v28, %v872_v17 }
 0x243   :  { %v887_v52 = vpack.c.bf16 %v3903_v25, %v3903_v25 }
 0x245   :  { %896 = vmatmul.bf16.vlgmr.msra.gmra.mxu0 %v887_v52  ;;  %909 = vmatmul.bf16.vlgmr.msra.gmra.mxu1 %v887_v52 }
 0x246   :  { %922 = vmatmul.bf16.vlgmr.msra.gmra.mxu2 %v887_v52  ;;  %935 = vmatmul.bf16.vlgmr.msra.gmra.mxu3 %v887_v52 }
 0x247   :  { %1056 = vmatpush.bf16.msra.mxu0 %v3552_v37  ;;  %1069 = vmatpush.bf16.msra.mxu1 %v3554_v41 }
 0x248   :  { %1082 = vmatpush.bf16.msra.mxu2 %v3556_v47  ;;  %1095 = vmatpush.bf16.msra.mxu3 %v3559_v49 }
 0x24b   :  { %1057 = vmatpush.bf16.msra.mxu0 %v3561_v50  ;;  %1070 = vmatpush.bf16.msra.mxu1 %v3564_v53 }
 0x24c   :  { %1083 = vmatpush.bf16.msra.mxu2 %v3567_v59  ;;  %1096 = vmatpush.bf16.msra.mxu3 %v3571_v60 }
 0x24f   :  { %1058 = vmatpush.bf16.msra.mxu0 %v3573_v61  ;;  %1071 = vmatpush.bf16.msra.mxu1 %v3576_v1 }
 0x250   :  { %1084 = vmatpush.bf16.msra.mxu2 %v3579_v7  ;;  %1097 = vmatpush.bf16.msra.mxu3 %v3583_v8 }
 0x253   :  { %1059 = vmatpush.bf16.msra.mxu0 %v3585_v9  ;;  %1072 = vmatpush.bf16.msra.mxu1 %v3588_v13 }
 0x254   :  { %1085 = vmatpush.bf16.msra.mxu2 %v3594_v20  ;;  %1098 = vmatpush.bf16.msra.mxu3 %v3598_v21 }
 0x257   :  { %1060 = vmatpush.bf16.msra.mxu0 %v3600_v22  ;;  %1073 = vmatpush.bf16.msra.mxu1 %v3603_v26 }
 0x258   :  { %1086 = vmatpush.bf16.msra.mxu2 %v3606_v32  ;;  %1099 = vmatpush.bf16.msra.mxu3 %v3610_v33 }
 0x25b   :  { %1061 = vmatpush.bf16.msra.mxu0 %v3612_v34  ;;  %1074 = vmatpush.bf16.msra.mxu1 %v3615_v38 }
 0x25c   :  { %1087 = vmatpush.bf16.msra.mxu2 %v3618_v42  ;;  %1100 = vmatpush.bf16.msra.mxu3 %v3622_v46 }
 0x25f   :  { %1062 = vmatpush.bf16.msra.mxu0 %v3624_v48  ;;  %1075 = vmatpush.bf16.msra.mxu1 %v3627_v55 }
 0x260   :  { %1088 = vmatpush.bf16.msra.mxu2 %v3630_v2  ;;  %1101 = vmatpush.bf16.msra.mxu3 %v3634_v3 }
 0x263   :  { %1063 = vmatpush.bf16.msra.mxu0 %v3636_v4  ;;  %1076 = vmatpush.bf16.msra.mxu1 %v3639_v10 }
 0x264   :  { %1089 = vmatpush.bf16.msra.mxu2 %v3642_v14  ;;  %1102 = vmatpush.bf16.msra.mxu3 %v3646_v15 }
 0x2c2   :  { %v897_v58 = vpop.f32.mrf.mxu0  ;;  %v910_v12 = vpop.f32.mrf.mxu1 }
 0x2c3   :  { %v940_v31 = vadd.f32 %v897_v58, %v307_v56  ;;  %v941_v29 = vadd.f32 %v910_v12, %v336_v57 }
 0x2c5   :  { %v944_v19 = vmul.f32 0.5, %v940_v31  ;;  %v948_v36 = vmul.f32 0.5, %v941_v29 }
 0x2c7   :  { %3321 = vtanh.f32 %v944_v19 }
 0x2c8   :  { %3323 = vtanh.f32 %v948_v36 }
 0x2c9   :  { %v923_v11 = vpop.f32.mrf.mxu2  ;;  %v936_v6 = vpop.f32.mrf.mxu3 }
 0x2ca   :  { %v942_v0 = vadd.f32 %v923_v11, %v365_v40  ;;  %v943_v24 = vadd.f32 %v936_v6, %v394_v5  ;;  %v899_v43 = vpop.f32.mrf.mxu0  ;;  %v912_v54 = vpop.f32.mrf.mxu1 }
 0x2cb   :  { %v4612_v43 = vld [vmem:[#allocation16_spill] sm:$0xff] }
 0x2cc   :  { %3325 = vtanh.f32 %v942_v0  ;;  %v953_v63 = vmul.f32 0.5, %v943_v24  ;;  %v4611_v0 = vld [vmem:[#allocation15_spill] sm:$0xff] }
 0x2cd   :  { %v3322_v17 = vpop.eup %3321 }
 0x2ce   :  { %v3324_v28 = vpop.eup %3323  ;;  %v946_v52 = vmul.f32 0.5, %v3322_v17  ;;  %3327 = vtanh.f32 %v953_v63 }
 0x2cf   :  { %v950_v16 = vmul.f32 0.5, %v3324_v28 }
 0x2d0   :  { %v947_v56 = vadd.f32 0.5, %v946_v52 }
 0x2d1   :  { %v951_v18 = vadd.f32 0.5, %v950_v16  ;;  %v925_v57 = vpop.f32.mrf.mxu2  ;;  %v938_v58 = vpop.f32.mrf.mxu3  ;;  %v4613_v16 = vld [vmem:[#allocation17_spill] sm:$0xff] }
 0x2d2   :  { %v3326_v12 = vpop.eup %3325 }
 0x2d3   :  { %v957_v31 = vmul.f32 %v951_v18, %v3900_v27  ;;  %v958_v29 = vmul.f32 %v3326_v12, %v947_v56  ;;  %v4614_v18 = vld [vmem:[#allocation19_spill] sm:$0xff] }
 0x2d4   :  { %v3328_v19 = vpop.eup %3327 }
 0x2d5   :  { %v3948_v36 = vadd.f32 %v958_v29, %v957_v31  ;;  %v955_v23 = vmul.f32 0.5, %v3328_v19 }
 0x2d7   :  { %3329 = vtanh.f32 %v3948_v36  ;;  %v956_v40 = vadd.f32 0.5, %v955_v23 }
 0x2dd   :  { %v3330_v44 = vpop.eup %3329 }
 0x2de   :  { %v3951_v5 = vmul.f32 %v3330_v44, %v956_v40 }
 0x2e0   :  { %v971_v11 = vpack.c.bf16 %v3951_v5, %v3951_v5 }
 0x2e2   :  { %980 = vmatmul.bf16.vlgmr.msrb.gmra.mxu0 %v971_v11  ;;  %993 = vmatmul.bf16.vlgmr.msrb.gmra.mxu1 %v971_v11 }
 0x2e3   :  { %1006 = vmatmul.bf16.vlgmr.msrb.gmra.mxu2 %v971_v11  ;;  %1019 = vmatmul.bf16.vlgmr.msrb.gmra.mxu3 %v971_v11 }
 0x2e4   :  { %1140 = vmatpush.bf16.msrb.mxu0 %v3552_v37  ;;  %1153 = vmatpush.bf16.msrb.mxu1 %v3554_v41 }
 0x2e5   :  { %1166 = vmatpush.bf16.msrb.mxu2 %v3556_v47  ;;  %1179 = vmatpush.bf16.msrb.mxu3 %v3559_v49 }
 0x2e8   :  { %1141 = vmatpush.bf16.msrb.mxu0 %v3561_v50  ;;  %1154 = vmatpush.bf16.msrb.mxu1 %v3564_v53 }
 0x2e9   :  { %1167 = vmatpush.bf16.msrb.mxu2 %v3567_v59  ;;  %1180 = vmatpush.bf16.msrb.mxu3 %v3571_v60 }
 0x2ec   :  { %1142 = vmatpush.bf16.msrb.mxu0 %v3573_v61  ;;  %1155 = vmatpush.bf16.msrb.mxu1 %v3576_v1 }
 0x2ed   :  { %1168 = vmatpush.bf16.msrb.mxu2 %v3579_v7  ;;  %1181 = vmatpush.bf16.msrb.mxu3 %v3583_v8 }
 0x2f0   :  { %1143 = vmatpush.bf16.msrb.mxu0 %v3585_v9  ;;  %1156 = vmatpush.bf16.msrb.mxu1 %v3588_v13 }
 0x2f1   :  { %1169 = vmatpush.bf16.msrb.mxu2 %v3594_v20  ;;  %1182 = vmatpush.bf16.msrb.mxu3 %v3598_v21 }
 0x2f4   :  { %1144 = vmatpush.bf16.msrb.mxu0 %v3600_v22  ;;  %1157 = vmatpush.bf16.msrb.mxu1 %v3603_v26 }
 0x2f5   :  { %1170 = vmatpush.bf16.msrb.mxu2 %v3606_v32  ;;  %1183 = vmatpush.bf16.msrb.mxu3 %v3610_v33 }
 0x2f8   :  { %1145 = vmatpush.bf16.msrb.mxu0 %v3612_v34  ;;  %1158 = vmatpush.bf16.msrb.mxu1 %v3615_v38 }
 0x2f9   :  { %1171 = vmatpush.bf16.msrb.mxu2 %v3618_v42  ;;  %1184 = vmatpush.bf16.msrb.mxu3 %v3622_v46 }
 0x2fc   :  { %1146 = vmatpush.bf16.msrb.mxu0 %v3624_v48  ;;  %1159 = vmatpush.bf16.msrb.mxu1 %v3627_v55 }
 0x2fd   :  { %1172 = vmatpush.bf16.msrb.mxu2 %v3630_v2  ;;  %1185 = vmatpush.bf16.msrb.mxu3 %v3634_v3 }
 0x300   :  { %1147 = vmatpush.bf16.msrb.mxu0 %v3636_v4  ;;  %1160 = vmatpush.bf16.msrb.mxu1 %v3639_v10 }
 0x301   :  { %1173 = vmatpush.bf16.msrb.mxu2 %v3642_v14  ;;  %1186 = vmatpush.bf16.msrb.mxu3 %v3646_v15 }
 0x35f   :  { %v981_v27 = vpop.f32.mrf.mxu0  ;;  %v994_v6 = vpop.f32.mrf.mxu1 }
 0x360   :  { %v1024_v24 = vadd.f32 %v981_v27, %v4611_v0  ;;  %v1025_v54 = vadd.f32 %v994_v6, %v4612_v43 }
 0x362   :  { %v1028_v63 = vmul.f32 0.5, %v1024_v24  ;;  %v1032_v17 = vmul.f32 0.5, %v1025_v54 }
 0x364   :  { %3331 = vtanh.f32 %v1028_v63 }
 0x365   :  { %3333 = vtanh.f32 %v1032_v17 }
 0x366   :  { %v1007_v28 = vpop.f32.mrf.mxu2  ;;  %v1020_v52 = vpop.f32.mrf.mxu3 }
 0x367   :  { %v1026_v56 = vadd.f32 %v1007_v28, %v4613_v16  ;;  %v1027_v57 = vadd.f32 %v1020_v52, %v4614_v18  ;;  %v983_v58 = vpop.f32.mrf.mxu0  ;;  %v996_v12 = vpop.f32.mrf.mxu1 }
 0x369   :  { %3335 = vtanh.f32 %v1026_v56  ;;  %v1037_v31 = vmul.f32 0.5, %v1027_v57 }
 0x36a   :  { %v3332_v29 = vpop.eup %3331 }
 0x36b   :  { %v3334_v19 = vpop.eup %3333  ;;  %v1030_v23 = vmul.f32 0.5, %v3332_v29  ;;  %3337 = vtanh.f32 %v1037_v31 }
 0x36c   :  { %v1034_v40 = vmul.f32 0.5, %v3334_v19  ;;  %v2971_v19 = vld [vmem:[#allocation4 + $0x1e0] sm:$0xf] }
 0x36d   :  { %v1031_v44 = vadd.f32 0.5, %v1030_v23  ;;  %v3243_v23 = vld [vmem:[#allocation4 + $0x1ec] sm:$0xf0] }
 0x36e   :  { %v1035_v11 = vadd.f32 0.5, %v1034_v40  ;;  %v1009_v27 = vpop.f32.mrf.mxu2  ;;  %v1022_v6 = vpop.f32.mrf.mxu3  ;;  %v3241_v40 = vld [vmem:[#allocation4 + $0x1e4] sm:$0xf] }
 0x36f   :  { %v3336_v0 = vpop.eup %3335  ;;  %v2979_v27 = vld [vmem:[#allocation4 + $0x1e8] sm:$0xf]  ;;  %v3244_v6 = vld [vmem:[#allocation4 + $0x1f4] sm:$0xf0] }
 0x370   :  { %v1041_v24 = vmul.f32 %v1035_v11, %v3948_v36  ;;  %v1042_v43 = vmul.f32 %v3336_v0, %v1031_v44  ;;  %v2972_v44 = vor.u32 %v3243_v23, %v2971_v19  ;;  %v2973_v11 = vld [vmem:[#allocation4 + $0x1f0] sm:$0xf0] }
 0x371   :  { %v3338_v54 = vpop.eup %3337  ;;  %v2976_v0 = vor.u32 %v3241_v40, %v2973_v11  ;;  %v2909_v23 = vld [vmem:[#allocation4 + $0x170] sm:$0xf0]  ;;  %v2915_v40 = vld [vmem:[#allocation4 + $0x168] sm:$0xf] }
 0x372   :  { %v3992_v63 = vadd.f32 %v1042_v43, %v1041_v24  ;;  %v1039_v17 = vmul.f32 0.5, %v3338_v54  ;;  %v2980_v24 = vor.u32 %v3244_v6, %v2979_v27  ;;  %v3242_v43 = vld [vmem:[#allocation4 + $0x1ec] sm:$0xf]  ;;  %v2981_v54 = vld [vmem:[#allocation4 + $0x1f8] sm:$0xf0]  ;;  %v4620_v6 = vld [vmem:[#allocation24_spill] sm:$0xff] }
 0x373   :  { %v4619_v11 = vld [vmem:[#allocation23_spill] sm:$0xff] }
 0x374   :  { %3339 = vtanh.f32 %v3992_v63  ;;  %v1040_v28 = vadd.f32 0.5, %v1039_v17  ;;  %v2955_v17 = vld [vmem:[#allocation4 + $0x1c0] sm:$0xf] }
 0x37a   :  { %v3340_v52 = vpop.eup %3339 }
 0x37b   :  { %v3995_v16 = vmul.f32 %v3340_v52, %v1040_v28  ;;  %v3239_v28 = vld [vmem:[#allocation4 + $0x1cc] sm:$0xf0]  ;;  %v3237_v52 = vld [vmem:[#allocation4 + $0x1c4] sm:$0xf] }
 0x37d   :  { %v1055_v56 = vpack.c.bf16 %v3995_v16, %v3995_v16 }
 0x37f   :  { %1064 = vmatmul.bf16.vlgmr.msra.gmra.mxu0 %v1055_v56  ;;  %1077 = vmatmul.bf16.vlgmr.msra.gmra.mxu1 %v1055_v56 }
 0x380   :  { %1090 = vmatmul.bf16.vlgmr.msra.gmra.mxu2 %v1055_v56  ;;  %1103 = vmatmul.bf16.vlgmr.msra.gmra.mxu3 %v1055_v56  ;;  %v2956_v56 = vor.u32 %v3239_v28, %v2955_v17  ;;  %v2891_v17 = vld [vmem:[#allocation4 + $0x140] sm:$0xf] }
 0x381   :  { %1224 = vmatpush.bf16.msra.mxu0 %v3552_v37  ;;  %1237 = vmatpush.bf16.msra.mxu1 %v3554_v41  ;;  %v4615_v37 = vld [vmem:[#allocation18_spill] sm:$0xff] }
 0x382   :  { %1250 = vmatpush.bf16.msra.mxu2 %v3556_v47  ;;  %1263 = vmatpush.bf16.msra.mxu3 %v3559_v49  ;;  %v312_v41 = vadd.f32 %v4615_v37, %v3732_v30  ;;  %v4616_v47 = vld [vmem:[#allocation20_spill] sm:$0xff] }
 0x383   :  { %v341_v49 = vadd.f32 %v4616_v47, %v3736_v35  ;;  %v2957_v37 = vld [vmem:[#allocation4 + $0x1d0] sm:$0xf0]  ;;  %v3240_v47 = vld [vmem:[#allocation4 + $0x1d4] sm:$0xf0] }
 0x385   :  { %1225 = vmatpush.bf16.msra.mxu0 %v3561_v50  ;;  %1238 = vmatpush.bf16.msra.mxu1 %v3564_v53 }
 0x386   :  { %1251 = vmatpush.bf16.msra.mxu2 %v3567_v59  ;;  %1264 = vmatpush.bf16.msra.mxu3 %v3571_v60 }
 0x389   :  { %1226 = vmatpush.bf16.msra.mxu0 %v3573_v61  ;;  %1239 = vmatpush.bf16.msra.mxu1 %v3576_v1 }
 0x38a   :  { %1252 = vmatpush.bf16.msra.mxu2 %v3579_v7  ;;  %1265 = vmatpush.bf16.msra.mxu3 %v3583_v8  ;;  %v4617_v7 = vld [vmem:[#allocation21_spill] sm:$0xff] }
 0x38b   :  { %v370_v8 = vadd.f32 %v4617_v7, %v3746_v45  ;;  %v3233_v7 = vld [vmem:[#allocation4 + $0x1a4] sm:$0xf] }
 0x38d   :  { %1227 = vmatpush.bf16.msra.mxu0 %v3585_v9  ;;  %1240 = vmatpush.bf16.msra.mxu1 %v3588_v13  ;;  %v4618_v9 = vld [vmem:[#allocation22_spill] sm:$0xff] }
 0x38e   :  { %1253 = vmatpush.bf16.msra.mxu2 %v3594_v20  ;;  %1266 = vmatpush.bf16.msra.mxu3 %v3598_v21  ;;  %v399_v13 = vadd.f32 %v4618_v9, %v3748_v51  ;;  %v2941_v9 = vld [vmem:[#allocation4 + $0x1b0] sm:$0xf0] }
 0x391   :  { %1228 = vmatpush.bf16.msra.mxu0 %v3600_v22  ;;  %1241 = vmatpush.bf16.msra.mxu1 %v3603_v26 }
 0x392   :  { %1254 = vmatpush.bf16.msra.mxu2 %v3606_v32  ;;  %1267 = vmatpush.bf16.msra.mxu3 %v3610_v33 }
 0x395   :  { %1229 = vmatpush.bf16.msra.mxu0 %v3612_v34  ;;  %1242 = vmatpush.bf16.msra.mxu1 %v3615_v38 }
 0x396   :  { %1255 = vmatpush.bf16.msra.mxu2 %v3618_v42  ;;  %1268 = vmatpush.bf16.msra.mxu3 %v3622_v46 }
 0x399   :  { %1230 = vmatpush.bf16.msra.mxu0 %v3624_v48  ;;  %1243 = vmatpush.bf16.msra.mxu1 %v3627_v55 }
 0x39a   :  { %1256 = vmatpush.bf16.msra.mxu2 %v3630_v2  ;;  %1269 = vmatpush.bf16.msra.mxu3 %v3634_v3 }
 0x39d   :  { %1231 = vmatpush.bf16.msra.mxu0 %v3636_v4  ;;  %1244 = vmatpush.bf16.msra.mxu1 %v3639_v10 }
 0x39e   :  { %1257 = vmatpush.bf16.msra.mxu2 %v3642_v14  ;;  %1270 = vmatpush.bf16.msra.mxu3 %v3646_v15 }
 0x3fc   :  { %v1065_v50 = vpop.f32.mrf.mxu0  ;;  %v1078_v53 = vpop.f32.mrf.mxu1 }
 0x3fd   :  { %v1108_v59 = vadd.f32 %v1065_v50, %v312_v41  ;;  %v1109_v60 = vadd.f32 %v1078_v53, %v341_v49  ;;  %v2963_v41 = vld [vmem:[#allocation4 + $0x1c8] sm:$0xf]  ;;  %v2960_v49 = vor.u32 %v3237_v52, %v2957_v37  ;;  %v3238_v53 = vld [vmem:[#allocation4 + $0x1cc] sm:$0xf]  ;;  %v3223_v52 = vld [vmem:[#allocation4 + $0x14c] sm:$0xf0] }
 0x3fe   :  { %v2964_v50 = vor.u32 %v3240_v47, %v2963_v41  ;;  %v2893_v37 = vld [vmem:[#allocation4 + $0x150] sm:$0xf0] }
 0x3ff   :  { %v1112_v61 = vmul.f32 0.5, %v1108_v59  ;;  %v1116_v1 = vmul.f32 0.5, %v1109_v60  ;;  %v2965_v59 = vld [vmem:[#allocation4 + $0x1d8] sm:$0xf0] }
 0x400   :  { %v2968_v60 = vor.u32 %v3238_v53, %v2965_v59  ;;  %v2899_v53 = vld [vmem:[#allocation4 + $0x148] sm:$0xf]  ;;  %v3224_v59 = vld [vmem:[#allocation4 + $0x154] sm:$0xf0] }
 0x401   :  { %3341 = vtanh.f32 %v1112_v61  ;;  %v2939_v61 = vld [vmem:[#allocation4 + $0x1a0] sm:$0xf] }
 0x402   :  { %3343 = vtanh.f32 %v1116_v1  ;;  %v3235_v1 = vld [vmem:[#allocation4 + $0x1ac] sm:$0xf0] }
 0x403   :  { %v1091_v20 = vpop.f32.mrf.mxu2  ;;  %v1104_v21 = vpop.f32.mrf.mxu3 }
 0x404   :  { %v1110_v22 = vadd.f32 %v1091_v20, %v370_v8  ;;  %v1111_v26 = vadd.f32 %v1104_v21, %v399_v13  ;;  %v1067_v32 = vpop.f32.mrf.mxu0  ;;  %v1080_v33 = vpop.f32.mrf.mxu1  ;;  %v2940_v8 = vor.u32 %v3235_v1, %v2939_v61  ;;  %v2947_v13 = vld [vmem:[#allocation4 + $0x1a8] sm:$0xf]  ;;  %v3236_v20 = vld [vmem:[#allocation4 + $0x1b4] sm:$0xf0]  ;;  %v2944_v21 = vor.u32 %v3233_v7, %v2941_v9  ;;  %v3222_v61 = vld [vmem:[#allocation4 + $0x14c] sm:$0xf] }
 0x405   :  { %v2949_v32 = vld [vmem:[#allocation4 + $0x1b8] sm:$0xf0]  ;;  %v2875_v7 = vld [vmem:[#allocation4 + $0x120] sm:$0xf]  ;;  %v3219_v9 = vld [vmem:[#allocation4 + $0x12c] sm:$0xf0] }
 0x406   :  { %3345 = vtanh.f32 %v1110_v22  ;;  %v1121_v34 = vmul.f32 0.5, %v1111_v26  ;;  %v2948_v22 = vor.u32 %v3236_v20, %v2947_v13  ;;  %v3234_v26 = vld [vmem:[#allocation4 + $0x1ac] sm:$0xf]  ;;  %v2901_v1 = vld [vmem:[#allocation4 + $0x158] sm:$0xf0] }
 0x407   :  { %v3342_v38 = vpop.eup %3341  ;;  %v2952_v33 = vor.u32 %v3234_v26, %v2949_v32  ;;  %v3217_v13 = vld [vmem:[#allocation4 + $0x124] sm:$0xf]  ;;  %v2877_v20 = vld [vmem:[#allocation4 + $0x130] sm:$0xf0]  ;;  %v3220_v26 = vld [vmem:[#allocation4 + $0x134] sm:$0xf0] }
 0x408   :  { %v3344_v42 = vpop.eup %3343  ;;  %v1114_v46 = vmul.f32 0.5, %v3342_v38  ;;  %3347 = vtanh.f32 %v1121_v34  ;;  %v2923_v34 = vld [vmem:[#allocation4 + $0x180] sm:$0xf]  ;;  %v3231_v38 = vld [vmem:[#allocation4 + $0x18c] sm:$0xf0] }
 0x409   :  { %v1118_v48 = vmul.f32 0.5, %v3344_v42  ;;  %v3229_v42 = vld [vmem:[#allocation4 + $0x184] sm:$0xf]  ;;  %v3218_v32 = vld [vmem:[#allocation4 + $0x12c] sm:$0xf] }
 0x40a   :  { %v1115_v55 = vadd.f32 0.5, %v1114_v46  ;;  %v2924_v46 = vor.u32 %v3231_v38, %v2923_v34  ;;  %v2880_v38 = vor.u32 %v3217_v13, %v2877_v20  ;;  %v3101_v13 = vld [vmem:[#allocation6 + $0x1f0] sm:$0xf0]  ;;  %v3107_v20 = vld [vmem:[#allocation6 + $0x1e8] sm:$0xf] }
 0x40b   :  { %v1119_v2 = vadd.f32 0.5, %v1118_v48  ;;  %v1093_v3 = vpop.f32.mrf.mxu2  ;;  %v1106_v4 = vpop.f32.mrf.mxu3  ;;  %v2925_v48 = vld [vmem:[#allocation4 + $0x190] sm:$0xf0] }
 0x40c   :  { %v3346_v10 = vpop.eup %3345  ;;  %v2928_v3 = vor.u32 %v3229_v42, %v2925_v48  ;;  %v2859_v48 = vld [vmem:[#allocation4 + $0x100] sm:$0xf] }
 0x40d   :  { %v1125_v14 = vmul.f32 %v1119_v2, %v3992_v63  ;;  %v1126_v15 = vmul.f32 %v3346_v10, %v1115_v55  ;;  %v2984_v63 = vor.u32 %v3242_v43, %v2981_v54  ;;  %v2931_v55 = vld [vmem:[#allocation4 + $0x188] sm:$0xf]  ;;  %v3232_v2 = vld [vmem:[#allocation4 + $0x194] sm:$0xf0]  ;;  %v3230_v10 = vld [vmem:[#allocation4 + $0x18c] sm:$0xf] }
 0x40e   :  { %v3348_v36 = vpop.eup %3347  ;;  %v2932_v4 = vor.u32 %v3232_v2, %v2931_v55  ;;  %v3226_v54 = vld [vmem:[#allocation4 + $0x16c] sm:$0xf]  ;;  %v3215_v55 = vld [vmem:[#allocation4 + $0x10c] sm:$0xf0]  ;;  %v4621_v2 = vld [vmem:[#allocation25_spill] sm:$0xff] }
 0x40f   :  { %v4040_v18 = vadd.f32 %v1126_v15, %v1125_v14  ;;  %v1123_v57 = vmul.f32 0.5, %v3348_v36  ;;  %v2933_v14 = vld [vmem:[#allocation4 + $0x198] sm:$0xf0]  ;;  %v2907_v36 = vld [vmem:[#allocation4 + $0x160] sm:$0xf] }
 0x410   :  { %v2936_v15 = vor.u32 %v3230_v10, %v2933_v14 }
 0x411   :  { %3349 = vtanh.f32 %v4040_v18  ;;  %v1124_v58 = vadd.f32 0.5, %v1123_v57  ;;  %v3227_v57 = vld [vmem:[#allocation4 + $0x16c] sm:$0xf0] }
 0x412   :  { %v2908_v19 = vor.u32 %v3227_v57, %v2907_v36  ;;  %v3213_v57 = vld [vmem:[#allocation4 + $0x104] sm:$0xf] }
 0x417   :  { %v3350_v12 = vpop.eup %3349 }
 0x418   :  { %v4043_v31 = vmul.f32 %v3350_v12, %v1124_v58  ;;  %v3225_v58 = vld [vmem:[#allocation4 + $0x164] sm:$0xf] }
 0x41a   :  { %v1139_v29 = vpack.c.bf16 %v4043_v31, %v4043_v31 }
 0x41c   :  { %1148 = vmatmul.bf16.vlgmr.msrb.gmra.mxu0 %v1139_v29  ;;  %1161 = vmatmul.bf16.vlgmr.msrb.gmra.mxu1 %v1139_v29 }
 0x41d   :  { %1174 = vmatmul.bf16.vlgmr.msrb.gmra.mxu2 %v1139_v29  ;;  %1187 = vmatmul.bf16.vlgmr.msrb.gmra.mxu3 %v1139_v29 }
 0x41e   :  { %1516 = vmatpush.bf16.msrb.mxu0 %v2972_v44  ;;  %1545 = vmatpush.bf16.msrb.mxu1 %v2976_v0  ;;  %v3228_v44 = vld [vmem:[#allocation4 + $0x174] sm:$0xf0] }
 0x41f   :  { %1574 = vmatpush.bf16.msrb.mxu2 %v2980_v24  ;;  %1603 = vmatpush.bf16.msrb.mxu3 %v2984_v63  ;;  %v2912_v24 = vor.u32 %v3225_v58, %v2909_v23  ;;  %v2916_v43 = vor.u32 %v3228_v44, %v2915_v40  ;;  %v2917_v63 = vld [vmem:[#allocation4 + $0x178] sm:$0xf0]  ;;  %v2861_v58 = vld [vmem:[#allocation4 + $0x110] sm:$0xf0]  ;;  %v2860_v44 = vor.u32 %v3215_v55, %v2859_v48  ;;  %v3091_v55 = vld [vmem:[#allocation6 + $0x1c8] sm:$0xf] }
 0x420   :  { %v2920_v28 = vor.u32 %v3226_v54, %v2917_v63  ;;  %v2869_v23 = vld [vmem:[#allocation4 + $0x118] sm:$0xf0] }
 0x422   :  { %1517 = vmatpush.bf16.msrb.mxu0 %v2956_v56  ;;  %1546 = vmatpush.bf16.msrb.mxu1 %v2960_v49  ;;  %v3221_v56 = vld [vmem:[#allocation4 + $0x144] sm:$0xf]  ;;  %v2892_v49 = vor.u32 %v3223_v52, %v2891_v17 }
 0x423   :  { %1575 = vmatpush.bf16.msrb.mxu2 %v2964_v50  ;;  %1604 = vmatpush.bf16.msrb.mxu3 %v2968_v60  ;;  %v2896_v50 = vor.u32 %v3221_v56, %v2893_v37  ;;  %v2900_v60 = vor.u32 %v3224_v59, %v2899_v53 }
 0x426   :  { %1518 = vmatpush.bf16.msrb.mxu0 %v2940_v8  ;;  %1547 = vmatpush.bf16.msrb.mxu1 %v2944_v21  ;;  %v2904_v8 = vor.u32 %v3222_v61, %v2901_v1  ;;  %v2876_v21 = vor.u32 %v3219_v9, %v2875_v7  ;;  %v3099_v1 = vld [vmem:[#allocation6 + $0x1e0] sm:$0xf]  ;;  %v3275_v7 = vld [vmem:[#allocation6 + $0x1ec] sm:$0xf0] }
 0x427   :  { %1576 = vmatpush.bf16.msrb.mxu2 %v2948_v22  ;;  %1605 = vmatpush.bf16.msrb.mxu3 %v2952_v33  ;;  %v2883_v22 = vld [vmem:[#allocation4 + $0x128] sm:$0xf]  ;;  %v4061_v9 = vor.u32 %v3275_v7, %v3099_v1  ;;  %v3258_v1 = vld [vmem:[#allocation6 + $0x16c] sm:$0xf]  ;;  %v4623_v7 = vld [vmem:[#allocation26_spill] sm:$0xff] }
 0x428   :  { %v2884_v42 = vor.u32 %v3220_v26, %v2883_v22 }
 0x42a   :  { %1519 = vmatpush.bf16.msrb.mxu0 %v2924_v46  ;;  %1548 = vmatpush.bf16.msrb.mxu1 %v2928_v3  ;;  %v2885_v46 = vld [vmem:[#allocation4 + $0x138] sm:$0xf0] }
 0x42b   :  { %1577 = vmatpush.bf16.msrb.mxu2 %v2932_v4  ;;  %1606 = vmatpush.bf16.msrb.mxu3 %v2936_v15  ;;  %v4622_v4 = vld [vmem:[#allocation27_spill] sm:$0xff]  ;;  %v2888_v36 = vor.u32 %v3218_v32, %v2885_v46 }
 0x42c   :  { %v3274_v32 = vld [vmem:[#allocation6 + $0x1ec] sm:$0xf] }
 0x42e   :  { %1520 = vmatpush.bf16.msrb.mxu0 %v2908_v19  ;;  %1549 = vmatpush.bf16.msrb.mxu1 %v2912_v24  ;;  %v3214_v19 = vld [vmem:[#allocation4 + $0x10c] sm:$0xf] }
 0x42f   :  { %1578 = vmatpush.bf16.msrb.mxu2 %v2916_v43  ;;  %1607 = vmatpush.bf16.msrb.mxu3 %v2920_v28  ;;  %v2872_v43 = vor.u32 %v3214_v19, %v2869_v23  ;;  %v3268_v19 = vld [vmem:[#allocation6 + $0x1b4] sm:$0xf0] }
 0x432   :  { %1521 = vmatpush.bf16.msrb.mxu0 %v2892_v49  ;;  %1550 = vmatpush.bf16.msrb.mxu1 %v2896_v50 }
 0x433   :  { %1579 = vmatpush.bf16.msrb.mxu2 %v2900_v60  ;;  %1608 = vmatpush.bf16.msrb.mxu3 %v2904_v8  ;;  %v3273_v8 = vld [vmem:[#allocation6 + $0x1e4] sm:$0xf] }
 0x434   :  { %v4063_v22 = vor.u32 %v3273_v8, %v3101_v13  ;;  %v317_v8 = vadd.f32 %v4623_v7, %v3732_v30  ;;  %v4624_v13 = vld [vmem:[#allocation28_spill] sm:$0xff] }
 0x436   :  { %1522 = vmatpush.bf16.msrb.mxu0 %v2876_v21  ;;  %1551 = vmatpush.bf16.msrb.mxu1 %v2880_v38  ;;  %v3276_v21 = vld [vmem:[#allocation6 + $0x1f4] sm:$0xf0]  ;;  %v3269_v38 = vld [vmem:[#allocation6 + $0x1c4] sm:$0xf] }
 0x437   :  { %1580 = vmatpush.bf16.msrb.mxu2 %v2884_v42  ;;  %1609 = vmatpush.bf16.msrb.mxu3 %v2888_v36  ;;  %v4065_v26 = vor.u32 %v3276_v21, %v3107_v20  ;;  %v3085_v42 = vld [vmem:[#allocation6 + $0x1d0] sm:$0xf0]  ;;  %v346_v20 = vadd.f32 %v4624_v13, %v3736_v35  ;;  %v3256_v35 = vld [vmem:[#allocation6 + $0x154] sm:$0xf0] }
 0x438   :  { %v4074_v48 = vor.u32 %v3269_v38, %v3085_v42 }
 0x43a   :  { %1523 = vmatpush.bf16.msrb.mxu0 %v2860_v44  ;;  %v1309_v44 = vpack.c.bf16 %v3951_v5, %v3903_v25  ;;  %v3261_v25 = vld [vmem:[#allocation6 + $0x184] sm:$0xf] }
 0x43b   :  { %1610 = vmatpush.bf16.msrb.mxu3 %v2872_v43  ;;  %v3263_v43 = vld [vmem:[#allocation6 + $0x18c] sm:$0xf0] }
 0x499   :  { %v1149_v12 = vpop.f32.mrf.mxu0  ;;  %v1162_v29 = vpop.f32.mrf.mxu1 }
 0x49a   :  { %v1192_v27 = vadd.f32 %v1149_v12, %v4619_v11  ;;  %v1193_v0 = vadd.f32 %v1162_v29, %v4620_v6  ;;  %v2867_v12 = vld [vmem:[#allocation4 + $0x108] sm:$0xf]  ;;  %v3216_v29 = vld [vmem:[#allocation4 + $0x114] sm:$0xf0] }
 0x49b   :  { %v2868_v6 = vor.u32 %v3216_v29, %v2867_v12  ;;  %v3075_v12 = vld [vmem:[#allocation6 + $0x1a8] sm:$0xf] }
 0x49c   :  { %v1196_v41 = vmul.f32 0.5, %v1192_v27  ;;  %v1200_v47 = vmul.f32 0.5, %v1193_v0  ;;  %v2864_v27 = vor.u32 %v3213_v57, %v2861_v58  ;;  %v3265_v57 = vld [vmem:[#allocation6 + $0x1a4] sm:$0xf]  ;;  %v3069_v58 = vld [vmem:[#allocation6 + $0x1b0] sm:$0xf0] }
 0x49d   :  { %1581 = vmatpush.bf16.msrb.mxu2 %v2868_v6  ;;  %v4086_v23 = vor.u32 %v3265_v57, %v3069_v58  ;;  %v3077_v6 = vld [vmem:[#allocation6 + $0x1b8] sm:$0xf0] }
 0x49e   :  { %3351 = vtanh.f32 %v1196_v41  ;;  %1552 = vmatpush.bf16.msrb.mxu1 %v2864_v27  ;;  %v3266_v27 = vld [vmem:[#allocation6 + $0x1ac] sm:$0xf]  ;;  %v3029_v57 = vld [vmem:[#allocation6 + $0x158] sm:$0xf0] }
 0x49f   :  { %3353 = vtanh.f32 %v1200_v47 }
 0x4a0   :  { %v1175_v33 = vpop.f32.mrf.mxu2  ;;  %v1188_v34 = vpop.f32.mrf.mxu3 }
 0x4a1   :  { %v1194_v3 = vadd.f32 %v1175_v33, %v4621_v2  ;;  %v1195_v10 = vadd.f32 %v1188_v34, %v4622_v4  ;;  %v1151_v14 = vpop.f32.mrf.mxu0  ;;  %v1164_v15 = vpop.f32.mrf.mxu1  ;;  %v3109_v33 = vld [vmem:[#allocation6 + $0x1f8] sm:$0xf0]  ;;  %v3083_v34 = vld [vmem:[#allocation6 + $0x1c0] sm:$0xf]  ;;  %v3272_v2 = vld [vmem:[#allocation6 + $0x1d4] sm:$0xf0] }
 0x4a2   :  { %v4077_v4 = vor.u32 %v3272_v2, %v3091_v55  ;;  %v3067_v14 = vld [vmem:[#allocation6 + $0x1a0] sm:$0xf]  ;;  %v3267_v15 = vld [vmem:[#allocation6 + $0x1ac] sm:$0xf0]  ;;  %v3253_v55 = vld [vmem:[#allocation6 + $0x144] sm:$0xf] }
 0x4a3   :  { %3355 = vtanh.f32 %v1194_v3  ;;  %v1205_v40 = vmul.f32 0.5, %v1195_v10  ;;  %v3270_v3 = vld [vmem:[#allocation6 + $0x1cc] sm:$0xf]  ;;  %v3093_v10 = vld [vmem:[#allocation6 + $0x1d8] sm:$0xf0]  ;;  %v4082_v29 = vor.u32 %v3267_v15, %v3067_v14 }
 0x4a4   :  { %v3352_v11 = vpop.eup %3351  ;;  %v4079_v36 = vor.u32 %v3270_v3, %v3093_v10  ;;  %v3021_v2 = vld [vmem:[#allocation6 + $0x150] sm:$0xf0]  ;;  %v3027_v3 = vld [vmem:[#allocation6 + $0x148] sm:$0xf]  ;;  %v3254_v15 = vld [vmem:[#allocation6 + $0x14c] sm:$0xf] }
 0x4a5   :  { %v3354_v0 = vpop.eup %3353  ;;  %v1198_v24 = vmul.f32 0.5, %v3352_v11  ;;  %3357 = vtanh.f32 %v1205_v40  ;;  %v4088_v40 = vor.u32 %v3268_v19, %v3075_v12  ;;  %v1310_v11 = vpack.c.bf16 %v4043_v31, %v3995_v16  ;;  %v3262_v31 = vld [vmem:[#allocation6 + $0x18c] sm:$0xf]  ;;  %v3003_v19 = vld [vmem:[#allocation6 + $0x120] sm:$0xf] }
 0x4a6   :  { %v1202_v54 = vmul.f32 0.5, %v3354_v0  ;;  %v4098_v0 = vor.u32 %v3266_v27, %v3077_v6  ;;  %v4130_v58 = vor.u32 %v3253_v55, %v3021_v2  ;;  %v4132_v12 = vor.u32 %v3256_v35, %v3027_v3  ;;  %v3248_v55 = vld [vmem:[#allocation6 + $0x114] sm:$0xf0]  ;;  %v2997_v35 = vld [vmem:[#allocation6 + $0x118] sm:$0xf0] }
 0x4a7   :  { %v1199_v63 = vadd.f32 0.5, %v1198_v24  ;;  %v3051_v24 = vld [vmem:[#allocation6 + $0x180] sm:$0xf] }
 0x4a8   :  { %v1203_v17 = vadd.f32 0.5, %v1202_v54  ;;  %v1177_v28 = vpop.f32.mrf.mxu2  ;;  %v1190_v52 = vpop.f32.mrf.mxu3  ;;  %v4101_v5 = vor.u32 %v3263_v43, %v3051_v24  ;;  %v3053_v54 = vld [vmem:[#allocation6 + $0x190] sm:$0xf0]  ;;  %v4135_v24 = vor.u32 %v3254_v15, %v3029_v57 }
 0x4a9   :  { %v3356_v56 = vpop.eup %3355  ;;  %v4103_v28 = vor.u32 %v3261_v25, %v3053_v54  ;;  %v3061_v52 = vld [vmem:[#allocation6 + $0x198] sm:$0xf0]  ;;  %v3005_v43 = vld [vmem:[#allocation6 + $0x130] sm:$0xf0]  ;;  %v3011_v25 = vld [vmem:[#allocation6 + $0x128] sm:$0xf] }
 0x4aa   :  { %v1209_v37 = vmul.f32 %v1203_v17, %v4040_v18  ;;  %v1210_v41 = vmul.f32 %v3356_v56, %v1199_v63  ;;  %v1308_v18 = vpack.c.bf16 %v3859_v39, %v3811_v62  ;;  %v4068_v62 = vor.u32 %v3274_v32, %v3109_v33  ;;  %v3271_v39 = vld [vmem:[#allocation6 + $0x1cc] sm:$0xf0]  ;;  %v3059_v63 = vld [vmem:[#allocation6 + $0x188] sm:$0xf]  ;;  %v3264_v17 = vld [vmem:[#allocation6 + $0x194] sm:$0xf0] }
 0x4ab   :  { %v3358_v47 = vpop.eup %3357  ;;  %v4072_v46 = vor.u32 %v3271_v39, %v3083_v34  ;;  %v4105_v16 = vor.u32 %v3264_v17, %v3059_v63  ;;  %v3035_v56 = vld [vmem:[#allocation6 + $0x160] sm:$0xf]  ;;  %v3045_v32 = vld [vmem:[#allocation6 + $0x178] sm:$0xf0]  ;;  %v3255_v34 = vld [vmem:[#allocation6 + $0x14c] sm:$0xf0] }
 0x4ac   :  { %v4052_v49 = vadd.f32 %v1210_v41, %v1209_v37  ;;  %v1207_v50 = vmul.f32 0.5, %v3358_v47  ;;  %v4108_v37 = vor.u32 %v3262_v31, %v3061_v52  ;;  %v3259_v41 = vld [vmem:[#allocation6 + $0x16c] sm:$0xf0]  ;;  %v3257_v47 = vld [vmem:[#allocation6 + $0x164] sm:$0xf]  ;;  %v4123_v42 = vor.u32 %v3258_v1, %v3045_v32  ;;  %v4625_v31 = vld [vmem:[#allocation29_spill] sm:$0xff] }
 0x4ad   :  { %v3019_v33 = vld [vmem:[#allocation6 + $0x140] sm:$0xf]  ;;  %v3252_v54 = vld [vmem:[#allocation6 + $0x134] sm:$0xf0]  ;;  %v3250_v63 = vld [vmem:[#allocation6 + $0x12c] sm:$0xf]  ;;  %v375_v52 = vadd.f32 %v4625_v31, %v3746_v45 }
 0x4ae   :  { %3359 = vtanh.f32 %v4052_v49  ;;  %v1208_v53 = vadd.f32 0.5, %v1207_v50  ;;  %v3037_v50 = vld [vmem:[#allocation6 + $0x170] sm:$0xf0]  ;;  %v4126_v30 = vor.u32 %v3255_v34, %v3019_v33  ;;  %v3013_v17 = vld [vmem:[#allocation6 + $0x138] sm:$0xf0] }
 0x4af   :  { %v4151_v45 = vor.u32 %v3250_v63, %v3013_v17  ;;  %v3247_v32 = vld [vmem:[#allocation6 + $0x10c] sm:$0xf0]  ;;  %v3245_v33 = vld [vmem:[#allocation6 + $0x104] sm:$0xf] }
 0x4b4   :  { %v3360_v59 = vpop.eup %3359 }
 0x4b5   :  { %v4055_v60 = vmul.f32 %v3360_v59, %v1208_v53  ;;  %v4112_v53 = vor.u32 %v3259_v41, %v3035_v56  ;;  %v4114_v59 = vor.u32 %v3257_v47, %v3037_v50  ;;  %v4626_v41 = vld [vmem:[#allocation30_spill] sm:$0xff] }
 0x4b6   :  { %v404_v47 = vadd.f32 %v4626_v41, %v3748_v51  ;;  %v2987_v51 = vld [vmem:[#allocation6 + $0x100] sm:$0xf] }
 0x4b7   :  { %v1223_v61 = vpack.c.bf16 %v4055_v60, %v4055_v60  ;;  %v4154_v34 = vor.u32 %v3247_v32, %v2987_v51 }
 0x4b9   :  { %1232 = vmatmul.bf16.vlgmr.msra.gmra.mxu0 %v1223_v61  ;;  %1245 = vmatmul.bf16.vlgmr.msra.gmra.mxu1 %v1223_v61 }
 0x4ba   :  { %1258 = vmatmul.bf16.vlgmr.msra.gmra.mxu2 %v1223_v61  ;;  %1271 = vmatmul.bf16.vlgmr.msra.gmra.mxu3 %v1223_v61  ;;  %v3043_v61 = vld [vmem:[#allocation6 + $0x168] sm:$0xf] }
 0x4bb   :  { %1861 = vmatpush.bf16.msra.mxu0 %v4061_v9  ;;  %1874 = vmatpush.bf16.msra.mxu1 %v4063_v22 }
 0x4bc   :  { %1887 = vmatpush.bf16.msra.mxu2 %v4065_v26  ;;  %1900 = vmatpush.bf16.msra.mxu3 %v4068_v62 }
 0x4bf   :  { %1862 = vmatpush.bf16.msra.mxu0 %v4072_v46  ;;  %1875 = vmatpush.bf16.msra.mxu1 %v4074_v48 }
 0x4c0   :  { %1888 = vmatpush.bf16.msra.mxu2 %v4077_v4  ;;  %1901 = vmatpush.bf16.msra.mxu3 %v4079_v36 }
 0x4c3   :  { %1863 = vmatpush.bf16.msra.mxu0 %v4082_v29  ;;  %1876 = vmatpush.bf16.msra.mxu1 %v4086_v23 }
 0x4c4   :  { %1889 = vmatpush.bf16.msra.mxu2 %v4088_v40  ;;  %1902 = vmatpush.bf16.msra.mxu3 %v4098_v0 }
 0x4c7   :  { %1864 = vmatpush.bf16.msra.mxu0 %v4101_v5  ;;  %1877 = vmatpush.bf16.msra.mxu1 %v4103_v28 }
 0x4c8   :  { %1890 = vmatpush.bf16.msra.mxu2 %v4105_v16  ;;  %1903 = vmatpush.bf16.msra.mxu3 %v4108_v37 }
 0x4c9   :  { %1524 = vmatmul.bf16.vlgmr.msrb.gmra.mxu0 %v1308_v18  ;;  %1553 = vmatmul.bf16.vlgmr.msrb.gmra.mxu1 %v1308_v18 }
 0x4ca   :  { %1582 = vmatmul.bf16.vlgmr.msrb.gmra.mxu2 %v1308_v18  ;;  %1611 = vmatmul.bf16.vlgmr.msrb.gmra.mxu3 %v1308_v18  ;;  %v3260_v18 = vld [vmem:[#allocation6 + $0x174] sm:$0xf0] }
 0x4cb   :  { %v4121_v21 = vor.u32 %v3260_v18, %v3043_v61  ;;  %1865 = vmatpush.bf16.msra.mxu0 %v4112_v53  ;;  %1878 = vmatpush.bf16.msra.mxu1 %v4114_v59  ;;  %v4148_v61 = vor.u32 %v3252_v54, %v3011_v25 }
 0x4cc   :  { %1904 = vmatpush.bf16.msra.mxu3 %v4123_v42 }
 0x4cd   :  { %1891 = vmatpush.bf16.msra.mxu2 %v4121_v21 }
 0x4cf   :  { %1866 = vmatpush.bf16.msra.mxu0 %v4126_v30  ;;  %1879 = vmatpush.bf16.msra.mxu1 %v4130_v58 }
 0x4d0   :  { %1905 = vmatpush.bf16.msra.mxu3 %v4135_v24 }
 0x4d1   :  { %1892 = vmatpush.bf16.msra.mxu2 %v4132_v12 }
 0x4d4   :  { %1906 = vmatpush.bf16.msra.mxu3 %v4151_v45 }
 0x4d5   :  { %1893 = vmatpush.bf16.msra.mxu2 %v4148_v61 }
 0x4d9   :  { %1529 = vmatmul.bf16.gmra.mxu0 %v1309_v44  ;;  %1558 = vmatmul.bf16.gmra.mxu1 %v1309_v44 }
 0x4da   :  { %1587 = vmatmul.bf16.gmra.mxu2 %v1309_v44  ;;  %1616 = vmatmul.bf16.gmra.mxu3 %v1309_v44  ;;  %v3251_v44 = vld [vmem:[#allocation6 + $0x12c] sm:$0xf0] }
 0x4db   :  { %v4140_v56 = vor.u32 %v3251_v44, %v3003_v19 }
 0x4dd   :  { %1867 = vmatpush.bf16.msra.mxu0 %v4140_v56 }
 0x4e1   :  { %1868 = vmatpush.bf16.msra.mxu0 %v4154_v34 }
 0x4e5   :  { %1940 = vmatpush.bf16.msrb.mxu0 %v4061_v9 }
 0x4e9   :  { %1534 = vmatmul.bf16.gmra.mxu0 %v1310_v11  ;;  %1563 = vmatmul.bf16.gmra.mxu1 %v1310_v11 }
 0x4ea   :  { %1592 = vmatmul.bf16.gmra.mxu2 %v1310_v11  ;;  %1621 = vmatmul.bf16.gmra.mxu3 %v1310_v11  ;;  %v3249_v11 = vld [vmem:[#allocation6 + $0x124] sm:$0xf] }
 0x4eb   :  { %v4146_v50 = vor.u32 %v3249_v11, %v3005_v43  ;;  %1941 = vmatpush.bf16.msrb.mxu0 %v4072_v46 }
 0x4ed   :  { %1880 = vmatpush.bf16.msra.mxu1 %v4146_v50 }
 0x4ef   :  { %1942 = vmatpush.bf16.msrb.mxu0 %v4082_v29 }
 0x4f3   :  { %1943 = vmatpush.bf16.msrb.mxu0 %v4101_v5 }
 0x4f7   :  { %1944 = vmatpush.bf16.msrb.mxu0 %v4112_v53 }
 0x4fb   :  { %1945 = vmatpush.bf16.msrb.mxu0 %v4126_v30 }
 0x4ff   :  { %1946 = vmatpush.bf16.msrb.mxu0 %v4140_v56 }
 0x503   :  { %1947 = vmatpush.bf16.msrb.mxu0 %v4154_v34 }
 0x536   :  { %v1233_v39 = vpop.f32.mrf.mxu0  ;;  %v1246_v38 = vpop.f32.mrf.mxu1 }
 0x537   :  { %v1276_v10 = vadd.f32 %v1233_v39, %v317_v8  ;;  %v1277_v14 = vadd.f32 %v1246_v38, %v346_v20  ;;  %v2989_v39 = vld [vmem:[#allocation6 + $0x110] sm:$0xf0]  ;;  %v2995_v38 = vld [vmem:[#allocation6 + $0x108] sm:$0xf] }
 0x538   :  { %v4158_v3 = vor.u32 %v3245_v33, %v2989_v39 }
 0x539   :  { %v1280_v27 = vmul.f32 0.5, %v1276_v10  ;;  %v1284_v6 = vmul.f32 0.5, %v1277_v14  ;;  %v4160_v10 = vor.u32 %v3248_v55, %v2995_v38  ;;  %v3246_v14 = vld [vmem:[#allocation6 + $0x10c] sm:$0xf] }
 0x53a   :  { %v4163_v57 = vor.u32 %v3246_v14, %v2997_v35  ;;  %1881 = vmatpush.bf16.msra.mxu1 %v4158_v3 }
 0x53b   :  { %3361 = vtanh.f32 %v1280_v27  ;;  %1894 = vmatpush.bf16.msra.mxu2 %v4160_v10 }
 0x53c   :  { %3363 = vtanh.f32 %v1284_v6  ;;  %1907 = vmatpush.bf16.msra.mxu3 %v4163_v57 }
 0x53d   :  { %v1259_v18 = vpop.f32.mrf.mxu2  ;;  %v1272_v1 = vpop.f32.mrf.mxu3 }
 0x53e   :  { %v1278_v7 = vadd.f32 %v1259_v18, %v375_v52  ;;  %v1279_v8 = vadd.f32 %v1272_v1, %v404_v47  ;;  %v1235_v13 = vpop.f32.mrf.mxu0  ;;  %v1248_v20 = vpop.f32.mrf.mxu1  ;;  %1953 = vmatpush.bf16.msrb.mxu1 %v4063_v22 }
 0x53f   :  { %1966 = vmatpush.bf16.msrb.mxu2 %v4065_v26 }
 0x540   :  { %3365 = vtanh.f32 %v1278_v7  ;;  %v1289_v2 = vmul.f32 0.5, %v1279_v8  ;;  %1979 = vmatpush.bf16.msrb.mxu3 %v4068_v62 }
 0x541   :  { %v3362_v15 = vpop.eup %3361 }
 0x542   :  { %v3364_v19 = vpop.eup %3363  ;;  %v1282_v44 = vmul.f32 0.5, %v3362_v15  ;;  %3367 = vtanh.f32 %v1289_v2  ;;  %1954 = vmatpush.bf16.msrb.mxu1 %v4074_v48 }
 0x543   :  { %v1286_v11 = vmul.f32 0.5, %v3364_v19  ;;  %1967 = vmatpush.bf16.msrb.mxu2 %v4077_v4 }
 0x544   :  { %v1283_v27 = vadd.f32 0.5, %v1282_v44  ;;  %1980 = vmatpush.bf16.msrb.mxu3 %v4079_v36 }
 0x545   :  { %v1287_v6 = vadd.f32 0.5, %v1286_v11  ;;  %v1261_v43 = vpop.f32.mrf.mxu2  ;;  %v1274_v25 = vpop.f32.mrf.mxu3 }
 0x546   :  { %v3366_v54 = vpop.eup %3365  ;;  %1955 = vmatpush.bf16.msrb.mxu1 %v4086_v23  ;;  %v1525_v7 = vpop.f32.mrf.mxu0 }
 0x547   :  { %v1293_v63 = vmul.f32 %v1287_v6, %v4052_v49  ;;  %v1294_v17 = vmul.f32 %v3366_v54, %v1283_v27  ;;  %1968 = vmatpush.bf16.msrb.mxu2 %v4088_v40  ;;  %v1554_v8 = vpop.f32.mrf.mxu1 }
 0x548   :  { %v3368_v31 = vpop.eup %3367  ;;  %1981 = vmatpush.bf16.msrb.mxu3 %v4098_v0 }
 0x549   :  { %v1295_v52 = vadd.f32 %v1294_v17, %v1293_v63  ;;  %v1291_v41 = vmul.f32 0.5, %v3368_v31 }
 0x54a   :  { %1956 = vmatpush.bf16.msrb.mxu1 %v4103_v28 }
 0x54b   :  { %3369 = vtanh.f32 %v1295_v52  ;;  %v1292_v49 = vadd.f32 0.5, %v1291_v41  ;;  %1969 = vmatpush.bf16.msrb.mxu2 %v4105_v16 }
 0x54c   :  { %1982 = vmatpush.bf16.msrb.mxu3 %v4108_v37 }
 0x54d   :  { %v1583_v13 = vpop.f32.mrf.mxu2  ;;  %v1612_v20 = vpop.f32.mrf.mxu3 }
 0x54e   :  { %1957 = vmatpush.bf16.msrb.mxu1 %v4114_v59  ;;  %v4239_v51 = vpop.f32.mrf.mxu0 }
 0x54f   :  { %1970 = vmatpush.bf16.msrb.mxu2 %v4121_v21  ;;  %v4241_v32 = vpop.f32.mrf.mxu1 }
 0x550   :  { %1983 = vmatpush.bf16.msrb.mxu3 %v4123_v42 }
 0x551   :  { %v3370_v47 = vpop.eup %3369 }
 0x552   :  { %v1297_v18 = vmul.f32 %v3370_v47, %v1292_v49  ;;  %1958 = vmatpush.bf16.msrb.mxu1 %v4130_v58  ;;  %v2856_v47 = vld [vmem:[%s4579_s3 + $0x4] sm:$0xf] }
 0x553   :  { %1971 = vmatpush.bf16.msrb.mxu2 %v4132_v12 }
 0x554   :  { %v1311_v1 = vpack.c.bf16 %v1297_v18, %v4055_v60  ;;  %1984 = vmatpush.bf16.msrb.mxu3 %v4135_v24  ;;  %v4627_v60 = vmov 0  }
 0x555   :  { %v4243_v33 = vpop.f32.mrf.mxu2  ;;  %v4245_v39 = vpop.f32.mrf.mxu3 }
 0x556   :  { %1539 = vmatmul.bf16.gmra.mxu0 %v1311_v1  ;;  %1568 = vmatmul.bf16.gmra.mxu1 %v1311_v1  ;;  %v4247_v38 = vpop.f32.mrf.mxu0 }
 0x557   :  { %1597 = vmatmul.bf16.gmra.mxu2 %v1311_v1  ;;  %1626 = vmatmul.bf16.gmra.mxu3 %v1311_v1  ;;  %v4249_v55 = vpop.f32.mrf.mxu1 }
 0x558   :  { %1959 = vmatpush.bf16.msrb.mxu1 %v4146_v50  ;;  %1972 = vmatpush.bf16.msrb.mxu2 %v4148_v61 }
 0x559   :  { %1985 = vmatpush.bf16.msrb.mxu3 %v4151_v45 }
 0x55c   :  { %1960 = vmatpush.bf16.msrb.mxu1 %v4158_v3  ;;  %1973 = vmatpush.bf16.msrb.mxu2 %v4160_v10 }
 0x55d   :  { %1986 = vmatpush.bf16.msrb.mxu3 %v4163_v57  ;;  %v4251_v2 = vpop.f32.mrf.mxu2  ;;  %v4253_v14 = vpop.f32.mrf.mxu3 }
 0x55e   :  { %4628 = vst [vmem:[#allocation11_spill] sm:$0xff] %v4251_v2  ;;  %v4255_v35 = vpop.f32.mrf.mxu0 }
 0x55f   :  { %4629 = vst [vmem:[#allocation10_spill] sm:$0xff] %v4253_v14  ;;  %v4257_v15 = vpop.f32.mrf.mxu1 }
 0x560   :  { %4630 = vst [vmem:[#allocation12_spill] sm:$0xff] %v4255_v35 }
 0x561   :  { %4631 = vst [vmem:[#allocation13_spill] sm:$0xff] %v4257_v15 }
 0x565   :  { %v4259_v19 = vpop.f32.mrf.mxu2  ;;  %v4261_v44 = vpop.f32.mrf.mxu3 }
 0x566   :  { %1869 = vmatmul.bf16.vlgmr.msra.gmra.mxu0 %v4627_v60  ;;  %1882 = vmatmul.bf16.vlgmr.msra.gmra.mxu1 %v4627_v60  ;;  %4632 = vst [vmem:[#allocation14_spill] sm:$0xff] %v4259_v19  ;;  %v4263_v11 = vpop.f32.mrf.mxu0 }
 0x567   :  { %1895 = vmatmul.bf16.vlgmr.msra.gmra.mxu2 %v4627_v60  ;;  %1908 = vmatmul.bf16.vlgmr.msra.gmra.mxu3 %v4627_v60  ;;  %4633 = vst [vmem:[#allocation15_spill] sm:$0xff] %v4261_v44  ;;  %v4265_v27 = vpop.f32.mrf.mxu1  ;;  %v4294_v60 = vperm.slane %v2856_v47, 0 }
 0x568   :  { %2019 = vmatpush.bf16.msra.mxu0 %v4061_v9  ;;  %2032 = vmatpush.bf16.msra.mxu1 %v4063_v22  ;;  %4634 = vst [vmem:[#allocation16_spill] sm:$0xff] %v4263_v11 }
 0x569   :  { %2045 = vmatpush.bf16.msra.mxu2 %v4065_v26  ;;  %2058 = vmatpush.bf16.msra.mxu3 %v4068_v62  ;;  %4635 = vst [vmem:[#allocation17_spill] sm:$0xff] %v4265_v27 }
 0x56c   :  { %2020 = vmatpush.bf16.msra.mxu0 %v4072_v46  ;;  %2033 = vmatpush.bf16.msra.mxu1 %v4074_v48 }
 0x56d   :  { %2046 = vmatpush.bf16.msra.mxu2 %v4077_v4  ;;  %2059 = vmatpush.bf16.msra.mxu3 %v4079_v36  ;;  %v4267_v6 = vpop.f32.mrf.mxu2  ;;  %v4269_v43 = vpop.f32.mrf.mxu3 }
 0x56e   :  { %4636 = vst [vmem:[#allocation19_spill] sm:$0xff] %v4267_v6  ;;  %v4271_v25 = vpop.f32.mrf.mxu0  ;;  %v4304_v6 = vperm.slane %v2856_v47, 2 }
 0x56f   :  { %4637 = vst [vmem:[#allocation18_spill] sm:$0xff] %v4269_v43  ;;  %v4273_v54 = vpop.f32.mrf.mxu1 }
 0x570   :  { %2021 = vmatpush.bf16.msra.mxu0 %v4082_v29  ;;  %2034 = vmatpush.bf16.msra.mxu1 %v4086_v23  ;;  %4638 = vst [vmem:[#allocation20_spill] sm:$0xff] %v4271_v25  ;;  %v1584_v11 = vadd.f32 %v1583_v13, %v4304_v6 }
 0x571   :  { %2047 = vmatpush.bf16.msra.mxu2 %v4088_v40  ;;  %2060 = vmatpush.bf16.msra.mxu3 %v4098_v0  ;;  %4639 = vst [vmem:[#allocation21_spill] sm:$0xff] %v4273_v54 }
 0x574   :  { %2022 = vmatpush.bf16.msra.mxu0 %v4101_v5  ;;  %2035 = vmatpush.bf16.msra.mxu1 %v4103_v28 }
 0x575   :  { %2048 = vmatpush.bf16.msra.mxu2 %v4105_v16  ;;  %2061 = vmatpush.bf16.msra.mxu3 %v4108_v37  ;;  %v4275_v63 = vpop.f32.mrf.mxu2  ;;  %v4277_v17 = vpop.f32.mrf.mxu3 }
 0x576   :  { %4640 = vst [vmem:[#allocation22_spill] sm:$0xff] %v4275_v63  ;;  %v4296_v63 = vperm.slane %v2856_v47, 1 }
 0x577   :  { %4641 = vst [vmem:[#allocation23_spill] sm:$0xff] %v4277_v17 }
 0x578   :  { %2023 = vmatpush.bf16.msra.mxu0 %v4112_v53  ;;  %2036 = vmatpush.bf16.msra.mxu1 %v4114_v59 }
 0x579   :  { %2049 = vmatpush.bf16.msra.mxu2 %v4121_v21  ;;  %2062 = vmatpush.bf16.msra.mxu3 %v4123_v42 }
 0x57c   :  { %2024 = vmatpush.bf16.msra.mxu0 %v4126_v30  ;;  %2037 = vmatpush.bf16.msra.mxu1 %v4130_v58 }
 0x57d   :  { %2050 = vmatpush.bf16.msra.mxu2 %v4132_v12  ;;  %2063 = vmatpush.bf16.msra.mxu3 %v4135_v24 }
 0x580   :  { %2025 = vmatpush.bf16.msra.mxu0 %v4140_v56  ;;  %2038 = vmatpush.bf16.msra.mxu1 %v4146_v50 }
 0x581   :  { %2051 = vmatpush.bf16.msra.mxu2 %v4148_v61  ;;  %2064 = vmatpush.bf16.msra.mxu3 %v4151_v45 }
 0x584   :  { %2026 = vmatpush.bf16.msra.mxu0 %v4154_v34  ;;  %2039 = vmatpush.bf16.msra.mxu1 %v4158_v3 }
 0x585   :  { %2052 = vmatpush.bf16.msra.mxu2 %v4160_v10  ;;  %2065 = vmatpush.bf16.msra.mxu3 %v4163_v57 }
 0x5d3   :  { %v4279_v31 = vpop.f32.mrf.mxu0  ;;  %v4281_v52 = vpop.f32.mrf.mxu1 }
 0x5d4   :  { %4642 = vst [vmem:[#allocation24_spill] sm:$0xff] %v4279_v31  ;;  %v1526_v31 = vadd.f32 %v1525_v7, %v4294_v60 }
 0x5d5   :  { %4643 = vst [vmem:[#allocation25_spill] sm:$0xff] %v4281_v52  ;;  %v1555_v52 = vadd.f32 %v1554_v8, %v4296_v63 }
 0x5da   :  { %v4283_v41 = vpop.f32.mrf.mxu2  ;;  %v4285_v49 = vpop.f32.mrf.mxu3 }
 0x5db   :  { %4644 = vst [vmem:[#allocation27_spill] sm:$0xff] %v4283_v41  ;;  %v4290_v18 = vpop.f32.mrf.mxu0  ;;  %v4292_v1 = vpop.f32.mrf.mxu1 }
 0x5dc   :  { %4645 = vst [vmem:[#allocation26_spill] sm:$0xff] %v4285_v49 }
 0x5dd   :  { %4646 = vst [vmem:[#allocation28_spill] sm:$0xff] %v4290_v18  ;;  %v4306_v18 = vperm.slane %v2856_v47, 3 }
 0x5de   :  { %4647 = vst [vmem:[#allocation29_spill] sm:$0xff] %v4292_v1 }
 0x5df   :  { %v1613_v7 = vadd.f32 %v1612_v20, %v4306_v18 }
 0x5e2   :  { %v4300_v17 = vpop.f32.mrf.mxu2  ;;  %v4302_v41 = vpop.f32.mrf.mxu3 }
 0x5e3   :  { %4648 = vst [vmem:[#allocation30_spill] sm:$0xff] %v4300_v17  ;;  %v1870_v49 = vpop.f32.mrf.mxu0  ;;  %v1883_v54 = vpop.f32.mrf.mxu1 }
 0x5e4   :  { %4649 = vst [vmem:[#allocation31_spill] sm:$0xff] %v4302_v41  ;;  %v1913_v25 = vadd.f32 %v1870_v49, %v1526_v31  ;;  %v1914_v43 = vadd.f32 %v1883_v54, %v1555_v52 }
 0x5e6   :  { %v1917_v1 = vmul.f32 0.5, %v1913_v25  ;;  %v1921_v27 = vmul.f32 0.5, %v1914_v43 }
 0x5e8   :  { %3371 = vtanh.f32 %v1917_v1 }
 0x5e9   :  { %3373 = vtanh.f32 %v1921_v27 }
 0x5ea   :  { %v1896_v8 = vpop.f32.mrf.mxu2  ;;  %v1909_v17 = vpop.f32.mrf.mxu3 }
 0x5eb   :  { %v1915_v44 = vadd.f32 %v1896_v8, %v1584_v11  ;;  %v1916_v41 = vadd.f32 %v1909_v17, %v1613_v7  ;;  %v1872_v19 = vpop.f32.mrf.mxu0  ;;  %v1885_v15 = vpop.f32.mrf.mxu1 }
 0x5ed   :  { %3375 = vtanh.f32 %v1915_v44  ;;  %v1926_v54 = vmul.f32 0.5, %v1916_v41 }
 0x5ee   :  { %v3372_v31 = vpop.eup %3371 }
 0x5ef   :  { %v3374_v52 = vpop.eup %3373  ;;  %v1919_v49 = vmul.f32 0.5, %v3372_v31  ;;  %3377 = vtanh.f32 %v1926_v54 }
 0x5f0   :  { %v1923_v47 = vmul.f32 0.5, %v3374_v52 }
 0x5f1   :  { %v1920_v43 = vadd.f32 0.5, %v1919_v49  ;;  %v1586_v49 = vadd.f32 %v4243_v33, %v4304_v6 }
 0x5f2   :  { %v1924_v25 = vadd.f32 0.5, %v1923_v47  ;;  %v1898_v1 = vpop.f32.mrf.mxu2  ;;  %v1911_v13 = vpop.f32.mrf.mxu3  ;;  %v1615_v47 = vadd.f32 %v4245_v39, %v4306_v18 }
 0x5f3   :  { %v3376_v35 = vpop.eup %3375 }
 0x5f4   :  { %v1930_v20 = vmul.f32 0.0, %v1924_v25  ;;  %v1931_v27 = vmul.f32 %v3376_v35, %v1920_v43  ;;  %v1557_v35 = vadd.f32 %v4241_v32, %v4296_v63 }
 0x5f5   :  { %v3378_v14 = vpop.eup %3377 }
 0x5f6   :  { %v4310_v2 = vadd.f32 %v1931_v27, %v1930_v20  ;;  %v1928_v15 = vmul.f32 0.5, %v3378_v14  ;;  %v1528_v14 = vadd.f32 %v4239_v51, %v4294_v60 }
 0x5f8   :  { %3379 = vtanh.f32 %v4310_v2  ;;  %v1929_v19 = vadd.f32 0.5, %v1928_v15 }
 0x5fe   :  { %v3380_v44 = vpop.eup %3379 }
 0x5ff   :  { %v1934_v11 = vmul.f32 %v3380_v44, %v1929_v19 }
 0x601   :  { %v1939_v17 = vpack.c.bf16 %v1934_v11, %v1934_v11 }
 0x603   :  { %1948 = vmatmul.bf16.vlgmr.msrb.gmra.mxu0 %v1939_v17  ;;  %1961 = vmatmul.bf16.vlgmr.msrb.gmra.mxu1 %v1939_v17 }
 0x604   :  { %1974 = vmatmul.bf16.vlgmr.msrb.gmra.mxu2 %v1939_v17  ;;  %1987 = vmatmul.bf16.vlgmr.msrb.gmra.mxu3 %v1939_v17 }
 0x605   :  { %2098 = vmatpush.bf16.msrb.mxu0 %v4061_v9  ;;  %2111 = vmatpush.bf16.msrb.mxu1 %v4063_v22 }
 0x606   :  { %2124 = vmatpush.bf16.msrb.mxu2 %v4065_v26  ;;  %2137 = vmatpush.bf16.msrb.mxu3 %v4068_v62 }
 0x609   :  { %2099 = vmatpush.bf16.msrb.mxu0 %v4072_v46  ;;  %2112 = vmatpush.bf16.msrb.mxu1 %v4074_v48 }
 0x60a   :  { %2125 = vmatpush.bf16.msrb.mxu2 %v4077_v4  ;;  %2138 = vmatpush.bf16.msrb.mxu3 %v4079_v36 }
 0x60d   :  { %2100 = vmatpush.bf16.msrb.mxu0 %v4082_v29  ;;  %2113 = vmatpush.bf16.msrb.mxu1 %v4086_v23 }
 0x60e   :  { %2126 = vmatpush.bf16.msrb.mxu2 %v4088_v40  ;;  %2139 = vmatpush.bf16.msrb.mxu3 %v4098_v0 }
 0x611   :  { %2101 = vmatpush.bf16.msrb.mxu0 %v4101_v5  ;;  %2114 = vmatpush.bf16.msrb.mxu1 %v4103_v28 }
 0x612   :  { %2127 = vmatpush.bf16.msrb.mxu2 %v4105_v16  ;;  %2140 = vmatpush.bf16.msrb.mxu3 %v4108_v37 }
 0x615   :  { %2102 = vmatpush.bf16.msrb.mxu0 %v4112_v53  ;;  %2115 = vmatpush.bf16.msrb.mxu1 %v4114_v59 }
 0x616   :  { %2128 = vmatpush.bf16.msrb.mxu2 %v4121_v21  ;;  %2141 = vmatpush.bf16.msrb.mxu3 %v4123_v42 }
 0x619   :  { %2103 = vmatpush.bf16.msrb.mxu0 %v4126_v30  ;;  %2116 = vmatpush.bf16.msrb.mxu1 %v4130_v58 }
 0x61a   :  { %2129 = vmatpush.bf16.msrb.mxu2 %v4132_v12  ;;  %2142 = vmatpush.bf16.msrb.mxu3 %v4135_v24 }
 0x61d   :  { %2104 = vmatpush.bf16.msrb.mxu0 %v4140_v56  ;;  %2117 = vmatpush.bf16.msrb.mxu1 %v4146_v50 }
 0x61e   :  { %2130 = vmatpush.bf16.msrb.mxu2 %v4148_v61  ;;  %2143 = vmatpush.bf16.msrb.mxu3 %v4151_v45 }
 0x621   :  { %2105 = vmatpush.bf16.msrb.mxu0 %v4154_v34  ;;  %2118 = vmatpush.bf16.msrb.mxu1 %v4158_v3 }
 0x622   :  { %2131 = vmatpush.bf16.msrb.mxu2 %v4160_v10  ;;  %2144 = vmatpush.bf16.msrb.mxu3 %v4163_v57 }
 0x680   :  { %v1949_v41 = vpop.f32.mrf.mxu0  ;;  %v1962_v7 = vpop.f32.mrf.mxu1 }
 0x681   :  { %v1992_v8 = vadd.f32 %v1949_v41, %v1528_v14  ;;  %v1993_v54 = vadd.f32 %v1962_v7, %v1557_v35 }
 0x683   :  { %v1996_v31 = vmul.f32 0.5, %v1992_v8  ;;  %v2000_v52 = vmul.f32 0.5, %v1993_v54 }
 0x685   :  { %3381 = vtanh.f32 %v1996_v31 }
 0x686   :  { %3383 = vtanh.f32 %v2000_v52 }
 0x687   :  { %v1975_v43 = vpop.f32.mrf.mxu2  ;;  %v1988_v25 = vpop.f32.mrf.mxu3 }
 0x688   :  { %v1994_v51 = vadd.f32 %v1975_v43, %v1586_v49  ;;  %v1995_v1 = vadd.f32 %v1988_v25, %v1615_v47  ;;  %v1951_v13 = vpop.f32.mrf.mxu0  ;;  %v1964_v32 = vpop.f32.mrf.mxu1  ;;  %v1560_v43 = vadd.f32 %v4249_v55, %v4296_v63 }
 0x68a   :  { %3385 = vtanh.f32 %v1994_v51  ;;  %v2005_v20 = vmul.f32 0.5, %v1995_v1 }
 0x68b   :  { %v3382_v27 = vpop.eup %3381 }
 0x68c   :  { %v3384_v15 = vpop.eup %3383  ;;  %v1998_v19 = vmul.f32 0.5, %v3382_v27  ;;  %3387 = vtanh.f32 %v2005_v20  ;;  %v4650_v27 = vld [vmem:[#allocation11_spill] sm:$0xff] }
 0x68d   :  { %v2002_v44 = vmul.f32 0.5, %v3384_v15  ;;  %v1589_v15 = vadd.f32 %v4650_v27, %v4304_v6 }
 0x68e   :  { %v1999_v11 = vadd.f32 0.5, %v1998_v19  ;;  %v4651_v19 = vld [vmem:[#allocation10_spill] sm:$0xff] }
 0x68f   :  { %v2003_v17 = vadd.f32 0.5, %v2002_v44  ;;  %v1977_v33 = vpop.f32.mrf.mxu2  ;;  %v1990_v14 = vpop.f32.mrf.mxu3  ;;  %v1618_v44 = vadd.f32 %v4651_v19, %v4306_v18 }
 0x690   :  { %v3386_v35 = vpop.eup %3385 }
 0x691   :  { %v2009_v39 = vmul.f32 %v2003_v17, %v4310_v2  ;;  %v2010_v41 = vmul.f32 %v3386_v35, %v1999_v11  ;;  %v1531_v2 = vadd.f32 %v4247_v38, %v4294_v60 }
 0x692   :  { %v3388_v7 = vpop.eup %3387 }
 0x693   :  { %v4354_v8 = vadd.f32 %v2010_v41, %v2009_v39  ;;  %v2007_v54 = vmul.f32 0.5, %v3388_v7 }
 0x695   :  { %3389 = vtanh.f32 %v4354_v8  ;;  %v2008_v31 = vadd.f32 0.5, %v2007_v54 }
 0x69b   :  { %v3390_v52 = vpop.eup %3389 }
 0x69c   :  { %v2013_v49 = vmul.f32 %v3390_v52, %v2008_v31 }
 0x69e   :  { %v2018_v47 = vpack.c.bf16 %v2013_v49, %v2013_v49 }
 0x6a0   :  { %2027 = vmatmul.bf16.vlgmr.msra.gmra.mxu0 %v2018_v47  ;;  %2040 = vmatmul.bf16.vlgmr.msra.gmra.mxu1 %v2018_v47 }
 0x6a1   :  { %2053 = vmatmul.bf16.vlgmr.msra.gmra.mxu2 %v2018_v47  ;;  %2066 = vmatmul.bf16.vlgmr.msra.gmra.mxu3 %v2018_v47 }
 0x6a2   :  { %2177 = vmatpush.bf16.msra.mxu0 %v4061_v9  ;;  %2190 = vmatpush.bf16.msra.mxu1 %v4063_v22 }
 0x6a3   :  { %2203 = vmatpush.bf16.msra.mxu2 %v4065_v26  ;;  %2216 = vmatpush.bf16.msra.mxu3 %v4068_v62 }
 0x6a6   :  { %2178 = vmatpush.bf16.msra.mxu0 %v4072_v46  ;;  %2191 = vmatpush.bf16.msra.mxu1 %v4074_v48 }
 0x6a7   :  { %2204 = vmatpush.bf16.msra.mxu2 %v4077_v4  ;;  %2217 = vmatpush.bf16.msra.mxu3 %v4079_v36 }
 0x6aa   :  { %2179 = vmatpush.bf16.msra.mxu0 %v4082_v29  ;;  %2192 = vmatpush.bf16.msra.mxu1 %v4086_v23 }
 0x6ab   :  { %2205 = vmatpush.bf16.msra.mxu2 %v4088_v40  ;;  %2218 = vmatpush.bf16.msra.mxu3 %v4098_v0 }
 0x6ae   :  { %2180 = vmatpush.bf16.msra.mxu0 %v4101_v5  ;;  %2193 = vmatpush.bf16.msra.mxu1 %v4103_v28 }
 0x6af   :  { %2206 = vmatpush.bf16.msra.mxu2 %v4105_v16  ;;  %2219 = vmatpush.bf16.msra.mxu3 %v4108_v37 }
 0x6b2   :  { %2181 = vmatpush.bf16.msra.mxu0 %v4112_v53  ;;  %2194 = vmatpush.bf16.msra.mxu1 %v4114_v59 }
 0x6b3   :  { %2207 = vmatpush.bf16.msra.mxu2 %v4121_v21  ;;  %2220 = vmatpush.bf16.msra.mxu3 %v4123_v42 }
 0x6b6   :  { %2182 = vmatpush.bf16.msra.mxu0 %v4126_v30  ;;  %2195 = vmatpush.bf16.msra.mxu1 %v4130_v58 }
 0x6b7   :  { %2208 = vmatpush.bf16.msra.mxu2 %v4132_v12  ;;  %2221 = vmatpush.bf16.msra.mxu3 %v4135_v24 }
 0x6ba   :  { %2183 = vmatpush.bf16.msra.mxu0 %v4140_v56  ;;  %2196 = vmatpush.bf16.msra.mxu1 %v4146_v50 }
 0x6bb   :  { %2209 = vmatpush.bf16.msra.mxu2 %v4148_v61  ;;  %2222 = vmatpush.bf16.msra.mxu3 %v4151_v45 }
 0x6be   :  { %2184 = vmatpush.bf16.msra.mxu0 %v4154_v34  ;;  %2197 = vmatpush.bf16.msra.mxu1 %v4158_v3 }
 0x6bf   :  { %2210 = vmatpush.bf16.msra.mxu2 %v4160_v10  ;;  %2223 = vmatpush.bf16.msra.mxu3 %v4163_v57 }
 0x71d   :  { %v2028_v25 = vpop.f32.mrf.mxu0  ;;  %v2041_v51 = vpop.f32.mrf.mxu1 }
 0x71e   :  { %v2071_v1 = vadd.f32 %v2028_v25, %v1531_v2  ;;  %v2072_v13 = vadd.f32 %v2041_v51, %v1560_v43 }
 0x720   :  { %v2075_v32 = vmul.f32 0.5, %v2071_v1  ;;  %v2079_v20 = vmul.f32 0.5, %v2072_v13 }
 0x722   :  { %3391 = vtanh.f32 %v2075_v32 }
 0x723   :  { %3393 = vtanh.f32 %v2079_v20 }
 0x724   :  { %v2054_v11 = vpop.f32.mrf.mxu2  ;;  %v2067_v17 = vpop.f32.mrf.mxu3 }
 0x725   :  { %v2073_v38 = vadd.f32 %v2054_v11, %v1589_v15  ;;  %v2074_v33 = vadd.f32 %v2067_v17, %v1618_v44  ;;  %v2030_v14 = vpop.f32.mrf.mxu0  ;;  %v2043_v55 = vpop.f32.mrf.mxu1  ;;  %v4653_v44 = vld [vmem:[#allocation13_spill] sm:$0xff] }
 0x726   :  { %v1562_v11 = vadd.f32 %v4653_v44, %v4296_v63 }
 0x727   :  { %3395 = vtanh.f32 %v2073_v38  ;;  %v2084_v35 = vmul.f32 0.5, %v2074_v33 }
 0x728   :  { %v3392_v39 = vpop.eup %3391 }
 0x729   :  { %v3394_v41 = vpop.eup %3393  ;;  %v2077_v7 = vmul.f32 0.5, %v3392_v39  ;;  %3397 = vtanh.f32 %v2084_v35  ;;  %v4654_v39 = vld [vmem:[#allocation14_spill] sm:$0xff] }
 0x72a   :  { %v2081_v54 = vmul.f32 0.5, %v3394_v41  ;;  %v1591_v41 = vadd.f32 %v4654_v39, %v4304_v6 }
 0x72b   :  { %v2078_v31 = vadd.f32 0.5, %v2077_v7  ;;  %v4655_v7 = vld [vmem:[#allocation15_spill] sm:$0xff] }
 0x72c   :  { %v2082_v52 = vadd.f32 0.5, %v2081_v54  ;;  %v2056_v49 = vpop.f32.mrf.mxu2  ;;  %v2069_v47 = vpop.f32.mrf.mxu3  ;;  %v1620_v54 = vadd.f32 %v4655_v7, %v4306_v18 }
 0x72d   :  { %v3396_v2 = vpop.eup %3395 }
 0x72e   :  { %v2088_v43 = vmul.f32 %v2082_v52, %v4354_v8  ;;  %v2089_v25 = vmul.f32 %v3396_v2, %v2078_v31  ;;  %v4652_v8 = vld [vmem:[#allocation12_spill] sm:$0xff] }
 0x72f   :  { %v3398_v51 = vpop.eup %3397  ;;  %v1533_v19 = vadd.f32 %v4652_v8, %v4294_v60 }
 0x730   :  { %v4398_v1 = vadd.f32 %v2089_v25, %v2088_v43  ;;  %v2086_v13 = vmul.f32 0.5, %v3398_v51 }
 0x732   :  { %3399 = vtanh.f32 %v4398_v1  ;;  %v2087_v32 = vadd.f32 0.5, %v2086_v13 }
 0x738   :  { %v3400_v20 = vpop.eup %3399 }
 0x739   :  { %v2092_v27 = vmul.f32 %v3400_v20, %v2087_v32 }
 0x73b   :  { %v2097_v15 = vpack.c.bf16 %v2092_v27, %v2092_v27 }
 0x73d   :  { %2106 = vmatmul.bf16.vlgmr.msrb.gmra.mxu0 %v2097_v15  ;;  %2119 = vmatmul.bf16.vlgmr.msrb.gmra.mxu1 %v2097_v15 }
 0x73e   :  { %2132 = vmatmul.bf16.vlgmr.msrb.gmra.mxu2 %v2097_v15  ;;  %2145 = vmatmul.bf16.vlgmr.msrb.gmra.mxu3 %v2097_v15 }
 0x73f   :  { %2256 = vmatpush.bf16.msrb.mxu0 %v4061_v9  ;;  %2269 = vmatpush.bf16.msrb.mxu1 %v4063_v22 }
 0x740   :  { %2282 = vmatpush.bf16.msrb.mxu2 %v4065_v26  ;;  %2295 = vmatpush.bf16.msrb.mxu3 %v4068_v62 }
 0x743   :  { %2257 = vmatpush.bf16.msrb.mxu0 %v4072_v46  ;;  %2270 = vmatpush.bf16.msrb.mxu1 %v4074_v48 }
 0x744   :  { %2283 = vmatpush.bf16.msrb.mxu2 %v4077_v4  ;;  %2296 = vmatpush.bf16.msrb.mxu3 %v4079_v36 }
 0x747   :  { %2258 = vmatpush.bf16.msrb.mxu0 %v4082_v29  ;;  %2271 = vmatpush.bf16.msrb.mxu1 %v4086_v23 }
 0x748   :  { %2284 = vmatpush.bf16.msrb.mxu2 %v4088_v40  ;;  %2297 = vmatpush.bf16.msrb.mxu3 %v4098_v0 }
 0x74b   :  { %2259 = vmatpush.bf16.msrb.mxu0 %v4101_v5  ;;  %2272 = vmatpush.bf16.msrb.mxu1 %v4103_v28 }
 0x74c   :  { %2285 = vmatpush.bf16.msrb.mxu2 %v4105_v16  ;;  %2298 = vmatpush.bf16.msrb.mxu3 %v4108_v37 }
 0x74f   :  { %2260 = vmatpush.bf16.msrb.mxu0 %v4112_v53  ;;  %2273 = vmatpush.bf16.msrb.mxu1 %v4114_v59 }
 0x750   :  { %2286 = vmatpush.bf16.msrb.mxu2 %v4121_v21  ;;  %2299 = vmatpush.bf16.msrb.mxu3 %v4123_v42 }
 0x753   :  { %2261 = vmatpush.bf16.msrb.mxu0 %v4126_v30  ;;  %2274 = vmatpush.bf16.msrb.mxu1 %v4130_v58 }
 0x754   :  { %2287 = vmatpush.bf16.msrb.mxu2 %v4132_v12  ;;  %2300 = vmatpush.bf16.msrb.mxu3 %v4135_v24 }
 0x757   :  { %2262 = vmatpush.bf16.msrb.mxu0 %v4140_v56  ;;  %2275 = vmatpush.bf16.msrb.mxu1 %v4146_v50 }
 0x758   :  { %2288 = vmatpush.bf16.msrb.mxu2 %v4148_v61  ;;  %2301 = vmatpush.bf16.msrb.mxu3 %v4151_v45 }
 0x75b   :  { %2263 = vmatpush.bf16.msrb.mxu0 %v4154_v34  ;;  %2276 = vmatpush.bf16.msrb.mxu1 %v4158_v3 }
 0x75c   :  { %2289 = vmatpush.bf16.msrb.mxu2 %v4160_v10  ;;  %2302 = vmatpush.bf16.msrb.mxu3 %v4163_v57 }
 0x7ba   :  { %v2107_v17 = vpop.f32.mrf.mxu0  ;;  %v2120_v38 = vpop.f32.mrf.mxu1 }
 0x7bb   :  { %v2150_v33 = vadd.f32 %v2107_v17, %v1533_v19  ;;  %v2151_v14 = vadd.f32 %v2120_v38, %v1562_v11 }
 0x7bd   :  { %v2154_v55 = vmul.f32 0.5, %v2150_v33  ;;  %v2158_v35 = vmul.f32 0.5, %v2151_v14 }
 0x7bf   :  { %3401 = vtanh.f32 %v2154_v55 }
 0x7c0   :  { %3403 = vtanh.f32 %v2158_v35 }
 0x7c1   :  { %v2133_v31 = vpop.f32.mrf.mxu2  ;;  %v2146_v52 = vpop.f32.mrf.mxu3 }
 0x7c2   :  { %v2152_v49 = vadd.f32 %v2133_v31, %v1591_v41  ;;  %v2153_v47 = vadd.f32 %v2146_v52, %v1620_v54  ;;  %v2109_v2 = vpop.f32.mrf.mxu0  ;;  %v2122_v43 = vpop.f32.mrf.mxu1  ;;  %v4657_v54 = vld [vmem:[#allocation17_spill] sm:$0xff] }
 0x7c3   :  { %v1565_v31 = vadd.f32 %v4657_v54, %v4296_v63 }
 0x7c4   :  { %3405 = vtanh.f32 %v2152_v49  ;;  %v2163_v25 = vmul.f32 0.5, %v2153_v47 }
 0x7c5   :  { %v3402_v51 = vpop.eup %3401 }
 0x7c6   :  { %v3404_v13 = vpop.eup %3403  ;;  %v2156_v32 = vmul.f32 0.5, %v3402_v51  ;;  %3407 = vtanh.f32 %v2163_v25  ;;  %v4658_v51 = vld [vmem:[#allocation19_spill] sm:$0xff] }
 0x7c7   :  { %v2160_v20 = vmul.f32 0.5, %v3404_v13  ;;  %v1594_v13 = vadd.f32 %v4658_v51, %v4304_v6 }
 0x7c8   :  { %v2157_v27 = vadd.f32 0.5, %v2156_v32  ;;  %v4659_v32 = vld [vmem:[#allocation18_spill] sm:$0xff] }
 0x7c9   :  { %v2161_v15 = vadd.f32 0.5, %v2160_v20  ;;  %v2135_v8 = vpop.f32.mrf.mxu2  ;;  %v2148_v19 = vpop.f32.mrf.mxu3  ;;  %v1623_v20 = vadd.f32 %v4659_v32, %v4306_v18 }
 0x7ca   :  { %v3406_v44 = vpop.eup %3405 }
 0x7cb   :  { %v2167_v11 = vmul.f32 %v2161_v15, %v4398_v1  ;;  %v2168_v17 = vmul.f32 %v3406_v44, %v2157_v27  ;;  %v4656_v1 = vld [vmem:[#allocation16_spill] sm:$0xff] }
 0x7cc   :  { %v3408_v38 = vpop.eup %3407  ;;  %v1536_v7 = vadd.f32 %v4656_v1, %v4294_v60 }
 0x7cd   :  { %v4442_v33 = vadd.f32 %v2168_v17, %v2167_v11  ;;  %v2165_v14 = vmul.f32 0.5, %v3408_v38 }
 0x7cf   :  { %3409 = vtanh.f32 %v4442_v33  ;;  %v2166_v55 = vadd.f32 0.5, %v2165_v14 }
 0x7d5   :  { %v3410_v35 = vpop.eup %3409 }
 0x7d6   :  { %v2171_v39 = vmul.f32 %v3410_v35, %v2166_v55 }
 0x7d8   :  { %v2176_v41 = vpack.c.bf16 %v2171_v39, %v2171_v39 }
 0x7da   :  { %2185 = vmatmul.bf16.vlgmr.msra.gmra.mxu0 %v2176_v41  ;;  %2198 = vmatmul.bf16.vlgmr.msra.gmra.mxu1 %v2176_v41 }
 0x7db   :  { %2211 = vmatmul.bf16.vlgmr.msra.gmra.mxu2 %v2176_v41  ;;  %2224 = vmatmul.bf16.vlgmr.msra.gmra.mxu3 %v2176_v41 }
 0x7dc   :  { %2335 = vmatpush.bf16.msra.mxu0 %v4061_v9  ;;  %2348 = vmatpush.bf16.msra.mxu1 %v4063_v22 }
 0x7dd   :  { %2361 = vmatpush.bf16.msra.mxu2 %v4065_v26  ;;  %2374 = vmatpush.bf16.msra.mxu3 %v4068_v62 }
 0x7e0   :  { %2336 = vmatpush.bf16.msra.mxu0 %v4072_v46  ;;  %2349 = vmatpush.bf16.msra.mxu1 %v4074_v48 }
 0x7e1   :  { %2362 = vmatpush.bf16.msra.mxu2 %v4077_v4  ;;  %2375 = vmatpush.bf16.msra.mxu3 %v4079_v36 }
 0x7e4   :  { %2337 = vmatpush.bf16.msra.mxu0 %v4082_v29  ;;  %2350 = vmatpush.bf16.msra.mxu1 %v4086_v23 }
 0x7e5   :  { %2363 = vmatpush.bf16.msra.mxu2 %v4088_v40  ;;  %2376 = vmatpush.bf16.msra.mxu3 %v4098_v0 }
 0x7e8   :  { %2338 = vmatpush.bf16.msra.mxu0 %v4101_v5  ;;  %2351 = vmatpush.bf16.msra.mxu1 %v4103_v28 }
 0x7e9   :  { %2364 = vmatpush.bf16.msra.mxu2 %v4105_v16  ;;  %2377 = vmatpush.bf16.msra.mxu3 %v4108_v37 }
 0x7ec   :  { %2339 = vmatpush.bf16.msra.mxu0 %v4112_v53  ;;  %2352 = vmatpush.bf16.msra.mxu1 %v4114_v59 }
 0x7ed   :  { %2365 = vmatpush.bf16.msra.mxu2 %v4121_v21  ;;  %2378 = vmatpush.bf16.msra.mxu3 %v4123_v42 }
 0x7f0   :  { %2340 = vmatpush.bf16.msra.mxu0 %v4126_v30  ;;  %2353 = vmatpush.bf16.msra.mxu1 %v4130_v58 }
 0x7f1   :  { %2366 = vmatpush.bf16.msra.mxu2 %v4132_v12  ;;  %2379 = vmatpush.bf16.msra.mxu3 %v4135_v24 }
 0x7f4   :  { %2341 = vmatpush.bf16.msra.mxu0 %v4140_v56  ;;  %2354 = vmatpush.bf16.msra.mxu1 %v4146_v50 }
 0x7f5   :  { %2367 = vmatpush.bf16.msra.mxu2 %v4148_v61  ;;  %2380 = vmatpush.bf16.msra.mxu3 %v4151_v45 }
 0x7f8   :  { %2342 = vmatpush.bf16.msra.mxu0 %v4154_v34  ;;  %2355 = vmatpush.bf16.msra.mxu1 %v4158_v3 }
 0x7f9   :  { %2368 = vmatpush.bf16.msra.mxu2 %v4160_v10  ;;  %2381 = vmatpush.bf16.msra.mxu3 %v4163_v57 }
 0x857   :  { %v2186_v52 = vpop.f32.mrf.mxu0  ;;  %v2199_v49 = vpop.f32.mrf.mxu1 }
 0x858   :  { %v2229_v47 = vadd.f32 %v2186_v52, %v1536_v7  ;;  %v2230_v2 = vadd.f32 %v2199_v49, %v1565_v31 }
 0x85a   :  { %v2233_v43 = vmul.f32 0.5, %v2229_v47  ;;  %v2237_v25 = vmul.f32 0.5, %v2230_v2 }
 0x85c   :  { %3411 = vtanh.f32 %v2233_v43 }
 0x85d   :  { %3413 = vtanh.f32 %v2237_v25 }
 0x85e   :  { %v2212_v27 = vpop.f32.mrf.mxu2  ;;  %v2225_v15 = vpop.f32.mrf.mxu3 }
 0x85f   :  { %v2231_v8 = vadd.f32 %v2212_v27, %v1594_v13  ;;  %v2232_v19 = vadd.f32 %v2225_v15, %v1623_v20  ;;  %v2188_v44 = vpop.f32.mrf.mxu0  ;;  %v2201_v11 = vpop.f32.mrf.mxu1 }
 0x860   :  { %v4664_v44 = vld [vmem:[#allocation24_spill] sm:$0xff] }
 0x861   :  { %3415 = vtanh.f32 %v2231_v8  ;;  %v2242_v17 = vmul.f32 0.5, %v2232_v19  ;;  %v1541_v11 = vadd.f32 %v4664_v44, %v4294_v60 }
 0x862   :  { %v3412_v38 = vpop.eup %3411 }
 0x863   :  { %v3414_v14 = vpop.eup %3413  ;;  %v2235_v55 = vmul.f32 0.5, %v3412_v38  ;;  %3417 = vtanh.f32 %v2242_v17  ;;  %v4665_v17 = vld [vmem:[#allocation25_spill] sm:$0xff] }
 0x864   :  { %v2239_v35 = vmul.f32 0.5, %v3414_v14  ;;  %v1570_v38 = vadd.f32 %v4665_v17, %v4296_v63 }
 0x865   :  { %v2236_v39 = vadd.f32 0.5, %v2235_v55 }
 0x866   :  { %v2240_v41 = vadd.f32 0.5, %v2239_v35  ;;  %v2214_v1 = vpop.f32.mrf.mxu2  ;;  %v2227_v7 = vpop.f32.mrf.mxu3 }
 0x867   :  { %v3416_v54 = vpop.eup %3415  ;;  %v4666_v7 = vld [vmem:[#allocation27_spill] sm:$0xff] }
 0x868   :  { %v2246_v31 = vmul.f32 %v2240_v41, %v4442_v33  ;;  %v2247_v52 = vmul.f32 %v3416_v54, %v2236_v39  ;;  %v1599_v54 = vadd.f32 %v4666_v7, %v4304_v6 }
 0x869   :  { %v3418_v49 = vpop.eup %3417 }
 0x86a   :  { %v4486_v47 = vadd.f32 %v2247_v52, %v2246_v31  ;;  %v2244_v2 = vmul.f32 0.5, %v3418_v49  ;;  %v4667_v31 = vld [vmem:[#allocation26_spill] sm:$0xff] }
 0x86b   :  { %v1628_v52 = vadd.f32 %v4667_v31, %v4306_v18 }
 0x86c   :  { %3419 = vtanh.f32 %v4486_v47  ;;  %v2245_v43 = vadd.f32 0.5, %v2244_v2 }
 0x872   :  { %v3420_v25 = vpop.eup %3419 }
 0x873   :  { %v2250_v51 = vmul.f32 %v3420_v25, %v2245_v43 }
 0x875   :  { %v2255_v13 = vpack.c.bf16 %v2250_v51, %v2250_v51 }
 0x877   :  { %2264 = vmatmul.bf16.vlgmr.msrb.gmra.mxu0 %v2255_v13  ;;  %2277 = vmatmul.bf16.vlgmr.msrb.gmra.mxu1 %v2255_v13 }
 0x878   :  { %2290 = vmatmul.bf16.vlgmr.msrb.gmra.mxu2 %v2255_v13  ;;  %2303 = vmatmul.bf16.vlgmr.msrb.gmra.mxu3 %v2255_v13 }
 0x879   :  { %2414 = vmatpush.bf16.msrb.mxu0 %v4061_v9  ;;  %2427 = vmatpush.bf16.msrb.mxu1 %v4063_v22  ;;  %v4660_v9 = vld [vmem:[#allocation20_spill] sm:$0xff] }
 0x87a   :  { %2440 = vmatpush.bf16.msrb.mxu2 %v4065_v26  ;;  %2453 = vmatpush.bf16.msrb.mxu3 %v4068_v62  ;;  %v1538_v22 = vadd.f32 %v4660_v9, %v4294_v60  ;;  %v4661_v26 = vld [vmem:[#allocation21_spill] sm:$0xff] }
 0x87b   :  { %v1567_v62 = vadd.f32 %v4661_v26, %v4296_v63 }
 0x87d   :  { %2415 = vmatpush.bf16.msrb.mxu0 %v4072_v46  ;;  %2428 = vmatpush.bf16.msrb.mxu1 %v4074_v48 }
 0x87e   :  { %2441 = vmatpush.bf16.msrb.mxu2 %v4077_v4  ;;  %2454 = vmatpush.bf16.msrb.mxu3 %v4079_v36 }
 0x881   :  { %2416 = vmatpush.bf16.msrb.mxu0 %v4082_v29  ;;  %2429 = vmatpush.bf16.msrb.mxu1 %v4086_v23 }
 0x882   :  { %2442 = vmatpush.bf16.msrb.mxu2 %v4088_v40  ;;  %2455 = vmatpush.bf16.msrb.mxu3 %v4098_v0  ;;  %v4662_v40 = vld [vmem:[#allocation22_spill] sm:$0xff] }
 0x883   :  { %v1596_v0 = vadd.f32 %v4662_v40, %v4304_v6 }
 0x885   :  { %2417 = vmatpush.bf16.msrb.mxu0 %v4101_v5  ;;  %2430 = vmatpush.bf16.msrb.mxu1 %v4103_v28  ;;  %v4663_v5 = vld [vmem:[#allocation23_spill] sm:$0xff] }
 0x886   :  { %2443 = vmatpush.bf16.msrb.mxu2 %v4105_v16  ;;  %2456 = vmatpush.bf16.msrb.mxu3 %v4108_v37  ;;  %v1625_v28 = vadd.f32 %v4663_v5, %v4306_v18 }
 0x889   :  { %2418 = vmatpush.bf16.msrb.mxu0 %v4112_v53  ;;  %2431 = vmatpush.bf16.msrb.mxu1 %v4114_v59 }
 0x88a   :  { %2444 = vmatpush.bf16.msrb.mxu2 %v4121_v21  ;;  %2457 = vmatpush.bf16.msrb.mxu3 %v4123_v42 }
 0x88d   :  { %2419 = vmatpush.bf16.msrb.mxu0 %v4126_v30  ;;  %2432 = vmatpush.bf16.msrb.mxu1 %v4130_v58 }
 0x88e   :  { %2445 = vmatpush.bf16.msrb.mxu2 %v4132_v12  ;;  %2458 = vmatpush.bf16.msrb.mxu3 %v4135_v24 }
 0x891   :  { %2420 = vmatpush.bf16.msrb.mxu0 %v4140_v56  ;;  %2433 = vmatpush.bf16.msrb.mxu1 %v4146_v50 }
 0x892   :  { %2446 = vmatpush.bf16.msrb.mxu2 %v4148_v61  ;;  %2459 = vmatpush.bf16.msrb.mxu3 %v4151_v45 }
 0x895   :  { %2421 = vmatpush.bf16.msrb.mxu0 %v4154_v34  ;;  %2434 = vmatpush.bf16.msrb.mxu1 %v4158_v3 }
 0x896   :  { %2447 = vmatpush.bf16.msrb.mxu2 %v4160_v10  ;;  %2460 = vmatpush.bf16.msrb.mxu3 %v4163_v57 }
 0x8f4   :  { %v2265_v46 = vpop.f32.mrf.mxu0  ;;  %v2278_v48 = vpop.f32.mrf.mxu1 }
 0x8f5   :  { %v2308_v4 = vadd.f32 %v2265_v46, %v1538_v22  ;;  %v2309_v36 = vadd.f32 %v2278_v48, %v1567_v62 }
 0x8f7   :  { %v2312_v29 = vmul.f32 0.5, %v2308_v4  ;;  %v2316_v23 = vmul.f32 0.5, %v2309_v36 }
 0x8f9   :  { %3421 = vtanh.f32 %v2312_v29 }
 0x8fa   :  { %3423 = vtanh.f32 %v2316_v23 }
 0x8fb   :  { %v2291_v16 = vpop.f32.mrf.mxu2  ;;  %v2304_v37 = vpop.f32.mrf.mxu3 }
 0x8fc   :  { %v2310_v53 = vadd.f32 %v2291_v16, %v1596_v0  ;;  %v2311_v59 = vadd.f32 %v2304_v37, %v1625_v28  ;;  %v2267_v21 = vpop.f32.mrf.mxu0  ;;  %v2280_v42 = vpop.f32.mrf.mxu1 }
 0x8fd   :  { %v3284_v21 = vld [vmem:[%s4580_s4 + $0x38] sm:$0xff]  ;;  %v3283_v42 = vld [vmem:[%s4580_s4 + $0x30] sm:$0xff] }
 0x8fe   :  { %3425 = vtanh.f32 %v2310_v53  ;;  %v2321_v30 = vmul.f32 0.5, %v2311_v59 }
 0x8ff   :  { %v3422_v58 = vpop.eup %3421 }
 0x900   :  { %v3424_v12 = vpop.eup %3423  ;;  %v2314_v24 = vmul.f32 0.5, %v3422_v58  ;;  %3427 = vtanh.f32 %v2321_v30  ;;  %v3282_v30 = vld [vmem:[%s4580_s4 + $0x28] sm:$0xff]  ;;  %v3281_v58 = vld [vmem:[%s4580_s4 + $0x20] sm:$0xff] }
 0x901   :  { %v2318_v56 = vmul.f32 0.5, %v3424_v12  ;;  %v3280_v12 = vld [vmem:[%s4580_s4 + $0x18] sm:$0xff] }
 0x902   :  { %v2315_v50 = vadd.f32 0.5, %v2314_v24  ;;  %v3279_v24 = vld [vmem:[%s4580_s4 + $0x10] sm:$0xff] }
 0x903   :  { %v2319_v61 = vadd.f32 0.5, %v2318_v56  ;;  %v2293_v45 = vpop.f32.mrf.mxu2  ;;  %v2306_v34 = vpop.f32.mrf.mxu3  ;;  %v3278_v56 = vld [vmem:[%s4580_s4 + $0x8] sm:$0xff] }
 0x904   :  { %v3426_v3 = vpop.eup %3425  ;;  %v4669_v34 = vld [vmem:[#allocation29_spill] sm:$0xff] }
 0x905   :  { %v2325_v10 = vmul.f32 %v2319_v61, %v4486_v47  ;;  %v2326_v57 = vmul.f32 %v3426_v3, %v2315_v50  ;;  %v3277_v50 = vld [vmem:[%s4580_s4] sm:$0xff]  ;;  %v4668_v61 = vld [vmem:[#allocation28_spill] sm:$0xff]  ;;  %v1572_v3 = vadd.f32 %v4669_v34, %v4296_v63 }
 0x906   :  { %v3428_v33 = vpop.eup %3427  ;;  %v1543_v45 = vadd.f32 %v4668_v61, %v4294_v60 }
 0x907   :  { %v2327_v32 = vadd.f32 %v2326_v57, %v2325_v10  ;;  %v2323_v20 = vmul.f32 0.5, %v3428_v33 }
 0x909   :  { %3429 = vtanh.f32 %v2327_v32  ;;  %v2324_v27 = vadd.f32 0.5, %v2323_v20 }
 0x90f   :  { %v3430_v15 = vpop.eup %3429 }
 0x910   :  { %v2329_v8 = vmul.f32 %v3430_v15, %v2324_v27  ;;  %v4670_v15 = vld [vmem:[#allocation30_spill] sm:$0xff] }
 0x912   :  { %v2334_v19 = vpack.c.bf16 %v2329_v8, %v2329_v8  ;;  %v1601_v8 = vadd.f32 %v4670_v15, %v4304_v6 }
 0x914   :  { %2343 = vmatmul.bf16.vlgmr.msra.gmra.mxu0 %v2334_v19  ;;  %2356 = vmatmul.bf16.vlgmr.msra.gmra.mxu1 %v2334_v19 }
 0x915   :  { %2369 = vmatmul.bf16.vlgmr.msra.gmra.mxu2 %v2334_v19  ;;  %2382 = vmatmul.bf16.vlgmr.msra.gmra.mxu3 %v2334_v19  ;;  %v4671_v19 = vld [vmem:[#allocation31_spill] sm:$0xff] }
 0x916   :  { %2557 = vmatpush.bf16.msra.mxu0 %v3284_v21  ;;  %v1630_v44 = vadd.f32 %v4671_v19, %v4306_v18 }
 0x91a   :  { %2558 = vmatpush.bf16.msra.mxu0 %v3283_v42 }
 0x91e   :  { %2559 = vmatpush.bf16.msra.mxu0 %v3282_v30 }
 0x922   :  { %2560 = vmatpush.bf16.msra.mxu0 %v3281_v58 }
 0x926   :  { %2561 = vmatpush.bf16.msra.mxu0 %v3280_v12 }
 0x92a   :  { %2562 = vmatpush.bf16.msra.mxu0 %v3279_v24 }
 0x92e   :  { %2563 = vmatpush.bf16.msra.mxu0 %v3278_v56 }
 0x932   :  { %2564 = vmatpush.bf16.msra.mxu0 %v3277_v50 }
 0x991   :  { %v2344_v14 = vpop.f32.mrf.mxu0  ;;  %v2357_v55 = vpop.f32.mrf.mxu1 }
 0x992   :  { %v2387_v35 = vadd.f32 %v2344_v14, %v1541_v11  ;;  %v2388_v39 = vadd.f32 %v2357_v55, %v1570_v38 }
 0x994   :  { %v2391_v41 = vmul.f32 0.5, %v2387_v35  ;;  %v2395_v1 = vmul.f32 0.5, %v2388_v39 }
 0x996   :  { %3431 = vtanh.f32 %v2391_v41 }
 0x997   :  { %3433 = vtanh.f32 %v2395_v1 }
 0x998   :  { %v2370_v49 = vpop.f32.mrf.mxu2  ;;  %v2383_v47 = vpop.f32.mrf.mxu3 }
 0x999   :  { %v2389_v2 = vadd.f32 %v2370_v49, %v1599_v54  ;;  %v2390_v43 = vadd.f32 %v2383_v47, %v1628_v52  ;;  %v2346_v25 = vpop.f32.mrf.mxu0  ;;  %v2359_v51 = vpop.f32.mrf.mxu1 }
 0x99b   :  { %3435 = vtanh.f32 %v2389_v2  ;;  %v2400_v13 = vmul.f32 0.5, %v2390_v43 }
 0x99c   :  { %v3432_v9 = vpop.eup %3431 }
 0x99d   :  { %v3434_v22 = vpop.eup %3433  ;;  %v2393_v26 = vmul.f32 0.5, %v3432_v9  ;;  %3437 = vtanh.f32 %v2400_v13 }
 0x99e   :  { %v2397_v62 = vmul.f32 0.5, %v3434_v22  ;;  %v3290_v22 = vld [vmem:[%s4581_s5] ss:$0 sm:$0xff] }
 0x99f   :  { %v2394_v46 = vadd.f32 0.5, %v2393_v26 }
 0x9a0   :  { %v2398_v48 = vadd.f32 0.5, %v2397_v62  ;;  %v2372_v4 = vpop.f32.mrf.mxu2  ;;  %v2385_v36 = vpop.f32.mrf.mxu3 }
 0x9a1   :  { %v3436_v29 = vpop.eup %3435 }
 0x9a2   :  { %v2404_v23 = vmul.f32 %v2398_v48, %v2327_v32  ;;  %v2405_v40 = vmul.f32 %v3436_v29, %v2394_v46 }
 0x9a3   :  { %v3438_v0 = vpop.eup %3437 }
 0x9a4   :  { %v2406_v5 = vadd.f32 %v2405_v40, %v2404_v23  ;;  %v2402_v28 = vmul.f32 0.5, %v3438_v0 }
 0x9a6   :  { %3439 = vtanh.f32 %v2406_v5  ;;  %v2403_v16 = vadd.f32 0.5, %v2402_v28 }
 0x9ac   :  { %v3440_v37 = vpop.eup %3439 }
 0x9ad   :  { %v2408_v53 = vmul.f32 %v3440_v37, %v2403_v16 }
 0x9af   :  { %v2413_v59 = vpack.c.bf16 %v2408_v53, %v2408_v53 }
 0x9b1   :  { %2422 = vmatmul.bf16.vlgmr.msrb.gmra.mxu0 %v2413_v59  ;;  %2435 = vmatmul.bf16.vlgmr.msrb.gmra.mxu1 %v2413_v59 }
 0x9b2   :  { %2448 = vmatmul.bf16.vlgmr.msrb.gmra.mxu2 %v2413_v59  ;;  %2461 = vmatmul.bf16.vlgmr.msrb.gmra.mxu3 %v2413_v59 }
 0xa2e   :  { %v2423_v10 = vpop.f32.mrf.mxu0  ;;  %v2436_v57 = vpop.f32.mrf.mxu1 }
 0xa2f   :  { %v2466_v33 = vadd.f32 %v2423_v10, %v1543_v45  ;;  %v2467_v32 = vadd.f32 %v2436_v57, %v1572_v3 }
 0xa31   :  { %v2470_v20 = vmul.f32 0.5, %v2466_v33  ;;  %v2474_v27 = vmul.f32 0.5, %v2467_v32 }
 0xa33   :  { %3441 = vtanh.f32 %v2470_v20 }
 0xa34   :  { %3443 = vtanh.f32 %v2474_v27 }
 0xa35   :  { %v2449_v11 = vpop.f32.mrf.mxu2  ;;  %v2462_v17 = vpop.f32.mrf.mxu3 }
 0xa36   :  { %v2468_v60 = vadd.f32 %v2449_v11, %v1601_v8  ;;  %v2469_v38 = vadd.f32 %v2462_v17, %v1630_v44  ;;  %v2425_v14 = vpop.f32.mrf.mxu0  ;;  %v2438_v63 = vpop.f32.mrf.mxu1 }
 0xa38   :  { %3445 = vtanh.f32 %v2468_v60  ;;  %v2479_v55 = vmul.f32 0.5, %v2469_v38 }
 0xa39   :  { %v3442_v35 = vpop.eup %3441 }
 0xa3a   :  { %v3444_v39 = vpop.eup %3443  ;;  %v2472_v41 = vmul.f32 0.5, %v3442_v35  ;;  %3447 = vtanh.f32 %v2479_v55 }
 0xa3b   :  { %v2476_v1 = vmul.f32 0.5, %v3444_v39 }
 0xa3c   :  { %v2473_v7 = vadd.f32 0.5, %v2472_v41 }
 0xa3d   :  { %v2477_v54 = vadd.f32 0.5, %v2476_v1  ;;  %v2451_v6 = vpop.f32.mrf.mxu2  ;;  %v2464_v31 = vpop.f32.mrf.mxu3 }
 0xa3e   :  { %v3446_v52 = vpop.eup %3445 }
 0xa3f   :  { %v2483_v18 = vmul.f32 %v2477_v54, %v2406_v5  ;;  %v2484_v49 = vmul.f32 %v3446_v52, %v2473_v7 }
 0xa40   :  { %v3448_v47 = vpop.eup %3447 }
 0xa41   :  { %v2485_v2 = vadd.f32 %v2484_v49, %v2483_v18  ;;  %v2481_v43 = vmul.f32 0.5, %v3448_v47 }
 0xa43   :  { %3449 = vtanh.f32 %v2485_v2  ;;  %v2482_v25 = vadd.f32 0.5, %v2481_v43 }
 0xa49   :  { %v3450_v51 = vpop.eup %3449 }
 0xa4a   :  { %v2487_v13 = vmul.f32 %v3450_v51, %v2482_v25 }
 0xa4c   :  { %v2488_v9 = vpack.c.bf16 %v2487_v13, %v2487_v13 }
 0xa4e   :  { %2565 = vmatmul.bf16.vlgmr.msra.gmra.mxu0 %v2488_v9 }
 0xacb   :  { %v2566_v26 = vpop.f32.mrf.mxu0 }
 0xacc   :  { %v2567_v62 = vadd.f32 %v3290_v22, %v2566_v26 }
 0xace   :  { %2570 = vst [vmem:[%s4582_s6] sm:$0xff] %v2567_v62 }
 0xad3   :  { %v2568_v46 = vpop.f32.mrf.mxu0 }
 0xad4   :  { %2575 = vsyncpa [#allocation5], 1 }
 0xad5   :  { %2576 = vsyncpa [#allocation7], 1 }

</bundles_post_ra>
